<compile_context>
chip_gen: v7x
topology: tpu7x:2x2x1
jax: 0.10.0
libtpu: 0.0.40
codegen_flags: <defaults>
</compile_context>

<pallas_src>
import functools
import math

import jax
import jax.numpy as jnp
from jax.experimental import pallas as pl
from jax.experimental.pallas import tpu as pltpu


def _round_up(v, m):
    return ((v + m - 1) // m) * m


def _largest_divisor_leq(n, cap):
    cap = max(1, min(n, int(cap)))
    for d in range(cap, 0, -1):
        if n % d == 0:
            return d
    return 1


def _vmem_info():
    """Returns (vmem_limit_bytes, user_block_budget_bytes, num_tensorcores)."""
    phys = None
    cores = 1
    try:
        info = pltpu.get_tpu_info()
        phys = getattr(info, "vmem_capacity_bytes", None)
        for name in ("num_cores", "tensorcore_count", "num_tensorcores",
                     "cores_per_chip"):
            v = getattr(info, name, None)
            if v:
                cores = int(v)
                break
    except Exception:
        phys = None
    if not phys:
        phys = 64 * 1024 * 1024        # conservative default = v7x per-TC VMEM
    phys = int(phys)
    limit = (phys * 3) // 4            # headroom for compiler-internal scratch
    budget = limit // 2                # user blocks (double-buffered) + slab + temps
    return limit, budget, cores


def _graphconv_kernel(x_ref, s_ref, w_ref, b_ref, o_ref, slab_ref, *,
                      tb0, tb1, finp, fe, k1, fused):
    """One grid step = a (tb0, tb1) tile of (batch, time) pairs.

    x_ref   : (tb0, tb1, FinP, Np)                padded input signals
    s_ref   : (1, 1, Fe, Np, Np)   if `fused`     one shift operator per step
              (tb0, tb1, Fe, Np, Np) otherwise    per-pair shift operators
    w_ref   : (Fout, Fe*K1*FinP)                  flattened, Fin-zero-padded taps
    b_ref   : (Fout, 1)                           bias
    o_ref   : (tb0, tb1, Fout, Np)                output (lane axis = Np, dense)
    slab_ref: (tb0*tb1, Fe*K1*FinP, Np) f32       per-pair [X S_e^k] stacks
    """
    tbp = tb0 * tb1
    npad = x_ref.shape[-1]

    w = w_ref[...].astype(jnp.float32)                       # (Fout, FKF)
    bias = jnp.broadcast_to(b_ref[...].astype(jnp.float32),  # hoisted broadcast
                            (w.shape[0], npad))

    if fused:
        # Shift operator shared by every pair of this block: stack all pairs'
        # signals so each chain step is ONE (tbp*FinP, Np)@(Np, Np) MXU matmul.
        x2 = x_ref[...].astype(jnp.float32).reshape(tbp * finp, npad)
        for e in range(fe):
            s = s_ref[0, 0, e].astype(jnp.float32)            # (Np, Np)
            cur = x2                                          # X S_e^0
            for k in range(k1):
                blk = e * k1 + k
                slab_ref[:, blk * finp:(blk + 1) * finp, :] = (
                    cur.reshape(tbp, finp, npad))             # 8-row aligned store
                if k + 1 < k1:
                    cur = jnp.dot(cur, s, preferred_element_type=jnp.float32)
    else:
        # Fully batch+time varying graphs: this path is HBM-bound on streaming S,
        # so the narrow per-pair chain matmuls hide behind the graph DMAs.
        # TODO(synk): express the per-pair chain as a 2-batch-dim dot_general if
        # MXU fill ever becomes the bottleneck on this path.
        for p0 in range(tb0):
            for p1 in range(tb1):
                p = p0 * tb1 + p1
                xv = x_ref[p0, p1].astype(jnp.float32)        # (FinP, Np)
                for e in range(fe):
                    s = s_ref[p0, p1, e].astype(jnp.float32)  # (Np, Np)
                    cur = xv
                    for k in range(k1):
                        blk = e * k1 + k
                        slab_ref[p, blk * finp:(blk + 1) * finp, :] = cur
                        if k + 1 < k1:
                            cur = jnp.dot(cur, s,
                                          preferred_element_type=jnp.float32)

    # Fused tap contraction per pair: one (Fout, FKF)@(FKF, Np>=128) matmul with
    # dense lane stores, instead of Fe*(K+1) tiny Fin-deep matmuls.
    for p0 in range(tb0):
        for p1 in range(tb1):
            p = p0 * tb1 + p1
            y = jnp.dot(w, slab_ref[p], preferred_element_type=jnp.float32) + bias
            o_ref[p0, p1] = y.astype(o_ref.dtype)


def graph_conv_pallas(x, graph, weight, bias=None, *, graph_stream_dtype=None):
    """x: (B,T,Fin,N); graph: (Gb,Gt,Fe,N,N) with Gb in {1,B}, Gt in {1,T};
    weight: (Fout,Fe,K+1,Fin); bias: (Fout,1) or None.

    graph_stream_dtype: optionally stream S in a narrower dtype (e.g. bf16) to
    halve HBM traffic on the bandwidth-bound per-pair-graph path (the chain is
    still accumulated in f32 inside the kernel). Default: keep input dtype.
    """
    assert x.ndim == 4 and graph.ndim == 5 and weight.ndim == 4
    B, T, Fin, N = x.shape
    Gb, Gt = graph.shape[0], graph.shape[1]
    assert Gb in (1, B) and Gt in (1, T)
    Fout, Fe, K1, Fin_w = weight.shape
    assert Fin_w == Fin and graph.shape[2] == Fe
    assert graph.shape[3] == N and graph.shape[4] == N
    if bias is not None:
        assert bias.shape == (Fout, 1)

    # ---- padded, lane/sublane-aligned layouts (zero padding is exact) --------
    Npad = _round_up(N, 128)          # lane axis: dense stores / MXU columns
    FinP = _round_up(Fin, 8)          # sublane axis: aligned slab row blocks
    FKF = Fe * K1 * FinP

    x_p = x
    if (FinP, Npad) != (Fin, N):
        x_p = jnp.pad(x, ((0, 0), (0, 0), (0, FinP - Fin), (0, Npad - N)))
    g_p = graph
    if Npad != N:
        g_p = jnp.pad(graph, ((0, 0), (0, 0), (0, 0), (0, Npad - N), (0, Npad - N)))
    if graph_stream_dtype is not None:
        g_p = g_p.astype(graph_stream_dtype)
    w_p = weight
    if FinP != Fin:
        w_p = jnp.pad(weight, ((0, 0), (0, 0), (0, 0), (0, FinP - Fin)))
    w_k = w_p.reshape(Fout, FKF)      # column order (e, k, fin) matches the slab
    b_k = bias if bias is not None else jnp.zeros((Fout, 1), x.dtype)

    # ---- graph sharing mode ----------------------------------------------------
    gb_varies = (Gb == B) and (B > 1)
    gt_varies = (Gt == T) and (T > 1)
    if gb_varies and gt_varies:
        mode = 3                      # one graph per (b, t) pair
    elif gb_varies:
        mode = 1                      # graph varies with b only
    elif gt_varies:
        mode = 2                      # graph varies with t only
    else:
        mode = 0                      # one shared graph
    fused = mode != 3                 # graph constant within a block -> fused chain

    # ---- tile planning (generation-aware VMEM budget, padded shapes) -----------
    limit, budget, cores = _vmem_info()
    FoutP = _round_up(Fout, 8)
    itemsize = jnp.dtype(x.dtype).itemsize
    g_itemsize = jnp.dtype(g_p.dtype).itemsize
    per_pair = (FinP * Npad * itemsize * 2          # x block  (double-buffered)
                + FoutP * Npad * itemsize * 2       # o block  (double-buffered)
                + FKF * Npad * 4)                   # f32 slab (single buffer)
    fixed = (FoutP * _round_up(FKF, 128) * 4 * 2    # weight
             + 8 * 128 * 4 * 2)                     # bias
    graph_cost = Fe * Npad * Npad * g_itemsize * 2  # double-buffered
    if mode == 3:
        per_pair += graph_cost                      # per-pair graph streaming
        pair_cap = 8                                # keep per-pair unroll small
    else:
        fixed += graph_cost                         # per-step resident graph
        pair_cap = 32
    tbp_max = max(1, min(pair_cap, (budget - fixed) // per_pair))

    if mode == 1:                     # one b per block (graph fixed within block)
        tb0, tb1 = 1, _largest_divisor_leq(T, tbp_max)
    elif mode == 2:                   # one t per block
        tb0, tb1 = _largest_divisor_leq(B, tbp_max), 1
    else:
        tb1 = _largest_divisor_leq(T, tbp_max)
        tb0 = _largest_divisor_leq(B, max(1, tbp_max // tb1))
        if mode == 0 and cores >= 2 and (B // tb0) * (T // tb1) < 2:
            # keep >=2 grid steps so "parallel" can shard across TensorCores
            if B >= 2:
                tb0 = _largest_divisor_leq(B, max(1, B // 2))
            elif T >= 2:
                tb1 = _largest_divisor_leq(T, max(1, T // 2))

    # ---- grid & specs -----------------------------------------------------------
    if mode == 2:
        # graph-varying axis (t) outermost -> each S is DMA'd exactly once
        grid = (T // tb1, B // tb0)
        x_idx = lambda i, j: (j, i, 0, 0)
        g_idx = lambda i, j: (0, i, 0, 0, 0)
    else:
        grid = (B // tb0, T // tb1)
        x_idx = lambda i, j: (i, j, 0, 0)
        if mode == 0:
            g_idx = lambda i, j: (0, 0, 0, 0, 0)     # DMA'd once, reused every step
        elif mode == 1:
            g_idx = lambda i, j: (i, 0, 0, 0, 0)     # re-DMA'd only when b changes
        else:
            g_idx = lambda i, j: (i, j, 0, 0, 0)     # streamed per pair block

    g_block = ((tb0, tb1, Fe, Npad, Npad) if mode == 3
               else (1, 1, Fe, Npad, Npad))

    kernel = functools.partial(_graphconv_kernel, tb0=tb0, tb1=tb1, finp=FinP,
                               fe=Fe, k1=K1, fused=fused)

    out = pl.pallas_call(
        kernel,
        out_shape=jax.ShapeDtypeStruct((B, T, Fout, Npad), x.dtype),
        grid_spec=pltpu.PrefetchScalarGridSpec(
            num_scalar_prefetch=0,
            grid=grid,
            in_specs=[
                pl.BlockSpec((tb0, tb1, FinP, Npad), x_idx),
                pl.BlockSpec(g_block, g_idx),
                pl.BlockSpec((Fout, FKF), lambda i, j: (0, 0)),
                pl.BlockSpec((Fout, 1), lambda i, j: (0, 0)),
            ],
            out_specs=pl.BlockSpec((tb0, tb1, Fout, Npad), x_idx),
            scratch_shapes=[pltpu.VMEM((tb0 * tb1, FKF, Npad), jnp.float32)],
        ),
        compiler_params=pltpu.CompilerParams(
            dimension_semantics=("parallel", "arbitrary"),
            vmem_limit_bytes=limit,
        ),
    )(x_p, g_p, w_k, b_k)

    if Npad != N:
        out = out[..., :N]            # drop the zero-padded node columns
    return out


def graph_conv_ref(x, graph, weight, bias=None):
    """Pure-JAX transcription of the PyTorch graphConv (correctness check)."""
    B, T, Fin, N = x.shape
    Fout, Fe, K1, _ = weight.shape
    hp = jax.lax.Precision.HIGHEST
    g = jnp.broadcast_to(graph, (B, T, Fe, N, N))
    cur = jnp.broadcast_to(x[:, :, None], (B, T, Fe, Fin, N))          # X S_e^0
    outs = [cur]
    for _ in range(K1 - 1):
        cur = jnp.matmul(cur, g, precision=hp)                         # X S_e^k
        outs.append(cur)
    z = jnp.stack(outs, axis=3)                                        # (B,T,Fe,K1,Fin,N)
    y = jnp.einsum('oekf,btekfn->bton', weight, z, precision=hp)       # (B,T,Fout,N)
    if bias is not None:
        y = y + bias
    return y


if __name__ == "__main__":
    # small, module-consistent shapes
    B, T, Fin, Fout, N, Fe, K = 2, 3, 4, 8, 16, 2, 3
    K1 = K + 1
    key = jax.random.PRNGKey(0)
    kx, kg, kw, kb = jax.random.split(key, 4)

    x = jax.random.normal(kx, (B, T, Fin, N), dtype=jnp.float32)
    graph = jax.random.normal(kg, (B, T, Fe, N, N), dtype=jnp.float32) / math.sqrt(N)

    # deterministic parameter init mirroring reset_parameters()
    fan_in = Fe * K1 * Fin
    w_bound = math.sqrt(6.0 / fan_in) / math.sqrt(1.0 + 5.0)  # kaiming_uniform, a=sqrt(5)
    weight = jax.random.uniform(kw, (Fout, Fe, K1, Fin),
                                minval=-w_bound, maxval=w_bound, dtype=jnp.float32)
    b_bound = 1.0 / math.sqrt(fan_in)
    bias = jax.random.uniform(kb, (Fout, 1), minval=-b_bound, maxval=b_bound,
                              dtype=jnp.float32)

    # exercise all four graph-sharing paths (per-pair, shared, batch-only, time-only)
    cases = [
        ("per-pair graph (B,T)", graph),
        ("shared graph (1,1)", graph[:1, :1]),
        ("batch-varying graph (B,1)", graph[:, :1]),
        ("time-varying graph (1,T)", graph[:1, :]),
    ]
    for name, g in cases:
        y = jax.block_until_ready(graph_conv_pallas(x, g, weight, bias))
        y_ref = jax.block_until_ready(graph_conv_ref(x, g, weight, bias))
        assert y.shape == (B, T, Fout, N), (name, y.shape)
        err = float(jnp.max(jnp.abs(y - y_ref)))
        assert jnp.allclose(y, y_ref, atol=1e-4, rtol=1e-4), (name, err)

    print("KERNEL_OK")
</pallas_src>

<mosaic_0001>
module attributes {stable_mosaic.version = 11 : i64} {
  func.func @_graphconv_kernel(%arg0: i32, %arg1: i32, %arg2: memref<2x3x8x128xf32, #tpu.memory_space<vmem>>, %arg3: memref<2x3x2x128x128xf32, #tpu.memory_space<vmem>>, %arg4: memref<8x64xf32, #tpu.memory_space<vmem>>, %arg5: memref<8x1xf32, #tpu.memory_space<vmem>>, %arg6: memref<2x3x8x128xf32, #tpu.memory_space<vmem>>, %arg7: memref<6x64x128xf32, #tpu.memory_space<vmem>>) attributes {dimension_semantics = [#tpu.dimension_semantics<parallel>, #tpu.dimension_semantics<arbitrary>], iteration_bounds = array<i64: 1, 1>, scalar_prefetch = 0 : i64, scratch_operands = 1 : i64, tpu.core_type = #tpu.core_type<tc>, window_params = [{transform_indices = @transform_0, window_bounds = array<i64: 2, 3, 8, 128>}, {transform_indices = @transform_1, window_bounds = array<i64: 2, 3, 2, 128, 128>}, {pipeline_mode = #tpu.pipeline_mode<synchronous>, transform_indices = @transform_2, window_bounds = array<i64: 8, 64>}, {pipeline_mode = #tpu.pipeline_mode<synchronous>, transform_indices = @transform_3, window_bounds = array<i64: 8, 1>}, {transform_indices = @transform_4, window_bounds = array<i64: 2, 3, 8, 128>}]} {
    %c0 = arith.constant 0 : index
    %c0_0 = arith.constant 0 : index
    %0 = vector.load %arg4[%c0, %c0_0] : memref<8x64xf32, #tpu.memory_space<vmem>>, vector<8x64xf32>
    %c0_1 = arith.constant 0 : index
    %c0_2 = arith.constant 0 : index
    %1 = vector.load %arg5[%c0_1, %c0_2] : memref<8x1xf32, #tpu.memory_space<vmem>>, vector<8x1xf32>
    %2 = vector.shape_cast %1 : vector<8x1xf32> to vector<8x1xf32>
    %3 = vector.broadcast %2 : vector<8x1xf32> to vector<8x128xf32>
    %c0_3 = arith.constant 0 : index
    %c0_4 = arith.constant 0 : index
    %c0_5 = arith.constant 0 : index
    %c0_6 = arith.constant 0 : index
    %4 = vector.load %arg2[%c0_3, %c0_4, %c0_5, %c0_6] : memref<2x3x8x128xf32, #tpu.memory_space<vmem>>, vector<1x1x8x128xf32>
    %5 = vector.shape_cast %4 : vector<1x1x8x128xf32> to vector<8x128xf32>
    %c0_7 = arith.constant 0 : index
    %c0_8 = arith.constant 0 : index
    %c0_9 = arith.constant 0 : index
    %c0_10 = arith.constant 0 : index
    %c0_11 = arith.constant 0 : index
    %6 = vector.load %arg3[%c0_7, %c0_8, %c0_9, %c0_10, %c0_11] : memref<2x3x2x128x128xf32, #tpu.memory_space<vmem>>, vector<1x1x1x128x128xf32>
    %7 = vector.shape_cast %6 : vector<1x1x1x128x128xf32> to vector<128x128xf32>
    %c0_12 = arith.constant 0 : index
    %c0_13 = arith.constant 0 : index
    %c0_14 = arith.constant 0 : index
    %8 = vector.load %arg7[%c0_12, %c0_13, %c0_14] : memref<6x64x128xf32, #tpu.memory_space<vmem>>, vector<1x8x128xf32>
    %9 = vector.shape_cast %8 : vector<1x8x128xf32> to vector<8x128xf32>
    %10 = vector.shape_cast %5 : vector<8x128xf32> to vector<1x8x128xf32>
    tpu.vector_store %arg7[%c0_12, %c0_13, %c0_14], %10 {strides = array<i32>} : memref<6x64x128xf32, #tpu.memory_space<vmem>>, vector<1x8x128xf32>,
    %cst = arith.constant dense<0.000000e+00> : vector<8x128xf32>
    %11 = tpu.matmul %5, %7, %cst {dimension_numbers = #tpu.dot_dimension_numbers<[1], [0], [0], [1], [0, 0, 1, 1], [], []>} : vector<8x128xf32>, vector<128x128xf32>, vector<8x128xf32> -> vector<8x128xf32>
    %c0_15 = arith.constant 0 : index
    %c8 = arith.constant 8 : index
    %c0_16 = arith.constant 0 : index
    %12 = vector.load %arg7[%c0_15, %c8, %c0_16] : memref<6x64x128xf32, #tpu.memory_space<vmem>>, vector<1x8x128xf32>
    %13 = vector.shape_cast %12 : vector<1x8x128xf32> to vector<8x128xf32>
    %14 = vector.shape_cast %11 : vector<8x128xf32> to vector<1x8x128xf32>
    tpu.vector_store %arg7[%c0_15, %c8, %c0_16], %14 {strides = array<i32>} : memref<6x64x128xf32, #tpu.memory_space<vmem>>, vector<1x8x128xf32>,
    %cst_17 = arith.constant dense<0.000000e+00> : vector<8x128xf32>
    %15 = tpu.matmul %11, %7, %cst_17 {dimension_numbers = #tpu.dot_dimension_numbers<[1], [0], [0], [1], [0, 0, 1, 1], [], []>} : vector<8x128xf32>, vector<128x128xf32>, vector<8x128xf32> -> vector<8x128xf32>
    %c0_18 = arith.constant 0 : index
    %c16 = arith.constant 16 : index
    %c0_19 = arith.constant 0 : index
    %16 = vector.load %arg7[%c0_18, %c16, %c0_19] : memref<6x64x128xf32, #tpu.memory_space<vmem>>, vector<1x8x128xf32>
    %17 = vector.shape_cast %16 : vector<1x8x128xf32> to vector<8x128xf32>
    %18 = vector.shape_cast %15 : vector<8x128xf32> to vector<1x8x128xf32>
    tpu.vector_store %arg7[%c0_18, %c16, %c0_19], %18 {strides = array<i32>} : memref<6x64x128xf32, #tpu.memory_space<vmem>>, vector<1x8x128xf32>,
    %cst_20 = arith.constant dense<0.000000e+00> : vector<8x128xf32>
    %19 = tpu.matmul %15, %7, %cst_20 {dimension_numbers = #tpu.dot_dimension_numbers<[1], [0], [0], [1], [0, 0, 1, 1], [], []>} : vector<8x128xf32>, vector<128x128xf32>, vector<8x128xf32> -> vector<8x128xf32>
    %c0_21 = arith.constant 0 : index
    %c24 = arith.constant 24 : index
    %c0_22 = arith.constant 0 : index
    %20 = vector.load %arg7[%c0_21, %c24, %c0_22] : memref<6x64x128xf32, #tpu.memory_space<vmem>>, vector<1x8x128xf32>
    %21 = vector.shape_cast %20 : vector<1x8x128xf32> to vector<8x128xf32>
    %22 = vector.shape_cast %19 : vector<8x128xf32> to vector<1x8x128xf32>
    tpu.vector_store %arg7[%c0_21, %c24, %c0_22], %22 {strides = array<i32>} : memref<6x64x128xf32, #tpu.memory_space<vmem>>, vector<1x8x128xf32>,
    %c0_23 = arith.constant 0 : index
    %c0_24 = arith.constant 0 : index
    %c1 = arith.constant 1 : index
    %c0_25 = arith.constant 0 : index
    %c0_26 = arith.constant 0 : index
    %23 = vector.load %arg3[%c0_23, %c0_24, %c1, %c0_25, %c0_26] : memref<2x3x2x128x128xf32, #tpu.memory_space<vmem>>, vector<1x1x1x128x128xf32>
    %24 = vector.shape_cast %23 : vector<1x1x1x128x128xf32> to vector<128x128xf32>
    %c0_27 = arith.constant 0 : index
    %c32 = arith.constant 32 : index
    %c0_28 = arith.constant 0 : index
    %25 = vector.load %arg7[%c0_27, %c32, %c0_28] : memref<6x64x128xf32, #tpu.memory_space<vmem>>, vector<1x8x128xf32>
    %26 = vector.shape_cast %25 : vector<1x8x128xf32> to vector<8x128xf32>
    %27 = vector.shape_cast %5 : vector<8x128xf32> to vector<1x8x128xf32>
    tpu.vector_store %arg7[%c0_27, %c32, %c0_28], %27 {strides = array<i32>} : memref<6x64x128xf32, #tpu.memory_space<vmem>>, vector<1x8x128xf32>,
    %cst_29 = arith.constant dense<0.000000e+00> : vector<8x128xf32>
    %28 = tpu.matmul %5, %24, %cst_29 {dimension_numbers = #tpu.dot_dimension_numbers<[1], [0], [0], [1], [0, 0, 1, 1], [], []>} : vector<8x128xf32>, vector<128x128xf32>, vector<8x128xf32> -> vector<8x128xf32>
    %c0_30 = arith.constant 0 : index
    %c40 = arith.constant 40 : index
    %c0_31 = arith.constant 0 : index
    %29 = vector.load %arg7[%c0_30, %c40, %c0_31] : memref<6x64x128xf32, #tpu.memory_space<vmem>>, vector<1x8x128xf32>
    %30 = vector.shape_cast %29 : vector<1x8x128xf32> to vector<8x128xf32>
    %31 = vector.shape_cast %28 : vector<8x128xf32> to vector<1x8x128xf32>
    tpu.vector_store %arg7[%c0_30, %c40, %c0_31], %31 {strides = array<i32>} : memref<6x64x128xf32, #tpu.memory_space<vmem>>, vector<1x8x128xf32>,
    %cst_32 = arith.constant dense<0.000000e+00> : vector<8x128xf32>
    %32 = tpu.matmul %28, %24, %cst_32 {dimension_numbers = #tpu.dot_dimension_numbers<[1], [0], [0], [1], [0, 0, 1, 1], [], []>} : vector<8x128xf32>, vector<128x128xf32>, vector<8x128xf32> -> vector<8x128xf32>
    %c0_33 = arith.constant 0 : index
    %c48 = arith.constant 48 : index
    %c0_34 = arith.constant 0 : index
    %33 = vector.load %arg7[%c0_33, %c48, %c0_34] : memref<6x64x128xf32, #tpu.memory_space<vmem>>, vector<1x8x128xf32>
    %34 = vector.shape_cast %33 : vector<1x8x128xf32> to vector<8x128xf32>
    %35 = vector.shape_cast %32 : vector<8x128xf32> to vector<1x8x128xf32>
    tpu.vector_store %arg7[%c0_33, %c48, %c0_34], %35 {strides = array<i32>} : memref<6x64x128xf32, #tpu.memory_space<vmem>>, vector<1x8x128xf32>,
    %cst_35 = arith.constant dense<0.000000e+00> : vector<8x128xf32>
    %36 = tpu.matmul %32, %24, %cst_35 {dimension_numbers = #tpu.dot_dimension_numbers<[1], [0], [0], [1], [0, 0, 1, 1], [], []>} : vector<8x128xf32>, vector<128x128xf32>, vector<8x128xf32> -> vector<8x128xf32>
    %c0_36 = arith.constant 0 : index
    %c56 = arith.constant 56 : index
    %c0_37 = arith.constant 0 : index
    %37 = vector.load %arg7[%c0_36, %c56, %c0_37] : memref<6x64x128xf32, #tpu.memory_space<vmem>>, vector<1x8x128xf32>
    %38 = vector.shape_cast %37 : vector<1x8x128xf32> to vector<8x128xf32>
    %39 = vector.shape_cast %36 : vector<8x128xf32> to vector<1x8x128xf32>
    tpu.vector_store %arg7[%c0_36, %c56, %c0_37], %39 {strides = array<i32>} : memref<6x64x128xf32, #tpu.memory_space<vmem>>, vector<1x8x128xf32>,
    %c0_38 = arith.constant 0 : index
    %c1_39 = arith.constant 1 : index
    %c0_40 = arith.constant 0 : index
    %c0_41 = arith.constant 0 : index
    %40 = vector.load %arg2[%c0_38, %c1_39, %c0_40, %c0_41] : memref<2x3x8x128xf32, #tpu.memory_space<vmem>>, vector<1x1x8x128xf32>
    %41 = vector.shape_cast %40 : vector<1x1x8x128xf32> to vector<8x128xf32>
    %c0_42 = arith.constant 0 : index
    %c1_43 = arith.constant 1 : index
    %c0_44 = arith.constant 0 : index
    %c0_45 = arith.constant 0 : index
    %c0_46 = arith.constant 0 : index
    %42 = vector.load %arg3[%c0_42, %c1_43, %c0_44, %c0_45, %c0_46] : memref<2x3x2x128x128xf32, #tpu.memory_space<vmem>>, vector<1x1x1x128x128xf32>
    %43 = vector.shape_cast %42 : vector<1x1x1x128x128xf32> to vector<128x128xf32>
    %c1_47 = arith.constant 1 : index
    %c0_48 = arith.constant 0 : index
    %c0_49 = arith.constant 0 : index
    %44 = vector.load %arg7[%c1_47, %c0_48, %c0_49] : memref<6x64x128xf32, #tpu.memory_space<vmem>>, vector<1x8x128xf32>
    %45 = vector.shape_cast %44 : vector<1x8x128xf32> to vector<8x128xf32>
    %46 = vector.shape_cast %41 : vector<8x128xf32> to vector<1x8x128xf32>
    tpu.vector_store %arg7[%c1_47, %c0_48, %c0_49], %46 {strides = array<i32>} : memref<6x64x128xf32, #tpu.memory_space<vmem>>, vector<1x8x128xf32>,
    %cst_50 = arith.constant dense<0.000000e+00> : vector<8x128xf32>
    %47 = tpu.matmul %41, %43, %cst_50 {dimension_numbers = #tpu.dot_dimension_numbers<[1], [0], [0], [1], [0, 0, 1, 1], [], []>} : vector<8x128xf32>, vector<128x128xf32>, vector<8x128xf32> -> vector<8x128xf32>
    %c1_51 = arith.constant 1 : index
    %c8_52 = arith.constant 8 : index
    %c0_53 = arith.constant 0 : index
    %48 = vector.load %arg7[%c1_51, %c8_52, %c0_53] : memref<6x64x128xf32, #tpu.memory_space<vmem>>, vector<1x8x128xf32>
    %49 = vector.shape_cast %48 : vector<1x8x128xf32> to vector<8x128xf32>
    %50 = vector.shape_cast %47 : vector<8x128xf32> to vector<1x8x128xf32>
    tpu.vector_store %arg7[%c1_51, %c8_52, %c0_53], %50 {strides = array<i32>} : memref<6x64x128xf32, #tpu.memory_space<vmem>>, vector<1x8x128xf32>,
    %cst_54 = arith.constant dense<0.000000e+00> : vector<8x128xf32>
    %51 = tpu.matmul %47, %43, %cst_54 {dimension_numbers = #tpu.dot_dimension_numbers<[1], [0], [0], [1], [0, 0, 1, 1], [], []>} : vector<8x128xf32>, vector<128x128xf32>, vector<8x128xf32> -> vector<8x128xf32>
    %c1_55 = arith.constant 1 : index
    %c16_56 = arith.constant 16 : index
    %c0_57 = arith.constant 0 : index
    %52 = vector.load %arg7[%c1_55, %c16_56, %c0_57] : memref<6x64x128xf32, #tpu.memory_space<vmem>>, vector<1x8x128xf32>
    %53 = vector.shape_cast %52 : vector<1x8x128xf32> to vector<8x128xf32>
    %54 = vector.shape_cast %51 : vector<8x128xf32> to vector<1x8x128xf32>
    tpu.vector_store %arg7[%c1_55, %c16_56, %c0_57], %54 {strides = array<i32>} : memref<6x64x128xf32, #tpu.memory_space<vmem>>, vector<1x8x128xf32>,
    %cst_58 = arith.constant dense<0.000000e+00> : vector<8x128xf32>
    %55 = tpu.matmul %51, %43, %cst_58 {dimension_numbers = #tpu.dot_dimension_numbers<[1], [0], [0], [1], [0, 0, 1, 1], [], []>} : vector<8x128xf32>, vector<128x128xf32>, vector<8x128xf32> -> vector<8x128xf32>
    %c1_59 = arith.constant 1 : index
    %c24_60 = arith.constant 24 : index
    %c0_61 = arith.constant 0 : index
    %56 = vector.load %arg7[%c1_59, %c24_60, %c0_61] : memref<6x64x128xf32, #tpu.memory_space<vmem>>, vector<1x8x128xf32>
    %57 = vector.shape_cast %56 : vector<1x8x128xf32> to vector<8x128xf32>
    %58 = vector.shape_cast %55 : vector<8x128xf32> to vector<1x8x128xf32>
    tpu.vector_store %arg7[%c1_59, %c24_60, %c0_61], %58 {strides = array<i32>} : memref<6x64x128xf32, #tpu.memory_space<vmem>>, vector<1x8x128xf32>,
    %c0_62 = arith.constant 0 : index
    %c1_63 = arith.constant 1 : index
    %c1_64 = arith.constant 1 : index
    %c0_65 = arith.constant 0 : index
    %c0_66 = arith.constant 0 : index
    %59 = vector.load %arg3[%c0_62, %c1_63, %c1_64, %c0_65, %c0_66] : memref<2x3x2x128x128xf32, #tpu.memory_space<vmem>>, vector<1x1x1x128x128xf32>
    %60 = vector.shape_cast %59 : vector<1x1x1x128x128xf32> to vector<128x128xf32>
    %c1_67 = arith.constant 1 : index
    %c32_68 = arith.constant 32 : index
    %c0_69 = arith.constant 0 : index
    %61 = vector.load %arg7[%c1_67, %c32_68, %c0_69] : memref<6x64x128xf32, #tpu.memory_space<vmem>>, vector<1x8x128xf32>
    %62 = vector.shape_cast %61 : vector<1x8x128xf32> to vector<8x128xf32>
    %63 = vector.shape_cast %41 : vector<8x128xf32> to vector<1x8x128xf32>
    tpu.vector_store %arg7[%c1_67, %c32_68, %c0_69], %63 {strides = array<i32>} : memref<6x64x128xf32, #tpu.memory_space<vmem>>, vector<1x8x128xf32>,
    %cst_70 = arith.constant dense<0.000000e+00> : vector<8x128xf32>
    %64 = tpu.matmul %41, %60, %cst_70 {dimension_numbers = #tpu.dot_dimension_numbers<[1], [0], [0], [1], [0, 0, 1, 1], [], []>} : vector<8x128xf32>, vector<128x128xf32>, vector<8x128xf32> -> vector<8x128xf32>
    %c1_71 = arith.constant 1 : index
    %c40_72 = arith.constant 40 : index
    %c0_73 = arith.constant 0 : index
    %65 = vector.load %arg7[%c1_71, %c40_72, %c0_73] : memref<6x64x128xf32, #tpu.memory_space<vmem>>, vector<1x8x128xf32>
    %66 = vector.shape_cast %65 : vector<1x8x128xf32> to vector<8x128xf32>
    %67 = vector.shape_cast %64 : vector<8x128xf32> to vector<1x8x128xf32>
    tpu.vector_store %arg7[%c1_71, %c40_72, %c0_73], %67 {strides = array<i32>} : memref<6x64x128xf32, #tpu.memory_space<vmem>>, vector<1x8x128xf32>,
    %cst_74 = arith.constant dense<0.000000e+00> : vector<8x128xf32>
    %68 = tpu.matmul %64, %60, %cst_74 {dimension_numbers = #tpu.dot_dimension_numbers<[1], [0], [0], [1], [0, 0, 1, 1], [], []>} : vector<8x128xf32>, vector<128x128xf32>, vector<8x128xf32> -> vector<8x128xf32>
    %c1_75 = arith.constant 1 : index
    %c48_76 = arith.constant 48 : index
    %c0_77 = arith.constant 0 : index
    %69 = vector.load %arg7[%c1_75, %c48_76, %c0_77] : memref<6x64x128xf32, #tpu.memory_space<vmem>>, vector<1x8x128xf32>
    %70 = vector.shape_cast %69 : vector<1x8x128xf32> to vector<8x128xf32>
    %71 = vector.shape_cast %68 : vector<8x128xf32> to vector<1x8x128xf32>
    tpu.vector_store %arg7[%c1_75, %c48_76, %c0_77], %71 {strides = array<i32>} : memref<6x64x128xf32, #tpu.memory_space<vmem>>, vector<1x8x128xf32>,
    %cst_78 = arith.constant dense<0.000000e+00> : vector<8x128xf32>
    %72 = tpu.matmul %68, %60, %cst_78 {dimension_numbers = #tpu.dot_dimension_numbers<[1], [0], [0], [1], [0, 0, 1, 1], [], []>} : vector<8x128xf32>, vector<128x128xf32>, vector<8x128xf32> -> vector<8x128xf32>
    %c1_79 = arith.constant 1 : index
    %c56_80 = arith.constant 56 : index
    %c0_81 = arith.constant 0 : index
    %73 = vector.load %arg7[%c1_79, %c56_80, %c0_81] : memref<6x64x128xf32, #tpu.memory_space<vmem>>, vector<1x8x128xf32>
    %74 = vector.shape_cast %73 : vector<1x8x128xf32> to vector<8x128xf32>
    %75 = vector.shape_cast %72 : vector<8x128xf32> to vector<1x8x128xf32>
    tpu.vector_store %arg7[%c1_79, %c56_80, %c0_81], %75 {strides = array<i32>} : memref<6x64x128xf32, #tpu.memory_space<vmem>>, vector<1x8x128xf32>,
    %c0_82 = arith.constant 0 : index
    %c2 = arith.constant 2 : index
    %c0_83 = arith.constant 0 : index
    %c0_84 = arith.constant 0 : index
    %76 = vector.load %arg2[%c0_82, %c2, %c0_83, %c0_84] : memref<2x3x8x128xf32, #tpu.memory_space<vmem>>, vector<1x1x8x128xf32>
    %77 = vector.shape_cast %76 : vector<1x1x8x128xf32> to vector<8x128xf32>
    %c0_85 = arith.constant 0 : index
    %c2_86 = arith.constant 2 : index
    %c0_87 = arith.constant 0 : index
    %c0_88 = arith.constant 0 : index
    %c0_89 = arith.constant 0 : index
    %78 = vector.load %arg3[%c0_85, %c2_86, %c0_87, %c0_88, %c0_89] : memref<2x3x2x128x128xf32, #tpu.memory_space<vmem>>, vector<1x1x1x128x128xf32>
    %79 = vector.shape_cast %78 : vector<1x1x1x128x128xf32> to vector<128x128xf32>
    %c2_90 = arith.constant 2 : index
    %c0_91 = arith.constant 0 : index
    %c0_92 = arith.constant 0 : index
    %80 = vector.load %arg7[%c2_90, %c0_91, %c0_92] : memref<6x64x128xf32, #tpu.memory_space<vmem>>, vector<1x8x128xf32>
    %81 = vector.shape_cast %80 : vector<1x8x128xf32> to vector<8x128xf32>
    %82 = vector.shape_cast %77 : vector<8x128xf32> to vector<1x8x128xf32>
    tpu.vector_store %arg7[%c2_90, %c0_91, %c0_92], %82 {strides = array<i32>} : memref<6x64x128xf32, #tpu.memory_space<vmem>>, vector<1x8x128xf32>,
    %cst_93 = arith.constant dense<0.000000e+00> : vector<8x128xf32>
    %83 = tpu.matmul %77, %79, %cst_93 {dimension_numbers = #tpu.dot_dimension_numbers<[1], [0], [0], [1], [0, 0, 1, 1], [], []>} : vector<8x128xf32>, vector<128x128xf32>, vector<8x128xf32> -> vector<8x128xf32>
    %c2_94 = arith.constant 2 : index
    %c8_95 = arith.constant 8 : index
    %c0_96 = arith.constant 0 : index
    %84 = vector.load %arg7[%c2_94, %c8_95, %c0_96] : memref<6x64x128xf32, #tpu.memory_space<vmem>>, vector<1x8x128xf32>
    %85 = vector.shape_cast %84 : vector<1x8x128xf32> to vector<8x128xf32>
    %86 = vector.shape_cast %83 : vector<8x128xf32> to vector<1x8x128xf32>
    tpu.vector_store %arg7[%c2_94, %c8_95, %c0_96], %86 {strides = array<i32>} : memref<6x64x128xf32, #tpu.memory_space<vmem>>, vector<1x8x128xf32>,
    %cst_97 = arith.constant dense<0.000000e+00> : vector<8x128xf32>
    %87 = tpu.matmul %83, %79, %cst_97 {dimension_numbers = #tpu.dot_dimension_numbers<[1], [0], [0], [1], [0, 0, 1, 1], [], []>} : vector<8x128xf32>, vector<128x128xf32>, vector<8x128xf32> -> vector<8x128xf32>
    %c2_98 = arith.constant 2 : index
    %c16_99 = arith.constant 16 : index
    %c0_100 = arith.constant 0 : index
    %88 = vector.load %arg7[%c2_98, %c16_99, %c0_100] : memref<6x64x128xf32, #tpu.memory_space<vmem>>, vector<1x8x128xf32>
    %89 = vector.shape_cast %88 : vector<1x8x128xf32> to vector<8x128xf32>
    %90 = vector.shape_cast %87 : vector<8x128xf32> to vector<1x8x128xf32>
    tpu.vector_store %arg7[%c2_98, %c16_99, %c0_100], %90 {strides = array<i32>} : memref<6x64x128xf32, #tpu.memory_space<vmem>>, vector<1x8x128xf32>,
    %cst_101 = arith.constant dense<0.000000e+00> : vector<8x128xf32>
    %91 = tpu.matmul %87, %79, %cst_101 {dimension_numbers = #tpu.dot_dimension_numbers<[1], [0], [0], [1], [0, 0, 1, 1], [], []>} : vector<8x128xf32>, vector<128x128xf32>, vector<8x128xf32> -> vector<8x128xf32>
    %c2_102 = arith.constant 2 : index
    %c24_103 = arith.constant 24 : index
    %c0_104 = arith.constant 0 : index
    %92 = vector.load %arg7[%c2_102, %c24_103, %c0_104] : memref<6x64x128xf32, #tpu.memory_space<vmem>>, vector<1x8x128xf32>
    %93 = vector.shape_cast %92 : vector<1x8x128xf32> to vector<8x128xf32>
    %94 = vector.shape_cast %91 : vector<8x128xf32> to vector<1x8x128xf32>
    tpu.vector_store %arg7[%c2_102, %c24_103, %c0_104], %94 {strides = array<i32>} : memref<6x64x128xf32, #tpu.memory_space<vmem>>, vector<1x8x128xf32>,
    %c0_105 = arith.constant 0 : index
    %c2_106 = arith.constant 2 : index
    %c1_107 = arith.constant 1 : index
    %c0_108 = arith.constant 0 : index
    %c0_109 = arith.constant 0 : index
    %95 = vector.load %arg3[%c0_105, %c2_106, %c1_107, %c0_108, %c0_109] : memref<2x3x2x128x128xf32, #tpu.memory_space<vmem>>, vector<1x1x1x128x128xf32>
    %96 = vector.shape_cast %95 : vector<1x1x1x128x128xf32> to vector<128x128xf32>
    %c2_110 = arith.constant 2 : index
    %c32_111 = arith.constant 32 : index
    %c0_112 = arith.constant 0 : index
    %97 = vector.load %arg7[%c2_110, %c32_111, %c0_112] : memref<6x64x128xf32, #tpu.memory_space<vmem>>, vector<1x8x128xf32>
    %98 = vector.shape_cast %97 : vector<1x8x128xf32> to vector<8x128xf32>
    %99 = vector.shape_cast %77 : vector<8x128xf32> to vector<1x8x128xf32>
    tpu.vector_store %arg7[%c2_110, %c32_111, %c0_112], %99 {strides = array<i32>} : memref<6x64x128xf32, #tpu.memory_space<vmem>>, vector<1x8x128xf32>,
    %cst_113 = arith.constant dense<0.000000e+00> : vector<8x128xf32>
    %100 = tpu.matmul %77, %96, %cst_113 {dimension_numbers = #tpu.dot_dimension_numbers<[1], [0], [0], [1], [0, 0, 1, 1], [], []>} : vector<8x128xf32>, vector<128x128xf32>, vector<8x128xf32> -> vector<8x128xf32>
    %c2_114 = arith.constant 2 : index
    %c40_115 = arith.constant 40 : index
    %c0_116 = arith.constant 0 : index
    %101 = vector.load %arg7[%c2_114, %c40_115, %c0_116] : memref<6x64x128xf32, #tpu.memory_space<vmem>>, vector<1x8x128xf32>
    %102 = vector.shape_cast %101 : vector<1x8x128xf32> to vector<8x128xf32>
    %103 = vector.shape_cast %100 : vector<8x128xf32> to vector<1x8x128xf32>
    tpu.vector_store %arg7[%c2_114, %c40_115, %c0_116], %103 {strides = array<i32>} : memref<6x64x128xf32, #tpu.memory_space<vmem>>, vector<1x8x128xf32>,
    %cst_117 = arith.constant dense<0.000000e+00> : vector<8x128xf32>
    %104 = tpu.matmul %100, %96, %cst_117 {dimension_numbers = #tpu.dot_dimension_numbers<[1], [0], [0], [1], [0, 0, 1, 1], [], []>} : vector<8x128xf32>, vector<128x128xf32>, vector<8x128xf32> -> vector<8x128xf32>
    %c2_118 = arith.constant 2 : index
    %c48_119 = arith.constant 48 : index
    %c0_120 = arith.constant 0 : index
    %105 = vector.load %arg7[%c2_118, %c48_119, %c0_120] : memref<6x64x128xf32, #tpu.memory_space<vmem>>, vector<1x8x128xf32>
    %106 = vector.shape_cast %105 : vector<1x8x128xf32> to vector<8x128xf32>
    %107 = vector.shape_cast %104 : vector<8x128xf32> to vector<1x8x128xf32>
    tpu.vector_store %arg7[%c2_118, %c48_119, %c0_120], %107 {strides = array<i32>} : memref<6x64x128xf32, #tpu.memory_space<vmem>>, vector<1x8x128xf32>,
    %cst_121 = arith.constant dense<0.000000e+00> : vector<8x128xf32>
    %108 = tpu.matmul %104, %96, %cst_121 {dimension_numbers = #tpu.dot_dimension_numbers<[1], [0], [0], [1], [0, 0, 1, 1], [], []>} : vector<8x128xf32>, vector<128x128xf32>, vector<8x128xf32> -> vector<8x128xf32>
    %c2_122 = arith.constant 2 : index
    %c56_123 = arith.constant 56 : index
    %c0_124 = arith.constant 0 : index
    %109 = vector.load %arg7[%c2_122, %c56_123, %c0_124] : memref<6x64x128xf32, #tpu.memory_space<vmem>>, vector<1x8x128xf32>
    %110 = vector.shape_cast %109 : vector<1x8x128xf32> to vector<8x128xf32>
    %111 = vector.shape_cast %108 : vector<8x128xf32> to vector<1x8x128xf32>
    tpu.vector_store %arg7[%c2_122, %c56_123, %c0_124], %111 {strides = array<i32>} : memref<6x64x128xf32, #tpu.memory_space<vmem>>, vector<1x8x128xf32>,
    %c1_125 = arith.constant 1 : index
    %c0_126 = arith.constant 0 : index
    %c0_127 = arith.constant 0 : index
    %c0_128 = arith.constant 0 : index
    %112 = vector.load %arg2[%c1_125, %c0_126, %c0_127, %c0_128] : memref<2x3x8x128xf32, #tpu.memory_space<vmem>>, vector<1x1x8x128xf32>
    %113 = vector.shape_cast %112 : vector<1x1x8x128xf32> to vector<8x128xf32>
    %c1_129 = arith.constant 1 : index
    %c0_130 = arith.constant 0 : index
    %c0_131 = arith.constant 0 : index
    %c0_132 = arith.constant 0 : index
    %c0_133 = arith.constant 0 : index
    %114 = vector.load %arg3[%c1_129, %c0_130, %c0_131, %c0_132, %c0_133] : memref<2x3x2x128x128xf32, #tpu.memory_space<vmem>>, vector<1x1x1x128x128xf32>
    %115 = vector.shape_cast %114 : vector<1x1x1x128x128xf32> to vector<128x128xf32>
    %c3 = arith.constant 3 : index
    %c0_134 = arith.constant 0 : index
    %c0_135 = arith.constant 0 : index
    %116 = vector.load %arg7[%c3, %c0_134, %c0_135] : memref<6x64x128xf32, #tpu.memory_space<vmem>>, vector<1x8x128xf32>
    %117 = vector.shape_cast %116 : vector<1x8x128xf32> to vector<8x128xf32>
    %118 = vector.shape_cast %113 : vector<8x128xf32> to vector<1x8x128xf32>
    tpu.vector_store %arg7[%c3, %c0_134, %c0_135], %118 {strides = array<i32>} : memref<6x64x128xf32, #tpu.memory_space<vmem>>, vector<1x8x128xf32>,
    %cst_136 = arith.constant dense<0.000000e+00> : vector<8x128xf32>
    %119 = tpu.matmul %113, %115, %cst_136 {dimension_numbers = #tpu.dot_dimension_numbers<[1], [0], [0], [1], [0, 0, 1, 1], [], []>} : vector<8x128xf32>, vector<128x128xf32>, vector<8x128xf32> -> vector<8x128xf32>
    %c3_137 = arith.constant 3 : index
    %c8_138 = arith.constant 8 : index
    %c0_139 = arith.constant 0 : index
    %120 = vector.load %arg7[%c3_137, %c8_138, %c0_139] : memref<6x64x128xf32, #tpu.memory_space<vmem>>, vector<1x8x128xf32>
    %121 = vector.shape_cast %120 : vector<1x8x128xf32> to vector<8x128xf32>
    %122 = vector.shape_cast %119 : vector<8x128xf32> to vector<1x8x128xf32>
    tpu.vector_store %arg7[%c3_137, %c8_138, %c0_139], %122 {strides = array<i32>} : memref<6x64x128xf32, #tpu.memory_space<vmem>>, vector<1x8x128xf32>,
    %cst_140 = arith.constant dense<0.000000e+00> : vector<8x128xf32>
    %123 = tpu.matmul %119, %115, %cst_140 {dimension_numbers = #tpu.dot_dimension_numbers<[1], [0], [0], [1], [0, 0, 1, 1], [], []>} : vector<8x128xf32>, vector<128x128xf32>, vector<8x128xf32> -> vector<8x128xf32>
    %c3_141 = arith.constant 3 : index
    %c16_142 = arith.constant 16 : index
    %c0_143 = arith.constant 0 : index
    %124 = vector.load %arg7[%c3_141, %c16_142, %c0_143] : memref<6x64x128xf32, #tpu.memory_space<vmem>>, vector<1x8x128xf32>
    %125 = vector.shape_cast %124 : vector<1x8x128xf32> to vector<8x128xf32>
    %126 = vector.shape_cast %123 : vector<8x128xf32> to vector<1x8x128xf32>
    tpu.vector_store %arg7[%c3_141, %c16_142, %c0_143], %126 {strides = array<i32>} : memref<6x64x128xf32, #tpu.memory_space<vmem>>, vector<1x8x128xf32>,
    %cst_144 = arith.constant dense<0.000000e+00> : vector<8x128xf32>
    %127 = tpu.matmul %123, %115, %cst_144 {dimension_numbers = #tpu.dot_dimension_numbers<[1], [0], [0], [1], [0, 0, 1, 1], [], []>} : vector<8x128xf32>, vector<128x128xf32>, vector<8x128xf32> -> vector<8x128xf32>
    %c3_145 = arith.constant 3 : index
    %c24_146 = arith.constant 24 : index
    %c0_147 = arith.constant 0 : index
    %128 = vector.load %arg7[%c3_145, %c24_146, %c0_147] : memref<6x64x128xf32, #tpu.memory_space<vmem>>, vector<1x8x128xf32>
    %129 = vector.shape_cast %128 : vector<1x8x128xf32> to vector<8x128xf32>
    %130 = vector.shape_cast %127 : vector<8x128xf32> to vector<1x8x128xf32>
    tpu.vector_store %arg7[%c3_145, %c24_146, %c0_147], %130 {strides = array<i32>} : memref<6x64x128xf32, #tpu.memory_space<vmem>>, vector<1x8x128xf32>,
    %c1_148 = arith.constant 1 : index
    %c0_149 = arith.constant 0 : index
    %c1_150 = arith.constant 1 : index
    %c0_151 = arith.constant 0 : index
    %c0_152 = arith.constant 0 : index
    %131 = vector.load %arg3[%c1_148, %c0_149, %c1_150, %c0_151, %c0_152] : memref<2x3x2x128x128xf32, #tpu.memory_space<vmem>>, vector<1x1x1x128x128xf32>
    %132 = vector.shape_cast %131 : vector<1x1x1x128x128xf32> to vector<128x128xf32>
    %c3_153 = arith.constant 3 : index
    %c32_154 = arith.constant 32 : index
    %c0_155 = arith.constant 0 : index
    %133 = vector.load %arg7[%c3_153, %c32_154, %c0_155] : memref<6x64x128xf32, #tpu.memory_space<vmem>>, vector<1x8x128xf32>
    %134 = vector.shape_cast %133 : vector<1x8x128xf32> to vector<8x128xf32>
    %135 = vector.shape_cast %113 : vector<8x128xf32> to vector<1x8x128xf32>
    tpu.vector_store %arg7[%c3_153, %c32_154, %c0_155], %135 {strides = array<i32>} : memref<6x64x128xf32, #tpu.memory_space<vmem>>, vector<1x8x128xf32>,
    %cst_156 = arith.constant dense<0.000000e+00> : vector<8x128xf32>
    %136 = tpu.matmul %113, %132, %cst_156 {dimension_numbers = #tpu.dot_dimension_numbers<[1], [0], [0], [1], [0, 0, 1, 1], [], []>} : vector<8x128xf32>, vector<128x128xf32>, vector<8x128xf32> -> vector<8x128xf32>
    %c3_157 = arith.constant 3 : index
    %c40_158 = arith.constant 40 : index
    %c0_159 = arith.constant 0 : index
    %137 = vector.load %arg7[%c3_157, %c40_158, %c0_159] : memref<6x64x128xf32, #tpu.memory_space<vmem>>, vector<1x8x128xf32>
    %138 = vector.shape_cast %137 : vector<1x8x128xf32> to vector<8x128xf32>
    %139 = vector.shape_cast %136 : vector<8x128xf32> to vector<1x8x128xf32>
    tpu.vector_store %arg7[%c3_157, %c40_158, %c0_159], %139 {strides = array<i32>} : memref<6x64x128xf32, #tpu.memory_space<vmem>>, vector<1x8x128xf32>,
    %cst_160 = arith.constant dense<0.000000e+00> : vector<8x128xf32>
    %140 = tpu.matmul %136, %132, %cst_160 {dimension_numbers = #tpu.dot_dimension_numbers<[1], [0], [0], [1], [0, 0, 1, 1], [], []>} : vector<8x128xf32>, vector<128x128xf32>, vector<8x128xf32> -> vector<8x128xf32>
    %c3_161 = arith.constant 3 : index
    %c48_162 = arith.constant 48 : index
    %c0_163 = arith.constant 0 : index
    %141 = vector.load %arg7[%c3_161, %c48_162, %c0_163] : memref<6x64x128xf32, #tpu.memory_space<vmem>>, vector<1x8x128xf32>
    %142 = vector.shape_cast %141 : vector<1x8x128xf32> to vector<8x128xf32>
    %143 = vector.shape_cast %140 : vector<8x128xf32> to vector<1x8x128xf32>
    tpu.vector_store %arg7[%c3_161, %c48_162, %c0_163], %143 {strides = array<i32>} : memref<6x64x128xf32, #tpu.memory_space<vmem>>, vector<1x8x128xf32>,
    %cst_164 = arith.constant dense<0.000000e+00> : vector<8x128xf32>
    %144 = tpu.matmul %140, %132, %cst_164 {dimension_numbers = #tpu.dot_dimension_numbers<[1], [0], [0], [1], [0, 0, 1, 1], [], []>} : vector<8x128xf32>, vector<128x128xf32>, vector<8x128xf32> -> vector<8x128xf32>
    %c3_165 = arith.constant 3 : index
    %c56_166 = arith.constant 56 : index
    %c0_167 = arith.constant 0 : index
    %145 = vector.load %arg7[%c3_165, %c56_166, %c0_167] : memref<6x64x128xf32, #tpu.memory_space<vmem>>, vector<1x8x128xf32>
    %146 = vector.shape_cast %145 : vector<1x8x128xf32> to vector<8x128xf32>
    %147 = vector.shape_cast %144 : vector<8x128xf32> to vector<1x8x128xf32>
    tpu.vector_store %arg7[%c3_165, %c56_166, %c0_167], %147 {strides = array<i32>} : memref<6x64x128xf32, #tpu.memory_space<vmem>>, vector<1x8x128xf32>,
    %c1_168 = arith.constant 1 : index
    %c1_169 = arith.constant 1 : index
    %c0_170 = arith.constant 0 : index
    %c0_171 = arith.constant 0 : index
    %148 = vector.load %arg2[%c1_168, %c1_169, %c0_170, %c0_171] : memref<2x3x8x128xf32, #tpu.memory_space<vmem>>, vector<1x1x8x128xf32>
    %149 = vector.shape_cast %148 : vector<1x1x8x128xf32> to vector<8x128xf32>
    %c1_172 = arith.constant 1 : index
    %c1_173 = arith.constant 1 : index
    %c0_174 = arith.constant 0 : index
    %c0_175 = arith.constant 0 : index
    %c0_176 = arith.constant 0 : index
    %150 = vector.load %arg3[%c1_172, %c1_173, %c0_174, %c0_175, %c0_176] : memref<2x3x2x128x128xf32, #tpu.memory_space<vmem>>, vector<1x1x1x128x128xf32>
    %151 = vector.shape_cast %150 : vector<1x1x1x128x128xf32> to vector<128x128xf32>
    %c4 = arith.constant 4 : index
    %c0_177 = arith.constant 0 : index
    %c0_178 = arith.constant 0 : index
    %152 = vector.load %arg7[%c4, %c0_177, %c0_178] : memref<6x64x128xf32, #tpu.memory_space<vmem>>, vector<1x8x128xf32>
    %153 = vector.shape_cast %152 : vector<1x8x128xf32> to vector<8x128xf32>
    %154 = vector.shape_cast %149 : vector<8x128xf32> to vector<1x8x128xf32>
    tpu.vector_store %arg7[%c4, %c0_177, %c0_178], %154 {strides = array<i32>} : memref<6x64x128xf32, #tpu.memory_space<vmem>>, vector<1x8x128xf32>,
    %cst_179 = arith.constant dense<0.000000e+00> : vector<8x128xf32>
    %155 = tpu.matmul %149, %151, %cst_179 {dimension_numbers = #tpu.dot_dimension_numbers<[1], [0], [0], [1], [0, 0, 1, 1], [], []>} : vector<8x128xf32>, vector<128x128xf32>, vector<8x128xf32> -> vector<8x128xf32>
    %c4_180 = arith.constant 4 : index
    %c8_181 = arith.constant 8 : index
    %c0_182 = arith.constant 0 : index
    %156 = vector.load %arg7[%c4_180, %c8_181, %c0_182] : memref<6x64x128xf32, #tpu.memory_space<vmem>>, vector<1x8x128xf32>
    %157 = vector.shape_cast %156 : vector<1x8x128xf32> to vector<8x128xf32>
    %158 = vector.shape_cast %155 : vector<8x128xf32> to vector<1x8x128xf32>
    tpu.vector_store %arg7[%c4_180, %c8_181, %c0_182], %158 {strides = array<i32>} : memref<6x64x128xf32, #tpu.memory_space<vmem>>, vector<1x8x128xf32>,
    %cst_183 = arith.constant dense<0.000000e+00> : vector<8x128xf32>
    %159 = tpu.matmul %155, %151, %cst_183 {dimension_numbers = #tpu.dot_dimension_numbers<[1], [0], [0], [1], [0, 0, 1, 1], [], []>} : vector<8x128xf32>, vector<128x128xf32>, vector<8x128xf32> -> vector<8x128xf32>
    %c4_184 = arith.constant 4 : index
    %c16_185 = arith.constant 16 : index
    %c0_186 = arith.constant 0 : index
    %160 = vector.load %arg7[%c4_184, %c16_185, %c0_186] : memref<6x64x128xf32, #tpu.memory_space<vmem>>, vector<1x8x128xf32>
    %161 = vector.shape_cast %160 : vector<1x8x128xf32> to vector<8x128xf32>
    %162 = vector.shape_cast %159 : vector<8x128xf32> to vector<1x8x128xf32>
    tpu.vector_store %arg7[%c4_184, %c16_185, %c0_186], %162 {strides = array<i32>} : memref<6x64x128xf32, #tpu.memory_space<vmem>>, vector<1x8x128xf32>,
    %cst_187 = arith.constant dense<0.000000e+00> : vector<8x128xf32>
    %163 = tpu.matmul %159, %151, %cst_187 {dimension_numbers = #tpu.dot_dimension_numbers<[1], [0], [0], [1], [0, 0, 1, 1], [], []>} : vector<8x128xf32>, vector<128x128xf32>, vector<8x128xf32> -> vector<8x128xf32>
    %c4_188 = arith.constant 4 : index
    %c24_189 = arith.constant 24 : index
    %c0_190 = arith.constant 0 : index
    %164 = vector.load %arg7[%c4_188, %c24_189, %c0_190] : memref<6x64x128xf32, #tpu.memory_space<vmem>>, vector<1x8x128xf32>
    %165 = vector.shape_cast %164 : vector<1x8x128xf32> to vector<8x128xf32>
    %166 = vector.shape_cast %163 : vector<8x128xf32> to vector<1x8x128xf32>
    tpu.vector_store %arg7[%c4_188, %c24_189, %c0_190], %166 {strides = array<i32>} : memref<6x64x128xf32, #tpu.memory_space<vmem>>, vector<1x8x128xf32>,
    %c1_191 = arith.constant 1 : index
    %c1_192 = arith.constant 1 : index
    %c1_193 = arith.constant 1 : index
    %c0_194 = arith.constant 0 : index
    %c0_195 = arith.constant 0 : index
    %167 = vector.load %arg3[%c1_191, %c1_192, %c1_193, %c0_194, %c0_195] : memref<2x3x2x128x128xf32, #tpu.memory_space<vmem>>, vector<1x1x1x128x128xf32>
    %168 = vector.shape_cast %167 : vector<1x1x1x128x128xf32> to vector<128x128xf32>
    %c4_196 = arith.constant 4 : index
    %c32_197 = arith.constant 32 : index
    %c0_198 = arith.constant 0 : index
    %169 = vector.load %arg7[%c4_196, %c32_197, %c0_198] : memref<6x64x128xf32, #tpu.memory_space<vmem>>, vector<1x8x128xf32>
    %170 = vector.shape_cast %169 : vector<1x8x128xf32> to vector<8x128xf32>
    %171 = vector.shape_cast %149 : vector<8x128xf32> to vector<1x8x128xf32>
    tpu.vector_store %arg7[%c4_196, %c32_197, %c0_198], %171 {strides = array<i32>} : memref<6x64x128xf32, #tpu.memory_space<vmem>>, vector<1x8x128xf32>,
    %cst_199 = arith.constant dense<0.000000e+00> : vector<8x128xf32>
    %172 = tpu.matmul %149, %168, %cst_199 {dimension_numbers = #tpu.dot_dimension_numbers<[1], [0], [0], [1], [0, 0, 1, 1], [], []>} : vector<8x128xf32>, vector<128x128xf32>, vector<8x128xf32> -> vector<8x128xf32>
    %c4_200 = arith.constant 4 : index
    %c40_201 = arith.constant 40 : index
    %c0_202 = arith.constant 0 : index
    %173 = vector.load %arg7[%c4_200, %c40_201, %c0_202] : memref<6x64x128xf32, #tpu.memory_space<vmem>>, vector<1x8x128xf32>
    %174 = vector.shape_cast %173 : vector<1x8x128xf32> to vector<8x128xf32>
    %175 = vector.shape_cast %172 : vector<8x128xf32> to vector<1x8x128xf32>
    tpu.vector_store %arg7[%c4_200, %c40_201, %c0_202], %175 {strides = array<i32>} : memref<6x64x128xf32, #tpu.memory_space<vmem>>, vector<1x8x128xf32>,
    %cst_203 = arith.constant dense<0.000000e+00> : vector<8x128xf32>
    %176 = tpu.matmul %172, %168, %cst_203 {dimension_numbers = #tpu.dot_dimension_numbers<[1], [0], [0], [1], [0, 0, 1, 1], [], []>} : vector<8x128xf32>, vector<128x128xf32>, vector<8x128xf32> -> vector<8x128xf32>
    %c4_204 = arith.constant 4 : index
    %c48_205 = arith.constant 48 : index
    %c0_206 = arith.constant 0 : index
    %177 = vector.load %arg7[%c4_204, %c48_205, %c0_206] : memref<6x64x128xf32, #tpu.memory_space<vmem>>, vector<1x8x128xf32>
    %178 = vector.shape_cast %177 : vector<1x8x128xf32> to vector<8x128xf32>
    %179 = vector.shape_cast %176 : vector<8x128xf32> to vector<1x8x128xf32>
    tpu.vector_store %arg7[%c4_204, %c48_205, %c0_206], %179 {strides = array<i32>} : memref<6x64x128xf32, #tpu.memory_space<vmem>>, vector<1x8x128xf32>,
    %cst_207 = arith.constant dense<0.000000e+00> : vector<8x128xf32>
    %180 = tpu.matmul %176, %168, %cst_207 {dimension_numbers = #tpu.dot_dimension_numbers<[1], [0], [0], [1], [0, 0, 1, 1], [], []>} : vector<8x128xf32>, vector<128x128xf32>, vector<8x128xf32> -> vector<8x128xf32>
    %c4_208 = arith.constant 4 : index
    %c56_209 = arith.constant 56 : index
    %c0_210 = arith.constant 0 : index
    %181 = vector.load %arg7[%c4_208, %c56_209, %c0_210] : memref<6x64x128xf32, #tpu.memory_space<vmem>>, vector<1x8x128xf32>
    %182 = vector.shape_cast %181 : vector<1x8x128xf32> to vector<8x128xf32>
    %183 = vector.shape_cast %180 : vector<8x128xf32> to vector<1x8x128xf32>
    tpu.vector_store %arg7[%c4_208, %c56_209, %c0_210], %183 {strides = array<i32>} : memref<6x64x128xf32, #tpu.memory_space<vmem>>, vector<1x8x128xf32>,
    %c1_211 = arith.constant 1 : index
    %c2_212 = arith.constant 2 : index
    %c0_213 = arith.constant 0 : index
    %c0_214 = arith.constant 0 : index
    %184 = vector.load %arg2[%c1_211, %c2_212, %c0_213, %c0_214] : memref<2x3x8x128xf32, #tpu.memory_space<vmem>>, vector<1x1x8x128xf32>
    %185 = vector.shape_cast %184 : vector<1x1x8x128xf32> to vector<8x128xf32>
    %c1_215 = arith.constant 1 : index
    %c2_216 = arith.constant 2 : index
    %c0_217 = arith.constant 0 : index
    %c0_218 = arith.constant 0 : index
    %c0_219 = arith.constant 0 : index
    %186 = vector.load %arg3[%c1_215, %c2_216, %c0_217, %c0_218, %c0_219] : memref<2x3x2x128x128xf32, #tpu.memory_space<vmem>>, vector<1x1x1x128x128xf32>
    %187 = vector.shape_cast %186 : vector<1x1x1x128x128xf32> to vector<128x128xf32>
    %c5 = arith.constant 5 : index
    %c0_220 = arith.constant 0 : index
    %c0_221 = arith.constant 0 : index
    %188 = vector.load %arg7[%c5, %c0_220, %c0_221] : memref<6x64x128xf32, #tpu.memory_space<vmem>>, vector<1x8x128xf32>
    %189 = vector.shape_cast %188 : vector<1x8x128xf32> to vector<8x128xf32>
    %190 = vector.shape_cast %185 : vector<8x128xf32> to vector<1x8x128xf32>
    tpu.vector_store %arg7[%c5, %c0_220, %c0_221], %190 {strides = array<i32>} : memref<6x64x128xf32, #tpu.memory_space<vmem>>, vector<1x8x128xf32>,
    %cst_222 = arith.constant dense<0.000000e+00> : vector<8x128xf32>
    %191 = tpu.matmul %185, %187, %cst_222 {dimension_numbers = #tpu.dot_dimension_numbers<[1], [0], [0], [1], [0, 0, 1, 1], [], []>} : vector<8x128xf32>, vector<128x128xf32>, vector<8x128xf32> -> vector<8x128xf32>
    %c5_223 = arith.constant 5 : index
    %c8_224 = arith.constant 8 : index
    %c0_225 = arith.constant 0 : index
    %192 = vector.load %arg7[%c5_223, %c8_224, %c0_225] : memref<6x64x128xf32, #tpu.memory_space<vmem>>, vector<1x8x128xf32>
    %193 = vector.shape_cast %192 : vector<1x8x128xf32> to vector<8x128xf32>
    %194 = vector.shape_cast %191 : vector<8x128xf32> to vector<1x8x128xf32>
    tpu.vector_store %arg7[%c5_223, %c8_224, %c0_225], %194 {strides = array<i32>} : memref<6x64x128xf32, #tpu.memory_space<vmem>>, vector<1x8x128xf32>,
    %cst_226 = arith.constant dense<0.000000e+00> : vector<8x128xf32>
    %195 = tpu.matmul %191, %187, %cst_226 {dimension_numbers = #tpu.dot_dimension_numbers<[1], [0], [0], [1], [0, 0, 1, 1], [], []>} : vector<8x128xf32>, vector<128x128xf32>, vector<8x128xf32> -> vector<8x128xf32>
    %c5_227 = arith.constant 5 : index
    %c16_228 = arith.constant 16 : index
    %c0_229 = arith.constant 0 : index
    %196 = vector.load %arg7[%c5_227, %c16_228, %c0_229] : memref<6x64x128xf32, #tpu.memory_space<vmem>>, vector<1x8x128xf32>
    %197 = vector.shape_cast %196 : vector<1x8x128xf32> to vector<8x128xf32>
    %198 = vector.shape_cast %195 : vector<8x128xf32> to vector<1x8x128xf32>
    tpu.vector_store %arg7[%c5_227, %c16_228, %c0_229], %198 {strides = array<i32>} : memref<6x64x128xf32, #tpu.memory_space<vmem>>, vector<1x8x128xf32>,
    %cst_230 = arith.constant dense<0.000000e+00> : vector<8x128xf32>
    %199 = tpu.matmul %195, %187, %cst_230 {dimension_numbers = #tpu.dot_dimension_numbers<[1], [0], [0], [1], [0, 0, 1, 1], [], []>} : vector<8x128xf32>, vector<128x128xf32>, vector<8x128xf32> -> vector<8x128xf32>
    %c5_231 = arith.constant 5 : index
    %c24_232 = arith.constant 24 : index
    %c0_233 = arith.constant 0 : index
    %200 = vector.load %arg7[%c5_231, %c24_232, %c0_233] : memref<6x64x128xf32, #tpu.memory_space<vmem>>, vector<1x8x128xf32>
    %201 = vector.shape_cast %200 : vector<1x8x128xf32> to vector<8x128xf32>
    %202 = vector.shape_cast %199 : vector<8x128xf32> to vector<1x8x128xf32>
    tpu.vector_store %arg7[%c5_231, %c24_232, %c0_233], %202 {strides = array<i32>} : memref<6x64x128xf32, #tpu.memory_space<vmem>>, vector<1x8x128xf32>,
    %c1_234 = arith.constant 1 : index
    %c2_235 = arith.constant 2 : index
    %c1_236 = arith.constant 1 : index
    %c0_237 = arith.constant 0 : index
    %c0_238 = arith.constant 0 : index
    %203 = vector.load %arg3[%c1_234, %c2_235, %c1_236, %c0_237, %c0_238] : memref<2x3x2x128x128xf32, #tpu.memory_space<vmem>>, vector<1x1x1x128x128xf32>
    %204 = vector.shape_cast %203 : vector<1x1x1x128x128xf32> to vector<128x128xf32>
    %c5_239 = arith.constant 5 : index
    %c32_240 = arith.constant 32 : index
    %c0_241 = arith.constant 0 : index
    %205 = vector.load %arg7[%c5_239, %c32_240, %c0_241] : memref<6x64x128xf32, #tpu.memory_space<vmem>>, vector<1x8x128xf32>
    %206 = vector.shape_cast %205 : vector<1x8x128xf32> to vector<8x128xf32>
    %207 = vector.shape_cast %185 : vector<8x128xf32> to vector<1x8x128xf32>
    tpu.vector_store %arg7[%c5_239, %c32_240, %c0_241], %207 {strides = array<i32>} : memref<6x64x128xf32, #tpu.memory_space<vmem>>, vector<1x8x128xf32>,
    %cst_242 = arith.constant dense<0.000000e+00> : vector<8x128xf32>
    %208 = tpu.matmul %185, %204, %cst_242 {dimension_numbers = #tpu.dot_dimension_numbers<[1], [0], [0], [1], [0, 0, 1, 1], [], []>} : vector<8x128xf32>, vector<128x128xf32>, vector<8x128xf32> -> vector<8x128xf32>
    %c5_243 = arith.constant 5 : index
    %c40_244 = arith.constant 40 : index
    %c0_245 = arith.constant 0 : index
    %209 = vector.load %arg7[%c5_243, %c40_244, %c0_245] : memref<6x64x128xf32, #tpu.memory_space<vmem>>, vector<1x8x128xf32>
    %210 = vector.shape_cast %209 : vector<1x8x128xf32> to vector<8x128xf32>
    %211 = vector.shape_cast %208 : vector<8x128xf32> to vector<1x8x128xf32>
    tpu.vector_store %arg7[%c5_243, %c40_244, %c0_245], %211 {strides = array<i32>} : memref<6x64x128xf32, #tpu.memory_space<vmem>>, vector<1x8x128xf32>,
    %cst_246 = arith.constant dense<0.000000e+00> : vector<8x128xf32>
    %212 = tpu.matmul %208, %204, %cst_246 {dimension_numbers = #tpu.dot_dimension_numbers<[1], [0], [0], [1], [0, 0, 1, 1], [], []>} : vector<8x128xf32>, vector<128x128xf32>, vector<8x128xf32> -> vector<8x128xf32>
    %c5_247 = arith.constant 5 : index
    %c48_248 = arith.constant 48 : index
    %c0_249 = arith.constant 0 : index
    %213 = vector.load %arg7[%c5_247, %c48_248, %c0_249] : memref<6x64x128xf32, #tpu.memory_space<vmem>>, vector<1x8x128xf32>
    %214 = vector.shape_cast %213 : vector<1x8x128xf32> to vector<8x128xf32>
    %215 = vector.shape_cast %212 : vector<8x128xf32> to vector<1x8x128xf32>
    tpu.vector_store %arg7[%c5_247, %c48_248, %c0_249], %215 {strides = array<i32>} : memref<6x64x128xf32, #tpu.memory_space<vmem>>, vector<1x8x128xf32>,
    %cst_250 = arith.constant dense<0.000000e+00> : vector<8x128xf32>
    %216 = tpu.matmul %212, %204, %cst_250 {dimension_numbers = #tpu.dot_dimension_numbers<[1], [0], [0], [1], [0, 0, 1, 1], [], []>} : vector<8x128xf32>, vector<128x128xf32>, vector<8x128xf32> -> vector<8x128xf32>
    %c5_251 = arith.constant 5 : index
    %c56_252 = arith.constant 56 : index
    %c0_253 = arith.constant 0 : index
    %217 = vector.load %arg7[%c5_251, %c56_252, %c0_253] : memref<6x64x128xf32, #tpu.memory_space<vmem>>, vector<1x8x128xf32>
    %218 = vector.shape_cast %217 : vector<1x8x128xf32> to vector<8x128xf32>
    %219 = vector.shape_cast %216 : vector<8x128xf32> to vector<1x8x128xf32>
    tpu.vector_store %arg7[%c5_251, %c56_252, %c0_253], %219 {strides = array<i32>} : memref<6x64x128xf32, #tpu.memory_space<vmem>>, vector<1x8x128xf32>,
    %c0_254 = arith.constant 0 : index
    %c0_255 = arith.constant 0 : index
    %c0_256 = arith.constant 0 : index
    %220 = vector.load %arg7[%c0_254, %c0_255, %c0_256] : memref<6x64x128xf32, #tpu.memory_space<vmem>>, vector<1x64x128xf32>
    %221 = vector.shape_cast %220 : vector<1x64x128xf32> to vector<64x128xf32>
    %cst_257 = arith.constant dense<0.000000e+00> : vector<8x128xf32>
    %222 = tpu.matmul %0, %221, %cst_257 {dimension_numbers = #tpu.dot_dimension_numbers<[1], [0], [0], [1], [0, 0, 1, 1], [], []>} : vector<8x64xf32>, vector<64x128xf32>, vector<8x128xf32> -> vector<8x128xf32>
    %223 = arith.addf %222, %3 : vector<8x128xf32>
    %c0_258 = arith.constant 0 : index
    %c0_259 = arith.constant 0 : index
    %c0_260 = arith.constant 0 : index
    %c0_261 = arith.constant 0 : index
    %224 = vector.load %arg6[%c0_258, %c0_259, %c0_260, %c0_261] : memref<2x3x8x128xf32, #tpu.memory_space<vmem>>, vector<1x1x8x128xf32>
    %225 = vector.shape_cast %224 : vector<1x1x8x128xf32> to vector<8x128xf32>
    %226 = vector.shape_cast %223 : vector<8x128xf32> to vector<1x1x8x128xf32>
    tpu.vector_store %arg6[%c0_258, %c0_259, %c0_260, %c0_261], %226 {strides = array<i32>} : memref<2x3x8x128xf32, #tpu.memory_space<vmem>>, vector<1x1x8x128xf32>,
    %c1_262 = arith.constant 1 : index
    %c0_263 = arith.constant 0 : index
    %c0_264 = arith.constant 0 : index
    %227 = vector.load %arg7[%c1_262, %c0_263, %c0_264] : memref<6x64x128xf32, #tpu.memory_space<vmem>>, vector<1x64x128xf32>
    %228 = vector.shape_cast %227 : vector<1x64x128xf32> to vector<64x128xf32>
    %cst_265 = arith.constant dense<0.000000e+00> : vector<8x128xf32>
    %229 = tpu.matmul %0, %228, %cst_265 {dimension_numbers = #tpu.dot_dimension_numbers<[1], [0], [0], [1], [0, 0, 1, 1], [], []>} : vector<8x64xf32>, vector<64x128xf32>, vector<8x128xf32> -> vector<8x128xf32>
    %230 = arith.addf %229, %3 : vector<8x128xf32>
    %c0_266 = arith.constant 0 : index
    %c1_267 = arith.constant 1 : index
    %c0_268 = arith.constant 0 : index
    %c0_269 = arith.constant 0 : index
    %231 = vector.load %arg6[%c0_266, %c1_267, %c0_268, %c0_269] : memref<2x3x8x128xf32, #tpu.memory_space<vmem>>, vector<1x1x8x128xf32>
    %232 = vector.shape_cast %231 : vector<1x1x8x128xf32> to vector<8x128xf32>
    %233 = vector.shape_cast %230 : vector<8x128xf32> to vector<1x1x8x128xf32>
    tpu.vector_store %arg6[%c0_266, %c1_267, %c0_268, %c0_269], %233 {strides = array<i32>} : memref<2x3x8x128xf32, #tpu.memory_space<vmem>>, vector<1x1x8x128xf32>,
    %c2_270 = arith.constant 2 : index
    %c0_271 = arith.constant 0 : index
    %c0_272 = arith.constant 0 : index
    %234 = vector.load %arg7[%c2_270, %c0_271, %c0_272] : memref<6x64x128xf32, #tpu.memory_space<vmem>>, vector<1x64x128xf32>
    %235 = vector.shape_cast %234 : vector<1x64x128xf32> to vector<64x128xf32>
    %cst_273 = arith.constant dense<0.000000e+00> : vector<8x128xf32>
    %236 = tpu.matmul %0, %235, %cst_273 {dimension_numbers = #tpu.dot_dimension_numbers<[1], [0], [0], [1], [0, 0, 1, 1], [], []>} : vector<8x64xf32>, vector<64x128xf32>, vector<8x128xf32> -> vector<8x128xf32>
    %237 = arith.addf %236, %3 : vector<8x128xf32>
    %c0_274 = arith.constant 0 : index
    %c2_275 = arith.constant 2 : index
    %c0_276 = arith.constant 0 : index
    %c0_277 = arith.constant 0 : index
    %238 = vector.load %arg6[%c0_274, %c2_275, %c0_276, %c0_277] : memref<2x3x8x128xf32, #tpu.memory_space<vmem>>, vector<1x1x8x128xf32>
    %239 = vector.shape_cast %238 : vector<1x1x8x128xf32> to vector<8x128xf32>
    %240 = vector.shape_cast %237 : vector<8x128xf32> to vector<1x1x8x128xf32>
    tpu.vector_store %arg6[%c0_274, %c2_275, %c0_276, %c0_277], %240 {strides = array<i32>} : memref<2x3x8x128xf32, #tpu.memory_space<vmem>>, vector<1x1x8x128xf32>,
    %c3_278 = arith.constant 3 : index
    %c0_279 = arith.constant 0 : index
    %c0_280 = arith.constant 0 : index
    %241 = vector.load %arg7[%c3_278, %c0_279, %c0_280] : memref<6x64x128xf32, #tpu.memory_space<vmem>>, vector<1x64x128xf32>
    %242 = vector.shape_cast %241 : vector<1x64x128xf32> to vector<64x128xf32>
    %cst_281 = arith.constant dense<0.000000e+00> : vector<8x128xf32>
    %243 = tpu.matmul %0, %242, %cst_281 {dimension_numbers = #tpu.dot_dimension_numbers<[1], [0], [0], [1], [0, 0, 1, 1], [], []>} : vector<8x64xf32>, vector<64x128xf32>, vector<8x128xf32> -> vector<8x128xf32>
    %244 = arith.addf %243, %3 : vector<8x128xf32>
    %c1_282 = arith.constant 1 : index
    %c0_283 = arith.constant 0 : index
    %c0_284 = arith.constant 0 : index
    %c0_285 = arith.constant 0 : index
    %245 = vector.load %arg6[%c1_282, %c0_283, %c0_284, %c0_285] : memref<2x3x8x128xf32, #tpu.memory_space<vmem>>, vector<1x1x8x128xf32>
    %246 = vector.shape_cast %245 : vector<1x1x8x128xf32> to vector<8x128xf32>
    %247 = vector.shape_cast %244 : vector<8x128xf32> to vector<1x1x8x128xf32>
    tpu.vector_store %arg6[%c1_282, %c0_283, %c0_284, %c0_285], %247 {strides = array<i32>} : memref<2x3x8x128xf32, #tpu.memory_space<vmem>>, vector<1x1x8x128xf32>,
    %c4_286 = arith.constant 4 : index
    %c0_287 = arith.constant 0 : index
    %c0_288 = arith.constant 0 : index
    %248 = vector.load %arg7[%c4_286, %c0_287, %c0_288] : memref<6x64x128xf32, #tpu.memory_space<vmem>>, vector<1x64x128xf32>
    %249 = vector.shape_cast %248 : vector<1x64x128xf32> to vector<64x128xf32>
    %cst_289 = arith.constant dense<0.000000e+00> : vector<8x128xf32>
    %250 = tpu.matmul %0, %249, %cst_289 {dimension_numbers = #tpu.dot_dimension_numbers<[1], [0], [0], [1], [0, 0, 1, 1], [], []>} : vector<8x64xf32>, vector<64x128xf32>, vector<8x128xf32> -> vector<8x128xf32>
    %251 = arith.addf %250, %3 : vector<8x128xf32>
    %c1_290 = arith.constant 1 : index
    %c1_291 = arith.constant 1 : index
    %c0_292 = arith.constant 0 : index
    %c0_293 = arith.constant 0 : index
    %252 = vector.load %arg6[%c1_290, %c1_291, %c0_292, %c0_293] : memref<2x3x8x128xf32, #tpu.memory_space<vmem>>, vector<1x1x8x128xf32>
    %253 = vector.shape_cast %252 : vector<1x1x8x128xf32> to vector<8x128xf32>
    %254 = vector.shape_cast %251 : vector<8x128xf32> to vector<1x1x8x128xf32>
    tpu.vector_store %arg6[%c1_290, %c1_291, %c0_292, %c0_293], %254 {strides = array<i32>} : memref<2x3x8x128xf32, #tpu.memory_space<vmem>>, vector<1x1x8x128xf32>,
    %c5_294 = arith.constant 5 : index
    %c0_295 = arith.constant 0 : index
    %c0_296 = arith.constant 0 : index
    %255 = vector.load %arg7[%c5_294, %c0_295, %c0_296] : memref<6x64x128xf32, #tpu.memory_space<vmem>>, vector<1x64x128xf32>
    %256 = vector.shape_cast %255 : vector<1x64x128xf32> to vector<64x128xf32>
    %cst_297 = arith.constant dense<0.000000e+00> : vector<8x128xf32>
    %257 = tpu.matmul %0, %256, %cst_297 {dimension_numbers = #tpu.dot_dimension_numbers<[1], [0], [0], [1], [0, 0, 1, 1], [], []>} : vector<8x64xf32>, vector<64x128xf32>, vector<8x128xf32> -> vector<8x128xf32>
    %258 = arith.addf %257, %3 : vector<8x128xf32>
    %c1_298 = arith.constant 1 : index
    %c2_299 = arith.constant 2 : index
    %c0_300 = arith.constant 0 : index
    %c0_301 = arith.constant 0 : index
    %259 = vector.load %arg6[%c1_298, %c2_299, %c0_300, %c0_301] : memref<2x3x8x128xf32, #tpu.memory_space<vmem>>, vector<1x1x8x128xf32>
    %260 = vector.shape_cast %259 : vector<1x1x8x128xf32> to vector<8x128xf32>
    %261 = vector.shape_cast %258 : vector<8x128xf32> to vector<1x1x8x128xf32>
    tpu.vector_store %arg6[%c1_298, %c2_299, %c0_300, %c0_301], %261 {strides = array<i32>} : memref<2x3x8x128xf32, #tpu.memory_space<vmem>>, vector<1x1x8x128xf32>,
    return
  }
  func.func @transform_0(%arg0: i32, %arg1: i32) -> (i32, i32, i32, i32) {
    %c0_i32 = arith.constant 0 : i32
    %c0_i32_0 = arith.constant 0 : i32
    %c0_i32_1 = arith.constant 0 : i32
    return %arg0, %arg1, %c0_i32, %c0_i32_0 : i32, i32, i32, i32
  }
  func.func @transform_1(%arg0: i32, %arg1: i32) -> (i32, i32, i32, i32, i32) {
    %c0_i32 = arith.constant 0 : i32
    %c0_i32_0 = arith.constant 0 : i32
    %c0_i32_1 = arith.constant 0 : i32
    %c0_i32_2 = arith.constant 0 : i32
    return %arg0, %arg1, %c0_i32, %c0_i32_0, %c0_i32_1 : i32, i32, i32, i32, i32
  }
  func.func @transform_2(%arg0: i32, %arg1: i32) -> (i32, i32) {
    %c0_i32 = arith.constant 0 : i32
    %c0_i32_0 = arith.constant 0 : i32
    %c0_i32_1 = arith.constant 0 : i32
    return %c0_i32, %c0_i32_0 : i32, i32
  }
  func.func @transform_3(%arg0: i32, %arg1: i32) -> (i32, i32) {
    %c0_i32 = arith.constant 0 : i32
    %c0_i32_0 = arith.constant 0 : i32
    %c0_i32_1 = arith.constant 0 : i32
    return %c0_i32, %c0_i32_0 : i32, i32
  }
  func.func @transform_4(%arg0: i32, %arg1: i32) -> (i32, i32, i32, i32) {
    %c0_i32 = arith.constant 0 : i32
    %c0_i32_0 = arith.constant 0 : i32
    %c0_i32_1 = arith.constant 0 : i32
    return %arg0, %arg1, %c0_i32, %c0_i32_0 : i32, i32, i32, i32
  }
}

</mosaic_0001>

<bundles_post_ra>
// kernel: tpu_custom_call.1
= control target key start
LH: loop header
LB: loop body
LE: loop exit
PB: predicated region body
PF: predicated region fallthrough
CT: control target
= control target key end

     0   :  { %9 = vsyncpa [#allocation4], 0  ;;  %s7131_s0 = inlined_call_operand.hbm [shape: f32[2,3,8,128], index: 0, kind: input, shape index: {}]   ;;  %s7132_s1 = inlined_call_operand.hbm [shape: f32[2,3,2,128,128], index: 1, kind: input, shape index: {}]   ;;  %s7133_s2 = inlined_call_operand.vmem [shape: f32[8,64], index: 2, kind: input, shape index: {}]   ;;  %s7134_s3 = inlined_call_operand.vmem [shape: f32[8,1], index: 3, kind: input, shape index: {}]   ;;  %s7135_s4 = inlined_call_operand.hbm [shape: f32[2,3,8,128], index: 4, kind: output, shape index: {}]  }
   0x1   :  { %10 = vsyncpa [#allocation7], 0 }
   0x2   :  { %11 = vsyncpa [#allocation5], 0  ;;  %s6409_s15 = smov [#allocation3]   ;;  %s6337_s19 = scalar_lea.hbm %s7131_s0, 768 }
   0x3   :  { %s17_s16 = sshll.u32 %s6409_s15, 4  ;;  %p6338_p0 = scmp.ne.s32.totalorder %s7131_s0, %s6337_s19  ;;  %s18_s16 = int_to_ptr.vmem [resolvable:$true] %s17_s16 }
   0x4   :  { %p6341_p1 = scmp.lt.u32.totalorder %s6337_s19, %s7131_s0 }
   0x6   :  { %p6343_p2 = pnand %p6341_p1, %p6338_p0 }
   0x8   :  { %6346 = shalt.err (!%p6343_p2)
}
   0x9   :  { %s6347_s24 = scalar_lea.vmem %s18_s16, 768  ;;  %p6352_p4 = scmp.lt.s32.totalorder %s18_s16, %s18_s16 }
   0xa   :  { %p6348_p3 = scmp.ne.s32.totalorder %s18_s16, %s6347_s24  ;;  %p6353_p5 = scmp.lt.s32.totalorder %s6347_s24, %s6347_s24 }
   0xc   :  { %p6354_p6 = por %p6353_p5, %p6352_p4 }
   0xe   :  { %p6355_p7 = pnand %p6354_p6, %p6348_p3 }
  0x10   :  { %6358 = shalt.err (!%p6355_p7)
}
  0x11   :  { %s6410_s25 = smov 128   ;;  %s6411_s26 = smov 8  }
  0x12   :  { %23 = dma.hbm_to_vmem [thread:$0]  %s7131_s0, 768, %s18_s16, [#allocation4], %s6410_s25, %s6410_s25, %s6411_s26  }
  0x13   :  { %s6412_s29 = smov [#allocation6]   ;;  %s6359_s7 = scalar_lea.hbm %s7132_s1, 24576 }
  0x14   :  { %s29_s30 = sshll.u32 %s6412_s29, 4  ;;  %p6360_p8 = scmp.ne.s32.totalorder %s7132_s1, %s6359_s7  ;;  %s30_s30 = int_to_ptr.vmem [resolvable:$true] %s29_s30 }
  0x15   :  { %p6363_p9 = scmp.lt.u32.totalorder %s6359_s7, %s7132_s1 }
  0x17   :  { %p6365_p10 = pnand %p6363_p9, %p6360_p8 }
  0x19   :  { %6368 = shalt.err (!%p6365_p10)
}
  0x1a   :  { %s6369_s12 = scalar_lea.vmem %s30_s30, 24576  ;;  %p6374_p12 = scmp.lt.s32.totalorder %s30_s30, %s30_s30 }
  0x1b   :  { %p6370_p11 = scmp.ne.s32.totalorder %s30_s30, %s6369_s12  ;;  %p6375_p13 = scmp.lt.s32.totalorder %s6369_s12, %s6369_s12 }
  0x1d   :  { %p6376_p0 = por %p6375_p13, %p6374_p12 }
  0x1f   :  { %p6377_p1 = pnand %p6376_p0, %p6370_p11 }
  0x21   :  { %6380 = shalt.err (!%p6377_p1)
}
  0x22   :  { %35 = dma.hbm_to_vmem [thread:$0]  %s7132_s1, 24576, %s30_s30, [#allocation7], %s6410_s25, %s6410_s25, %s6411_s26  }
  0x23   :  { %6403 = dma.done.wait [#allocation4], 768  }
  0x24   :  { %6404 = vsyncadd [#allocation4], 4294966528 }
  0x25   :  { %6405 = dma.done.wait [#allocation7], 24576  }
  0x26   :  { %6406 = vsyncadd [#allocation7], 4294942720  ;;  %v6413_v0 = vmov 0.0|0.0   ;;  %vm6414_vm0 = vmmov 0   ;;  %v6415_v1 = vmov 0.0   ;;  %v54_v2 = vld [vmem:[#allocation6] sm:$0xff] }
  0x27   :  { %5387 = vmatprep.subr.bf16.mxu0 %v6413_v0  ;;  %4045 = vmatprep.mubr.msk.f32.mxu0 %vm6414_vm0, %v6415_v1  ;;  %v55_v3 = vld [vmem:[#allocation6 + $0x8] sm:$0xff]  ;;  %v56_v4 = vld [vmem:[#allocation6 + $0x10] sm:$0xff]  ;;  %v57_v6 = vld [vmem:[#allocation6 + $0x18] sm:$0xff]  ;;  %vm2848_vm1 = vcmask 523264  }
  0x28   :  { %5411 = vmatprep.subr.bf16.mxu1 %v6413_v0  ;;  %4080 = vmatprep.mubr.msk.f32.mxu1 %vm6414_vm0, %v6415_v1  ;;  %v5388_v5 = vpack.c.bf16 %v55_v3, %v54_v2  ;;  %v5391_v7 = vpack.c.bf16 %v57_v6, %v56_v4  ;;  %v58_v8 = vld [vmem:[#allocation6 + $0x20] sm:$0xff]  ;;  %v59_v9 = vld [vmem:[#allocation6 + $0x28] sm:$0xff]  ;;  %v60_v11 = vld [vmem:[#allocation6 + $0x30] sm:$0xff] }
  0x29   :  { %v5394_v10 = vpack.c.bf16 %v59_v9, %v58_v8  ;;  %v61_v12 = vld [vmem:[#allocation6 + $0x38] sm:$0xff]  ;;  %v62_v14 = vld [vmem:[#allocation6 + $0x40] sm:$0xff]  ;;  %v63_v15 = vld [vmem:[#allocation6 + $0x48] sm:$0xff] }
  0x2a   :  { %5389 = vmatpush3.bf16.msra.mxu0 %v5388_v5  ;;  %5413 = vmatpush3.bf16.msra.mxu1 %v5388_v5  ;;  %v5397_v13 = vpack.c.bf16 %v61_v12, %v60_v11  ;;  %v5400_v16 = vpack.c.bf16 %v63_v15, %v62_v14  ;;  %v64_v17 = vld [vmem:[#allocation6 + $0x50] sm:$0xff]  ;;  %v65_v18 = vld [vmem:[#allocation6 + $0x58] sm:$0xff]  ;;  %v66_v20 = vld [vmem:[#allocation6 + $0x60] sm:$0xff] }
  0x2b   :  { %5390 = vmatprep.subr.bf16.mxu0 %v6413_v0  ;;  %5414 = vmatprep.subr.bf16.mxu1 %v6413_v0  ;;  %v5403_v19 = vpack.c.bf16 %v65_v18, %v64_v17  ;;  %v67_v21 = vld [vmem:[#allocation6 + $0x68] sm:$0xff]  ;;  %v68_v23 = vld [vmem:[#allocation6 + $0x70] sm:$0xff]  ;;  %v69_v24 = vld [vmem:[#allocation6 + $0x78] sm:$0xff] }
  0x2c   :  { %v5406_v22 = vpack.c.bf16 %v67_v21, %v66_v20  ;;  %v5409_v25 = vpack.c.bf16 %v69_v24, %v68_v23  ;;  %v6493_v26 = vld [vmem:[#allocation3] sm:$0xff]  ;;  %v285_v27 = vld [vmem:[#allocation6 + $0x80] sm:$0xff]  ;;  %v286_v28 = vld [vmem:[#allocation6 + $0x88] sm:$0xff] }
  0x2d   :  { %v5460_v29 = vpack.c.bf16 %v286_v28, %v285_v27  ;;  %v287_v30 = vld [vmem:[#allocation6 + $0x90] sm:$0xff]  ;;  %v288_v31 = vld [vmem:[#allocation6 + $0x98] sm:$0xff]  ;;  %v289_v35 = vld [vmem:[#allocation6 + $0xa0] sm:$0xff] }
  0x2e   :  { %5392 = vmatpush3.bf16.msra.mxu0 %v5391_v7  ;;  %5416 = vmatpush3.bf16.msra.mxu1 %v5391_v7  ;;  %v5463_v34 = vpack.c.bf16 %v288_v31, %v287_v30  ;;  %v290_v36 = vld [vmem:[#allocation6 + $0xa8] sm:$0xff]  ;;  %v291_v38 = vld [vmem:[#allocation6 + $0xb0] sm:$0xff]  ;;  %v292_v39 = vld [vmem:[#allocation6 + $0xb8] sm:$0xff] }
  0x2f   :  { %5393 = vmatprep.subr.bf16.mxu0 %v6413_v0  ;;  %5417 = vmatprep.subr.bf16.mxu1 %v6413_v0  ;;  %v5466_v37 = vpack.c.bf16 %v290_v36, %v289_v35  ;;  %v5469_v40 = vpack.c.bf16 %v292_v39, %v291_v38  ;;  %v293_v41 = vld [vmem:[#allocation6 + $0xc0] sm:$0xff]  ;;  %v294_v42 = vld [vmem:[#allocation6 + $0xc8] sm:$0xff]  ;;  %v295_v44 = vld [vmem:[#allocation6 + $0xd0] sm:$0xff] }
  0x30   :  { %v5472_v43 = vpack.c.bf16 %v294_v42, %v293_v41  ;;  %v296_v45 = vld [vmem:[#allocation6 + $0xd8] sm:$0xff]  ;;  %v297_v47 = vld [vmem:[#allocation6 + $0xe0] sm:$0xff]  ;;  %v298_v48 = vld [vmem:[#allocation6 + $0xe8] sm:$0xff] }
  0x31   :  { %v5475_v46 = vpack.c.bf16 %v296_v45, %v295_v44  ;;  %v5478_v49 = vpack.c.bf16 %v298_v48, %v297_v47  ;;  %v299_v50 = vld [vmem:[#allocation6 + $0xf0] sm:$0xff]  ;;  %v300_v51 = vld [vmem:[#allocation6 + $0xf8] sm:$0xff]  ;;  %v518_v55 = vld [vmem:[#allocation6 + $0x100] sm:$0xff] }
  0x32   :  { %5395 = vmatpush3.bf16.msra.mxu0 %v5394_v10  ;;  %5419 = vmatpush3.bf16.msra.mxu1 %v5394_v10  ;;  %v5481_v52 = vpack.c.bf16 %v300_v51, %v299_v50  ;;  %v519_v56 = vld [vmem:[#allocation6 + $0x108] sm:$0xff]  ;;  %v520_v58 = vld [vmem:[#allocation6 + $0x110] sm:$0xff]  ;;  %v521_v59 = vld [vmem:[#allocation6 + $0x118] sm:$0xff] }
  0x33   :  { %5396 = vmatprep.subr.bf16.mxu0 %v6413_v0  ;;  %5420 = vmatprep.subr.bf16.mxu1 %v6413_v0  ;;  %v6544_v57 = vpack.c.bf16 %v519_v56, %v518_v55  ;;  %v5535_v62 = vpack.c.bf16 %v521_v59, %v520_v58  ;;  %v522_v63 = vld [vmem:[#allocation6 + $0x120] sm:$0xff]  ;;  %v523_v2 = vld [vmem:[#allocation6 + $0x128] sm:$0xff]  ;;  %v524_v4 = vld [vmem:[#allocation6 + $0x130] sm:$0xff] }
  0x34   :  { %v5538_v3 = vpack.c.bf16 %v523_v2, %v522_v63  ;;  %v527_v8 = vld [vmem:[#allocation6 + $0x148] sm:$0xff]  ;;  %v529_v11 = vld [vmem:[#allocation6 + $0x158] sm:$0xff]  ;;  %v752_v28 = vld [vmem:[#allocation6 + $0x190] sm:$0xff] }
  0x35   :  { %v531_v14 = vld [vmem:[#allocation6 + $0x168] sm:$0xff]  ;;  %v533_v17 = vld [vmem:[#allocation6 + $0x178] sm:$0xff]  ;;  %v983_v58 = vld [vmem:[#allocation6 + $0x200] sm:$0xff] }
  0x36   :  { %5398 = vmatpush3.bf16.msra.mxu0 %v5397_v13  ;;  %5422 = vmatpush3.bf16.msra.mxu1 %v5397_v13  ;;  %v755_v35 = vld [vmem:[#allocation6 + $0x1a8] sm:$0xff]  ;;  %v757_v38 = vld [vmem:[#allocation6 + $0x1b8] sm:$0xff] }
  0x37   :  { %5399 = vmatprep.subr.bf16.mxu0 %v6413_v0  ;;  %5423 = vmatprep.subr.bf16.mxu1 %v6413_v0  ;;  %v759_v41 = vld [vmem:[#allocation6 + $0x1c8] sm:$0xff]  ;;  %v761_v44 = vld [vmem:[#allocation6 + $0x1d8] sm:$0xff] }
  0x38   :  { %v763_v47 = vld [vmem:[#allocation6 + $0x1e8] sm:$0xff]  ;;  %v765_v50 = vld [vmem:[#allocation6 + $0x1f8] sm:$0xff] }
  0x39   :  { %v984_v59 = vld [vmem:[#allocation6 + $0x208] sm:$0xff]  ;;  %v986_v63 = vld [vmem:[#allocation6 + $0x218] sm:$0xff] }
  0x3a   :  { %5401 = vmatpush3.bf16.msra.mxu0 %v5400_v16  ;;  %5425 = vmatpush3.bf16.msra.mxu1 %v5400_v16 }
  0x3b   :  { %5402 = vmatprep.subr.bf16.mxu0 %v6413_v0  ;;  %5426 = vmatprep.subr.bf16.mxu1 %v6413_v0 }
  0x3e   :  { %5404 = vmatpush3.bf16.msra.mxu0 %v5403_v19  ;;  %5428 = vmatpush3.bf16.msra.mxu1 %v5403_v19 }
  0x3f   :  { %5405 = vmatprep.subr.bf16.mxu0 %v6413_v0  ;;  %5429 = vmatprep.subr.bf16.mxu1 %v6413_v0 }
  0x42   :  { %5407 = vmatpush3.bf16.msra.mxu0 %v5406_v22  ;;  %5431 = vmatpush3.bf16.msra.mxu1 %v5406_v22 }
  0x43   :  { %5408 = vmatprep.subr.bf16.mxu0 %v6413_v0  ;;  %5432 = vmatprep.subr.bf16.mxu1 %v6413_v0 }
  0x46   :  { %5410 = vmatpush3.bf16.msra.mxu0 %v5409_v25  ;;  %5434 = vmatpush3.bf16.msra.mxu1 %v5409_v25 }
  0x47   :  { %5459 = vmatprep.subr.bf16.mxu1 %v6413_v0  ;;  %5435 = vmatprep.subr.bf16.mxu0 %v6413_v0 }
  0x49   :  { %4046 = vmatmul.mubr.f32.vlgmr.msra.gmra.mrb[0].mxu0 %v6493_v26 }
  0x4a   :  { %5437 = vmatpush3.bf16.msra.mxu0 %v5388_v5  ;;  %4115 = vmatprep.mubr.msk.f32.mxu0 %vm6414_vm0, %v6415_v1  ;;  %v525_v5 = vld [vmem:[#allocation6 + $0x138] sm:$0xff] }
  0x4b   :  { %5438 = vmatprep.subr.bf16.mxu0 %v6413_v0  ;;  %v5541_v6 = vpack.c.bf16 %v525_v5, %v524_v4  ;;  %v987_v5 = vld [vmem:[#allocation6 + $0x220] sm:$0xff] }
  0x4e   :  { %5440 = vmatpush3.bf16.msra.mxu0 %v5391_v7  ;;  %v526_v7 = vld [vmem:[#allocation6 + $0x140] sm:$0xff] }
  0x4f   :  { %5441 = vmatprep.subr.bf16.mxu0 %v6413_v0  ;;  %v5544_v9 = vpack.c.bf16 %v527_v8, %v526_v7  ;;  %v989_v8 = vld [vmem:[#allocation6 + $0x230] sm:$0xff] }
  0x52   :  { %5443 = vmatpush3.bf16.msra.mxu0 %v5394_v10  ;;  %v528_v10 = vld [vmem:[#allocation6 + $0x150] sm:$0xff] }
  0x53   :  { %5444 = vmatprep.subr.bf16.mxu0 %v6413_v0  ;;  %v5547_v12 = vpack.c.bf16 %v529_v11, %v528_v10  ;;  %v991_v11 = vld [vmem:[#allocation6 + $0x240] sm:$0xff] }
  0x56   :  { %5446 = vmatpush3.bf16.msra.mxu0 %v5397_v13  ;;  %v530_v13 = vld [vmem:[#allocation6 + $0x160] sm:$0xff] }
  0x57   :  { %5447 = vmatprep.subr.bf16.mxu0 %v6413_v0  ;;  %v5550_v15 = vpack.c.bf16 %v531_v14, %v530_v13  ;;  %v993_v14 = vld [vmem:[#allocation6 + $0x250] sm:$0xff] }
  0x5a   :  { %5449 = vmatpush3.bf16.msra.mxu0 %v5400_v16  ;;  %v532_v16 = vld [vmem:[#allocation6 + $0x170] sm:$0xff] }
  0x5b   :  { %5450 = vmatprep.subr.bf16.mxu0 %v6413_v0  ;;  %v5553_v18 = vpack.c.bf16 %v533_v17, %v532_v16  ;;  %v995_v17 = vld [vmem:[#allocation6 + $0x260] sm:$0xff] }
  0x5e   :  { %5452 = vmatpush3.bf16.msra.mxu0 %v5403_v19  ;;  %v6560_v19 = vld [vmem:[#allocation3 + $0x8] sm:$0xff] }
  0x5f   :  { %5453 = vmatprep.subr.bf16.mxu0 %v6413_v0 }
  0x62   :  { %5455 = vmatpush3.bf16.msra.mxu0 %v5406_v22 }
  0x63   :  { %5456 = vmatprep.subr.bf16.mxu0 %v6413_v0 }
  0x66   :  { %5458 = vmatpush3.bf16.msra.mxu0 %v5409_v25  ;;  %v750_v25 = vld [vmem:[#allocation6 + $0x180] sm:$0xff] }
  0x67   :  { %5483 = vmatprep.subr.bf16.mxu0 %v6413_v0 }
 0x11c   :  { %v6508_v32 = vpop.f32.mrb[0].mxu0 }
 0x11d   :  { %v4047_v33 = vpop.f32.mrb[1].mxu0  ;;  %4081 = vmatmul.mubr.f32.vlgmr.msra.gmra.mrb[0].mxu1 %v6508_v32 }
 0x11e   :  { %5461 = vmatpush3.bf16.msra.mxu1 %v5460_v29  ;;  %4150 = vmatprep.mubr.msk.f32.mxu1 %vm6414_vm0, %v6415_v1 }
 0x11f   :  { %5462 = vmatprep.subr.bf16.mxu1 %v6413_v0 }
 0x122   :  { %5464 = vmatpush3.bf16.msra.mxu1 %v5463_v34 }
 0x123   :  { %5465 = vmatprep.subr.bf16.mxu1 %v6413_v0 }
 0x126   :  { %5467 = vmatpush3.bf16.msra.mxu1 %v5466_v37 }
 0x127   :  { %5468 = vmatprep.subr.bf16.mxu1 %v6413_v0 }
 0x12a   :  { %5470 = vmatpush3.bf16.msra.mxu1 %v5469_v40 }
 0x12b   :  { %5471 = vmatprep.subr.bf16.mxu1 %v6413_v0 }
 0x12e   :  { %5473 = vmatpush3.bf16.msra.mxu1 %v5472_v43 }
 0x12f   :  { %5474 = vmatprep.subr.bf16.mxu1 %v6413_v0 }
 0x132   :  { %5476 = vmatpush3.bf16.msra.mxu1 %v5475_v46 }
 0x133   :  { %5477 = vmatprep.subr.bf16.mxu1 %v6413_v0 }
 0x136   :  { %5479 = vmatpush3.bf16.msra.mxu1 %v5478_v49 }
 0x137   :  { %5480 = vmatprep.subr.bf16.mxu1 %v6413_v0 }
 0x13a   :  { %5482 = vmatpush3.bf16.msra.mxu1 %v5481_v52 }
 0x13b   :  { %5507 = vmatprep.subr.bf16.mxu1 %v6413_v0 }
 0x13d   :  { %4151 = vmatmul.mubr.f32.vlgmr.msra.gmra.mrb[2].mxu1 %v6493_v26  ;;  %v751_v26 = vld [vmem:[#allocation6 + $0x188] sm:$0xff] }
 0x13e   :  { %5509 = vmatpush3.bf16.msra.mxu1 %v5460_v29  ;;  %4220 = vmatprep.mubr.msk.f32.mxu1 %vm6414_vm0, %v6415_v1  ;;  %v6592_v27 = vpack.c.bf16 %v751_v26, %v750_v25  ;;  %v6654_v26 = vld [vmem:[#allocation3 + $0x10] sm:$0xff] }
 0x13f   :  { %5510 = vmatprep.subr.bf16.mxu1 %v6413_v0 }
 0x142   :  { %5512 = vmatpush3.bf16.msra.mxu1 %v5463_v34 }
 0x143   :  { %5513 = vmatprep.subr.bf16.mxu1 %v6413_v0 }
 0x146   :  { %5515 = vmatpush3.bf16.msra.mxu1 %v5466_v37 }
 0x147   :  { %5516 = vmatprep.subr.bf16.mxu1 %v6413_v0 }
 0x14a   :  { %5518 = vmatpush3.bf16.msra.mxu1 %v5469_v40 }
 0x14b   :  { %5519 = vmatprep.subr.bf16.mxu1 %v6413_v0 }
 0x14e   :  { %5521 = vmatpush3.bf16.msra.mxu1 %v5472_v43 }
 0x14f   :  { %5522 = vmatprep.subr.bf16.mxu1 %v6413_v0 }
 0x152   :  { %5524 = vmatpush3.bf16.msra.mxu1 %v5475_v46 }
 0x153   :  { %5525 = vmatprep.subr.bf16.mxu1 %v6413_v0 }
 0x156   :  { %5527 = vmatpush3.bf16.msra.mxu1 %v5478_v49 }
 0x157   :  { %5528 = vmatprep.subr.bf16.mxu1 %v6413_v0 }
 0x15a   :  { %5530 = vmatpush3.bf16.msra.mxu1 %v5481_v52 }
 0x15b   :  { %5555 = vmatprep.subr.bf16.mxu1 %v6413_v0 }
 0x1f0   :  { %v6532_v53 = vpop.f32.mrb[0].mxu1 }
 0x1f1   :  { %v4082_v54 = vpop.f32.mrb[1].mxu1  ;;  %4116 = vmatmul.mubr.f32.vlgmr.msra.gmra.mrb[2].mxu0 %v6532_v53 }
 0x1f2   :  { %5485 = vmatpush3.bf16.msra.mxu0 %v5460_v29  ;;  %4185 = vmatprep.mubr.msk.f32.mxu0 %vm6414_vm0, %v6415_v1  ;;  %v753_v29 = vld [vmem:[#allocation6 + $0x198] sm:$0xff] }
 0x1f3   :  { %5486 = vmatprep.subr.bf16.mxu0 %v6413_v0  ;;  %v5607_v33 = vpack.c.bf16 %v753_v29, %v752_v28 }
 0x1f6   :  { %5488 = vmatpush3.bf16.msra.mxu0 %v5463_v34  ;;  %v754_v34 = vld [vmem:[#allocation6 + $0x1a0] sm:$0xff] }
 0x1f7   :  { %5489 = vmatprep.subr.bf16.mxu0 %v6413_v0  ;;  %v5610_v36 = vpack.c.bf16 %v755_v35, %v754_v34  ;;  %v1215_v34 = vld [vmem:[#allocation6 + $0x280] sm:$0xff]  ;;  %v1216_v35 = vld [vmem:[#allocation6 + $0x288] sm:$0xff] }
 0x1fa   :  { %5491 = vmatpush3.bf16.msra.mxu0 %v5466_v37  ;;  %v756_v37 = vld [vmem:[#allocation6 + $0x1b0] sm:$0xff] }
 0x1fb   :  { %5492 = vmatprep.subr.bf16.mxu0 %v6413_v0  ;;  %v5613_v39 = vpack.c.bf16 %v757_v38, %v756_v37  ;;  %v1217_v37 = vld [vmem:[#allocation6 + $0x290] sm:$0xff]  ;;  %v1218_v38 = vld [vmem:[#allocation6 + $0x298] sm:$0xff] }
 0x1fe   :  { %5494 = vmatpush3.bf16.msra.mxu0 %v5469_v40  ;;  %v758_v40 = vld [vmem:[#allocation6 + $0x1c0] sm:$0xff] }
 0x1ff   :  { %5495 = vmatprep.subr.bf16.mxu0 %v6413_v0  ;;  %v5616_v42 = vpack.c.bf16 %v759_v41, %v758_v40  ;;  %v5751_v41 = vpack.c.bf16 %v1218_v38, %v1217_v37  ;;  %v1460_v37 = vld [vmem:[#allocation6 + $0x360] sm:$0xff]  ;;  %v1461_v38 = vld [vmem:[#allocation6 + $0x368] sm:$0xff] }
 0x202   :  { %5497 = vmatpush3.bf16.msra.mxu0 %v5472_v43  ;;  %v760_v43 = vld [vmem:[#allocation6 + $0x1d0] sm:$0xff] }
 0x203   :  { %5498 = vmatprep.subr.bf16.mxu0 %v6413_v0  ;;  %v5619_v45 = vpack.c.bf16 %v761_v44, %v760_v43  ;;  %v1220_v43 = vld [vmem:[#allocation6 + $0x2a8] sm:$0xff] }
 0x206   :  { %5500 = vmatpush3.bf16.msra.mxu0 %v5475_v46  ;;  %v762_v46 = vld [vmem:[#allocation6 + $0x1e0] sm:$0xff] }
 0x207   :  { %5501 = vmatprep.subr.bf16.mxu0 %v6413_v0  ;;  %v5622_v48 = vpack.c.bf16 %v763_v47, %v762_v46  ;;  %v1222_v46 = vld [vmem:[#allocation6 + $0x2b8] sm:$0xff] }
 0x20a   :  { %5503 = vmatpush3.bf16.msra.mxu0 %v5478_v49  ;;  %v764_v49 = vld [vmem:[#allocation6 + $0x1f0] sm:$0xff] }
 0x20b   :  { %5504 = vmatprep.subr.bf16.mxu0 %v6413_v0  ;;  %v5625_v51 = vpack.c.bf16 %v765_v50, %v764_v49  ;;  %v1224_v49 = vld [vmem:[#allocation6 + $0x2c8] sm:$0xff] }
 0x20e   :  { %5506 = vmatpush3.bf16.msra.mxu0 %v5481_v52 }
 0x20f   :  { %5531 = vmatprep.subr.bf16.mxu0 %v6413_v0 }
 0x210   :  { %v6547_v60 = vpop.f32.mrb[2].mxu1 }
 0x211   :  { %v4152_v61 = vpop.f32.mrb[3].mxu1  ;;  %4186 = vmatmul.mubr.f32.vlgmr.msra.gmra.mrb[4].mxu0 %v6547_v60 }
 0x212   :  { %5533 = vmatpush3.bf16.msra.mxu0 %v6544_v57  ;;  %4255 = vmatprep.mubr.msk.f32.mxu0 %vm6414_vm0, %v6415_v1  ;;  %v6638_v61 = vpack.c.bf16 %v984_v59, %v983_v58  ;;  %v1227_v58 = vld [vmem:[#allocation6 + $0x2e0] sm:$0xff]  ;;  %v1228_v59 = vld [vmem:[#allocation6 + $0x2e8] sm:$0xff] }
 0x213   :  { %5534 = vmatprep.subr.bf16.mxu0 %v6413_v0 }
 0x216   :  { %5536 = vmatpush3.bf16.msra.mxu0 %v5535_v62 }
 0x217   :  { %5537 = vmatprep.subr.bf16.mxu0 %v6413_v0 }
 0x21a   :  { %5539 = vmatpush3.bf16.msra.mxu0 %v5538_v3 }
 0x21b   :  { %5540 = vmatprep.subr.bf16.mxu0 %v6413_v0 }
 0x21e   :  { %5542 = vmatpush3.bf16.msra.mxu0 %v5541_v6 }
 0x21f   :  { %5543 = vmatprep.subr.bf16.mxu0 %v6413_v0 }
 0x222   :  { %5545 = vmatpush3.bf16.msra.mxu0 %v5544_v9 }
 0x223   :  { %5546 = vmatprep.subr.bf16.mxu0 %v6413_v0 }
 0x226   :  { %5548 = vmatpush3.bf16.msra.mxu0 %v5547_v12 }
 0x227   :  { %5549 = vmatprep.subr.bf16.mxu0 %v6413_v0 }
 0x22a   :  { %5551 = vmatpush3.bf16.msra.mxu0 %v5550_v15 }
 0x22b   :  { %5552 = vmatprep.subr.bf16.mxu0 %v6413_v0 }
 0x22e   :  { %5554 = vmatpush3.bf16.msra.mxu0 %v5553_v18 }
 0x22f   :  { %5579 = vmatprep.subr.bf16.mxu0 %v6413_v0 }
 0x231   :  { %4256 = vmatmul.mubr.f32.vlgmr.msra.gmra.mrb[6].mxu0 %v6560_v19 }
 0x232   :  { %5581 = vmatpush3.bf16.msra.mxu0 %v6544_v57  ;;  %4325 = vmatprep.mubr.msk.f32.mxu0 %vm6414_vm0, %v6415_v1 }
 0x233   :  { %5582 = vmatprep.subr.bf16.mxu0 %v6413_v0 }
 0x236   :  { %5584 = vmatpush3.bf16.msra.mxu0 %v5535_v62 }
 0x237   :  { %5585 = vmatprep.subr.bf16.mxu0 %v6413_v0 }
 0x23a   :  { %5587 = vmatpush3.bf16.msra.mxu0 %v5538_v3 }
 0x23b   :  { %5588 = vmatprep.subr.bf16.mxu0 %v6413_v0 }
 0x23e   :  { %5590 = vmatpush3.bf16.msra.mxu0 %v5541_v6 }
 0x23f   :  { %5591 = vmatprep.subr.bf16.mxu0 %v6413_v0 }
 0x242   :  { %5593 = vmatpush3.bf16.msra.mxu0 %v5544_v9 }
 0x243   :  { %5594 = vmatprep.subr.bf16.mxu0 %v6413_v0 }
 0x246   :  { %5596 = vmatpush3.bf16.msra.mxu0 %v5547_v12 }
 0x247   :  { %5597 = vmatprep.subr.bf16.mxu0 %v6413_v0 }
 0x24a   :  { %5599 = vmatpush3.bf16.msra.mxu0 %v5550_v15 }
 0x24b   :  { %5600 = vmatprep.subr.bf16.mxu0 %v6413_v0 }
 0x24e   :  { %5602 = vmatpush3.bf16.msra.mxu0 %v5553_v18 }
 0x24f   :  { %5627 = vmatprep.subr.bf16.mxu0 %v6413_v0 }
 0x2c4   :  { %v6575_v20 = vpop.f32.mrb[2].mxu0 }
 0x2c5   :  { %v6255_v21 = vpack.c.bf16 %v6575_v20, %v6532_v53  ;;  %v4117_v22 = vpop.f32.mrb[3].mxu0  ;;  %v6334_v53 = vld [vmem:[#allocation3 + $0x10] sm:$0xff] }
 0x2c6   :  { %v997_v22 = vld [vmem:[#allocation6 + $0x270] sm:$0xff] }
 0x2e4   :  { %v6579_v23 = vpop.f32.mrb[4].mxu0 }
 0x2e5   :  { %v4187_v24 = vpop.f32.mrb[5].mxu0  ;;  %4221 = vmatmul.mubr.f32.vlgmr.msra.gmra.mrb[4].mxu1 %v6579_v23 }
 0x2e6   :  { %5557 = vmatpush3.bf16.msra.mxu1 %v6544_v57  ;;  %4290 = vmatprep.mubr.msk.f32.mxu1 %vm6414_vm0, %v6415_v1  ;;  %v998_v24 = vld [vmem:[#allocation6 + $0x278] sm:$0xff] }
 0x2e7   :  { %5558 = vmatprep.subr.bf16.mxu1 %v6413_v0  ;;  %v5697_v25 = vpack.c.bf16 %v998_v24, %v997_v22  ;;  %v1454_v22 = vld [vmem:[#allocation6 + $0x330] sm:$0xff]  ;;  %v1455_v24 = vld [vmem:[#allocation6 + $0x338] sm:$0xff] }
 0x2ea   :  { %5560 = vmatpush3.bf16.msra.mxu1 %v5535_v62  ;;  %v985_v62 = vld [vmem:[#allocation6 + $0x210] sm:$0xff] }
 0x2eb   :  { %5561 = vmatprep.subr.bf16.mxu1 %v6413_v0  ;;  %v5679_v4 = vpack.c.bf16 %v986_v63, %v985_v62  ;;  %v1229_v62 = vld [vmem:[#allocation6 + $0x2f0] sm:$0xff]  ;;  %v1230_v63 = vld [vmem:[#allocation6 + $0x2f8] sm:$0xff] }
 0x2ee   :  { %5563 = vmatpush3.bf16.msra.mxu1 %v5538_v3 }
 0x2ef   :  { %5564 = vmatprep.subr.bf16.mxu1 %v6413_v0 }
 0x2f2   :  { %5566 = vmatpush3.bf16.msra.mxu1 %v5541_v6  ;;  %v988_v6 = vld [vmem:[#allocation6 + $0x228] sm:$0xff] }
 0x2f3   :  { %5567 = vmatprep.subr.bf16.mxu1 %v6413_v0  ;;  %v5682_v7 = vpack.c.bf16 %v988_v6, %v987_v5 }
 0x2f6   :  { %5569 = vmatpush3.bf16.msra.mxu1 %v5544_v9  ;;  %v990_v9 = vld [vmem:[#allocation6 + $0x238] sm:$0xff] }
 0x2f7   :  { %5570 = vmatprep.subr.bf16.mxu1 %v6413_v0  ;;  %v5685_v10 = vpack.c.bf16 %v990_v9, %v989_v8  ;;  %v1448_v9 = vld [vmem:[#allocation6 + $0x300] sm:$0xff] }
 0x2fa   :  { %5572 = vmatpush3.bf16.msra.mxu1 %v5547_v12  ;;  %v992_v12 = vld [vmem:[#allocation6 + $0x248] sm:$0xff] }
 0x2fb   :  { %5573 = vmatprep.subr.bf16.mxu1 %v6413_v0  ;;  %v5688_v13 = vpack.c.bf16 %v992_v12, %v991_v11  ;;  %v1450_v12 = vld [vmem:[#allocation6 + $0x310] sm:$0xff] }
 0x2fe   :  { %5575 = vmatpush3.bf16.msra.mxu1 %v5550_v15  ;;  %v994_v15 = vld [vmem:[#allocation6 + $0x258] sm:$0xff] }
 0x2ff   :  { %5576 = vmatprep.subr.bf16.mxu1 %v6413_v0  ;;  %v5691_v16 = vpack.c.bf16 %v994_v15, %v993_v14 }
 0x302   :  { %5578 = vmatpush3.bf16.msra.mxu1 %v5553_v18  ;;  %v996_v18 = vld [vmem:[#allocation6 + $0x268] sm:$0xff] }
 0x303   :  { %5603 = vmatprep.subr.bf16.mxu1 %v6413_v0 }
 0x304   :  { %v6595_v30 = vpop.f32.mrb[6].mxu0 }
 0x305   :  { %v4257_v31 = vpop.f32.mrb[7].mxu0  ;;  %4291 = vmatmul.mubr.f32.vlgmr.msra.gmra.mrb[6].mxu1 %v6595_v30 }
 0x306   :  { %5605 = vmatpush3.bf16.msra.mxu1 %v6592_v27  ;;  %4360 = vmatprep.mubr.msk.f32.mxu1 %vm6414_vm0, %v6415_v1 }
 0x307   :  { %5606 = vmatprep.subr.bf16.mxu1 %v6413_v0 }
 0x30a   :  { %5608 = vmatpush3.bf16.msra.mxu1 %v5607_v33 }
 0x30b   :  { %5609 = vmatprep.subr.bf16.mxu1 %v6413_v0 }
 0x30e   :  { %5611 = vmatpush3.bf16.msra.mxu1 %v5610_v36 }
 0x30f   :  { %5612 = vmatprep.subr.bf16.mxu1 %v6413_v0 }
 0x312   :  { %5614 = vmatpush3.bf16.msra.mxu1 %v5613_v39 }
 0x313   :  { %5615 = vmatprep.subr.bf16.mxu1 %v6413_v0 }
 0x316   :  { %5617 = vmatpush3.bf16.msra.mxu1 %v5616_v42 }
 0x317   :  { %5618 = vmatprep.subr.bf16.mxu1 %v6413_v0 }
 0x31a   :  { %5620 = vmatpush3.bf16.msra.mxu1 %v5619_v45 }
 0x31b   :  { %5621 = vmatprep.subr.bf16.mxu1 %v6413_v0 }
 0x31e   :  { %5623 = vmatpush3.bf16.msra.mxu1 %v5622_v48 }
 0x31f   :  { %5624 = vmatprep.subr.bf16.mxu1 %v6413_v0 }
 0x322   :  { %5626 = vmatpush3.bf16.msra.mxu1 %v5625_v51 }
 0x323   :  { %5651 = vmatprep.subr.bf16.mxu1 %v6413_v0 }
 0x325   :  { %4361 = vmatmul.mubr.f32.vlgmr.msra.gmra.mrb[8].mxu1 %v6560_v19  ;;  %v5694_v19 = vpack.c.bf16 %v996_v18, %v995_v17  ;;  %v1452_v17 = vld [vmem:[#allocation6 + $0x320] sm:$0xff]  ;;  %v1453_v18 = vld [vmem:[#allocation6 + $0x328] sm:$0xff] }
 0x326   :  { %5653 = vmatpush3.bf16.msra.mxu1 %v6592_v27  ;;  %4430 = vmatprep.mubr.msk.f32.mxu1 %vm6414_vm0, %v6415_v1 }
 0x327   :  { %5654 = vmatprep.subr.bf16.mxu1 %v6413_v0 }
 0x32a   :  { %5656 = vmatpush3.bf16.msra.mxu1 %v5607_v33 }
 0x32b   :  { %5657 = vmatprep.subr.bf16.mxu1 %v6413_v0 }
 0x32e   :  { %5659 = vmatpush3.bf16.msra.mxu1 %v5610_v36 }
 0x32f   :  { %5660 = vmatprep.subr.bf16.mxu1 %v6413_v0 }
 0x332   :  { %5662 = vmatpush3.bf16.msra.mxu1 %v5613_v39 }
 0x333   :  { %5663 = vmatprep.subr.bf16.mxu1 %v6413_v0 }
 0x336   :  { %5665 = vmatpush3.bf16.msra.mxu1 %v5616_v42 }
 0x337   :  { %5666 = vmatprep.subr.bf16.mxu1 %v6413_v0 }
 0x33a   :  { %5668 = vmatpush3.bf16.msra.mxu1 %v5619_v45 }
 0x33b   :  { %5669 = vmatprep.subr.bf16.mxu1 %v6413_v0 }
 0x33e   :  { %5671 = vmatpush3.bf16.msra.mxu1 %v5622_v48 }
 0x33f   :  { %5672 = vmatprep.subr.bf16.mxu1 %v6413_v0 }
 0x342   :  { %5674 = vmatpush3.bf16.msra.mxu1 %v5625_v51 }
 0x343   :  { %5699 = vmatprep.subr.bf16.mxu1 %v6413_v0 }
 0x3b8   :  { %v6621_v52 = vpop.f32.mrb[4].mxu1 }
 0x3b9   :  { %v6261_v54 = vpack.c.bf16 %v6621_v52, %v6579_v23  ;;  %v4222_v55 = vpop.f32.mrb[5].mxu1 }
 0x3ba   :  { %v1226_v55 = vld [vmem:[#allocation6 + $0x2d8] sm:$0xff] }
 0x3d8   :  { %v6625_v56 = vpop.f32.mrb[6].mxu1 }
 0x3d9   :  { %v4292_v57 = vpop.f32.mrb[7].mxu1  ;;  %4326 = vmatmul.mubr.f32.vlgmr.msra.gmra.mrb[8].mxu0 %v6625_v56 }
 0x3da   :  { %5629 = vmatpush3.bf16.msra.mxu0 %v6592_v27  ;;  %4395 = vmatprep.mubr.msk.f32.mxu0 %vm6414_vm0, %v6415_v1 }
 0x3db   :  { %5630 = vmatprep.subr.bf16.mxu0 %v6413_v0 }
 0x3de   :  { %5632 = vmatpush3.bf16.msra.mxu0 %v5607_v33 }
 0x3df   :  { %5633 = vmatprep.subr.bf16.mxu0 %v6413_v0 }
 0x3e2   :  { %5635 = vmatpush3.bf16.msra.mxu0 %v5610_v36  ;;  %v6686_v36 = vpack.c.bf16 %v1216_v35, %v1215_v34  ;;  %v1458_v34 = vld [vmem:[#allocation6 + $0x350] sm:$0xff]  ;;  %v1459_v35 = vld [vmem:[#allocation6 + $0x358] sm:$0xff] }
 0x3e3   :  { %5636 = vmatprep.subr.bf16.mxu0 %v6413_v0 }
 0x3e6   :  { %5638 = vmatpush3.bf16.msra.mxu0 %v5613_v39 }
 0x3e7   :  { %5639 = vmatprep.subr.bf16.mxu0 %v6413_v0 }
 0x3ea   :  { %5641 = vmatpush3.bf16.msra.mxu0 %v5616_v42  ;;  %v1219_v42 = vld [vmem:[#allocation6 + $0x2a0] sm:$0xff] }
 0x3eb   :  { %5642 = vmatprep.subr.bf16.mxu0 %v6413_v0  ;;  %v5754_v44 = vpack.c.bf16 %v1220_v43, %v1219_v42  ;;  %v1463_v42 = vld [vmem:[#allocation6 + $0x378] sm:$0xff] }
 0x3ee   :  { %5644 = vmatpush3.bf16.msra.mxu0 %v5619_v45  ;;  %v1221_v45 = vld [vmem:[#allocation6 + $0x2b0] sm:$0xff] }
 0x3ef   :  { %5645 = vmatprep.subr.bf16.mxu0 %v6413_v0  ;;  %v5757_v47 = vpack.c.bf16 %v1222_v46, %v1221_v45 }
 0x3f2   :  { %5647 = vmatpush3.bf16.msra.mxu0 %v5622_v48  ;;  %v1223_v48 = vld [vmem:[#allocation6 + $0x2c0] sm:$0xff] }
 0x3f3   :  { %5648 = vmatprep.subr.bf16.mxu0 %v6413_v0  ;;  %v5760_v50 = vpack.c.bf16 %v1224_v49, %v1223_v48 }
 0x3f6   :  { %5650 = vmatpush3.bf16.msra.mxu0 %v5625_v51  ;;  %v1225_v51 = vld [vmem:[#allocation6 + $0x2d0] sm:$0xff] }
 0x3f7   :  { %5675 = vmatprep.subr.bf16.mxu0 %v6413_v0  ;;  %v5763_v57 = vpack.c.bf16 %v1226_v55, %v1225_v51  ;;  %v1681_v51 = vld [vmem:[#allocation6 + $0x388] sm:$0xff] }
 0x3f8   :  { %v6641_v2 = vpop.f32.mrb[8].mxu1 }
 0x3f9   :  { %v4362_v3 = vpop.f32.mrb[9].mxu1  ;;  %4396 = vmatmul.mubr.f32.vlgmr.msra.gmra.mrb[10].mxu0 %v6641_v2 }
 0x3fa   :  { %5677 = vmatpush3.bf16.msra.mxu0 %v6638_v61  ;;  %4465 = vmatprep.mubr.msk.f32.mxu0 %vm6414_vm0, %v6415_v1  ;;  %v5769_v3 = vpack.c.bf16 %v1230_v63, %v1229_v62  ;;  %v1684_v63 = vld [vmem:[#allocation6 + $0x3a0] sm:$0xff] }
 0x3fb   :  { %5678 = vmatprep.subr.bf16.mxu0 %v6413_v0 }
 0x3fe   :  { %5680 = vmatpush3.bf16.msra.mxu0 %v5679_v4 }
 0x3ff   :  { %5681 = vmatprep.subr.bf16.mxu0 %v6413_v0 }
 0x402   :  { %5683 = vmatpush3.bf16.msra.mxu0 %v5682_v7 }
 0x403   :  { %5684 = vmatprep.subr.bf16.mxu0 %v6413_v0 }
 0x406   :  { %5686 = vmatpush3.bf16.msra.mxu0 %v5685_v10 }
 0x407   :  { %5687 = vmatprep.subr.bf16.mxu0 %v6413_v0 }
 0x40a   :  { %5689 = vmatpush3.bf16.msra.mxu0 %v5688_v13 }
 0x40b   :  { %5690 = vmatprep.subr.bf16.mxu0 %v6413_v0 }
 0x40e   :  { %5692 = vmatpush3.bf16.msra.mxu0 %v5691_v16 }
 0x40f   :  { %5693 = vmatprep.subr.bf16.mxu0 %v6413_v0 }
 0x412   :  { %5695 = vmatpush3.bf16.msra.mxu0 %v5694_v19 }
 0x413   :  { %5696 = vmatprep.subr.bf16.mxu0 %v6413_v0 }
 0x416   :  { %5698 = vmatpush3.bf16.msra.mxu0 %v5697_v25 }
 0x417   :  { %5723 = vmatprep.subr.bf16.mxu0 %v6413_v0 }
 0x419   :  { %4466 = vmatmul.mubr.f32.vlgmr.msra.gmra.mrb[12].mxu0 %v6654_v26 }
 0x41a   :  { %5725 = vmatpush3.bf16.msra.mxu0 %v6638_v61  ;;  %4535 = vmatprep.mubr.msk.f32.mxu0 %vm6414_vm0, %v6415_v1 }
 0x41b   :  { %5726 = vmatprep.subr.bf16.mxu0 %v6413_v0 }
 0x41e   :  { %5728 = vmatpush3.bf16.msra.mxu0 %v5679_v4 }
 0x41f   :  { %5729 = vmatprep.subr.bf16.mxu0 %v6413_v0 }
 0x422   :  { %5731 = vmatpush3.bf16.msra.mxu0 %v5682_v7 }
 0x423   :  { %5732 = vmatprep.subr.bf16.mxu0 %v6413_v0 }
 0x426   :  { %5734 = vmatpush3.bf16.msra.mxu0 %v5685_v10 }
 0x427   :  { %5735 = vmatprep.subr.bf16.mxu0 %v6413_v0 }
 0x42a   :  { %5737 = vmatpush3.bf16.msra.mxu0 %v5688_v13 }
 0x42b   :  { %5738 = vmatprep.subr.bf16.mxu0 %v6413_v0 }
 0x42e   :  { %5740 = vmatpush3.bf16.msra.mxu0 %v5691_v16 }
 0x42f   :  { %5741 = vmatprep.subr.bf16.mxu0 %v6413_v0 }
 0x432   :  { %5743 = vmatpush3.bf16.msra.mxu0 %v5694_v19 }
 0x433   :  { %5744 = vmatprep.subr.bf16.mxu0 %v6413_v0 }
 0x436   :  { %5746 = vmatpush3.bf16.msra.mxu0 %v5697_v25 }
 0x437   :  { %5771 = vmatprep.subr.bf16.mxu0 %v6413_v0 }
 0x4ac   :  { %v6669_v27 = vpop.f32.mrb[8].mxu0 }
 0x4ad   :  { %v6267_v28 = vpack.c.bf16 %v6669_v27, %v6625_v56  ;;  %v4327_v29 = vpop.f32.mrb[9].mxu0 }
 0x4ae   :  { %v1457_v29 = vld [vmem:[#allocation6 + $0x348] sm:$0xff] }
 0x4cc   :  { %v6673_v31 = vpop.f32.mrb[10].mxu0 }
 0x4cd   :  { %v4397_v33 = vpop.f32.mrb[11].mxu0  ;;  %4431 = vmatmul.mubr.f32.vlgmr.msra.gmra.mrb[10].mxu1 %v6673_v31 }
 0x4ce   :  { %5701 = vmatpush3.bf16.msra.mxu1 %v6638_v61  ;;  %4500 = vmatprep.mubr.msk.f32.mxu1 %vm6414_vm0, %v6415_v1  ;;  %v5766_v61 = vpack.c.bf16 %v1228_v59, %v1227_v58  ;;  %v1683_v58 = vld [vmem:[#allocation6 + $0x398] sm:$0xff] }
 0x4cf   :  { %5702 = vmatprep.subr.bf16.mxu1 %v6413_v0 }
 0x4d2   :  { %5704 = vmatpush3.bf16.msra.mxu1 %v5679_v4 }
 0x4d3   :  { %5705 = vmatprep.subr.bf16.mxu1 %v6413_v0 }
 0x4d6   :  { %5707 = vmatpush3.bf16.msra.mxu1 %v5682_v7 }
 0x4d7   :  { %5708 = vmatprep.subr.bf16.mxu1 %v6413_v0 }
 0x4da   :  { %5710 = vmatpush3.bf16.msra.mxu1 %v5685_v10  ;;  %v1449_v10 = vld [vmem:[#allocation6 + $0x308] sm:$0xff] }
 0x4db   :  { %5711 = vmatprep.subr.bf16.mxu1 %v6413_v0  ;;  %v6732_v11 = vpack.c.bf16 %v1449_v10, %v1448_v9  ;;  %v1687_v9 = vld [vmem:[#allocation6 + $0x3b8] sm:$0xff] }
 0x4de   :  { %5713 = vmatpush3.bf16.msra.mxu1 %v5688_v13  ;;  %v1451_v13 = vld [vmem:[#allocation6 + $0x318] sm:$0xff] }
 0x4df   :  { %5714 = vmatprep.subr.bf16.mxu1 %v6413_v0 }
 0x4e2   :  { %5716 = vmatpush3.bf16.msra.mxu1 %v5691_v16  ;;  %v5823_v16 = vpack.c.bf16 %v1451_v13, %v1450_v12  ;;  %v1689_v12 = vld [vmem:[#allocation6 + $0x3c8] sm:$0xff] }
 0x4e3   :  { %5717 = vmatprep.subr.bf16.mxu1 %v6413_v0 }
 0x4e6   :  { %5719 = vmatpush3.bf16.msra.mxu1 %v5694_v19  ;;  %v5826_v19 = vpack.c.bf16 %v1453_v18, %v1452_v17  ;;  %v1692_v18 = vld [vmem:[#allocation6 + $0x3e0] sm:$0xff] }
 0x4e7   :  { %5720 = vmatprep.subr.bf16.mxu1 %v6413_v0 }
 0x4ea   :  { %5722 = vmatpush3.bf16.msra.mxu1 %v5697_v25  ;;  %v5829_v25 = vpack.c.bf16 %v1455_v24, %v1454_v22  ;;  %v1694_v24 = vld [vmem:[#allocation6 + $0x3f0] sm:$0xff] }
 0x4eb   :  { %5747 = vmatprep.subr.bf16.mxu1 %v6413_v0 }
 0x4ec   :  { %v6689_v39 = vpop.f32.mrb[12].mxu0 }
 0x4ed   :  { %v4467_v40 = vpop.f32.mrb[13].mxu0  ;;  %4501 = vmatmul.mubr.f32.vlgmr.msra.gmra.mrb[12].mxu1 %v6689_v39  ;;  %v6276_v20 = vpack.c.bf16 %v6689_v39, %v6334_v53 }
 0x4ee   :  { %5749 = vmatpush3.bf16.msra.mxu1 %v6686_v36  ;;  %4570 = vmatprep.mubr.msk.f32.mxu1 %vm6414_vm0, %v6415_v1  ;;  %v5838_v40 = vpack.c.bf16 %v1461_v38, %v1460_v37  ;;  %v1913_v37 = vld [vmem:[#allocation6 + $0x400] sm:$0xff]  ;;  %v1914_v38 = vld [vmem:[#allocation6 + $0x408] sm:$0xff] }
 0x4ef   :  { %5750 = vmatprep.subr.bf16.mxu1 %v6413_v0 }
 0x4f2   :  { %5752 = vmatpush3.bf16.msra.mxu1 %v5751_v41 }
 0x4f3   :  { %5753 = vmatprep.subr.bf16.mxu1 %v6413_v0 }
 0x4f6   :  { %5755 = vmatpush3.bf16.msra.mxu1 %v5754_v44 }
 0x4f7   :  { %5756 = vmatprep.subr.bf16.mxu1 %v6413_v0 }
 0x4fa   :  { %5758 = vmatpush3.bf16.msra.mxu1 %v5757_v47 }
 0x4fb   :  { %5759 = vmatprep.subr.bf16.mxu1 %v6413_v0 }
 0x4fe   :  { %5761 = vmatpush3.bf16.msra.mxu1 %v5760_v50 }
 0x4ff   :  { %5762 = vmatprep.subr.bf16.mxu1 %v6413_v0 }
 0x502   :  { %5764 = vmatpush3.bf16.msra.mxu1 %v5763_v57 }
 0x503   :  { %5765 = vmatprep.subr.bf16.mxu1 %v6413_v0 }
 0x506   :  { %5767 = vmatpush3.bf16.msra.mxu1 %v5766_v61 }
 0x507   :  { %5768 = vmatprep.subr.bf16.mxu1 %v6413_v0 }
 0x50a   :  { %5770 = vmatpush3.bf16.msra.mxu1 %v5769_v3 }
 0x50b   :  { %5795 = vmatprep.subr.bf16.mxu1 %v6413_v0 }
 0x50d   :  { %4571 = vmatmul.mubr.f32.vlgmr.msra.gmra.mrb[14].mxu1 %v6654_v26  ;;  %v1456_v26 = vld [vmem:[#allocation6 + $0x340] sm:$0xff] }
 0x50e   :  { %5797 = vmatpush3.bf16.msra.mxu1 %v6686_v36  ;;  %4640 = vmatprep.mubr.msk.f32.mxu1 %vm6414_vm0, %v6415_v1  ;;  %v5832_v33 = vpack.c.bf16 %v1457_v29, %v1456_v26 }
 0x50f   :  { %5798 = vmatprep.subr.bf16.mxu1 %v6413_v0 }
 0x512   :  { %5800 = vmatpush3.bf16.msra.mxu1 %v5751_v41 }
 0x513   :  { %5801 = vmatprep.subr.bf16.mxu1 %v6413_v0 }
 0x516   :  { %5803 = vmatpush3.bf16.msra.mxu1 %v5754_v44 }
 0x517   :  { %5804 = vmatprep.subr.bf16.mxu1 %v6413_v0 }
 0x51a   :  { %5806 = vmatpush3.bf16.msra.mxu1 %v5757_v47 }
 0x51b   :  { %5807 = vmatprep.subr.bf16.mxu1 %v6413_v0 }
 0x51e   :  { %5809 = vmatpush3.bf16.msra.mxu1 %v5760_v50 }
 0x51f   :  { %5810 = vmatprep.subr.bf16.mxu1 %v6413_v0 }
 0x522   :  { %5812 = vmatpush3.bf16.msra.mxu1 %v5763_v57 }
 0x523   :  { %5813 = vmatprep.subr.bf16.mxu1 %v6413_v0 }
 0x526   :  { %5815 = vmatpush3.bf16.msra.mxu1 %v5766_v61 }
 0x527   :  { %5816 = vmatprep.subr.bf16.mxu1 %v6413_v0 }
 0x52a   :  { %5818 = vmatpush3.bf16.msra.mxu1 %v5769_v3 }
 0x52b   :  { %5843 = vmatprep.subr.bf16.mxu1 %v6413_v0 }
 0x5a0   :  { %v6715_v4 = vpop.f32.mrb[10].mxu1 }
 0x5a1   :  { %v6273_v5 = vpack.c.bf16 %v6715_v4, %v6673_v31  ;;  %v4432_v6 = vpop.f32.mrb[11].mxu1  ;;  %v6416_v4 = vmov 0  }
 0x5a2   :  { %6332 = vset.pattern.permute.xlu0 %v6416_v4 }
 0x5c0   :  { %v6719_v7 = vpop.f32.mrb[12].mxu1 }
 0x5c1   :  { %v4502_v8 = vpop.f32.mrb[13].mxu1  ;;  %4536 = vmatmul.mubr.f32.vlgmr.msra.gmra.mrb[14].mxu0 %v6719_v7 }
 0x5c2   :  { %5773 = vmatpush3.bf16.msra.mxu0 %v6686_v36  ;;  %4605 = vmatprep.mubr.msk.f32.mxu0 %vm6414_vm0, %v6415_v1  ;;  %v5835_v36 = vpack.c.bf16 %v1459_v35, %v1458_v34  ;;  %v1686_v8 = vld [vmem:[#allocation6 + $0x3b0] sm:$0xff] }
 0x5c3   :  { %5774 = vmatprep.subr.bf16.mxu0 %v6413_v0  ;;  %v5901_v10 = vpack.c.bf16 %v1687_v9, %v1686_v8  ;;  %v1925_v9 = vld [vmem:[#allocation6 + $0x460] sm:$0xff] }
 0x5c6   :  { %5776 = vmatpush3.bf16.msra.mxu0 %v5751_v41  ;;  %v1462_v41 = vld [vmem:[#allocation6 + $0x370] sm:$0xff] }
 0x5c7   :  { %5777 = vmatprep.subr.bf16.mxu0 %v6413_v0  ;;  %v5841_v43 = vpack.c.bf16 %v1463_v42, %v1462_v41  ;;  %v1915_v41 = vld [vmem:[#allocation6 + $0x410] sm:$0xff]  ;;  %v1916_v42 = vld [vmem:[#allocation6 + $0x418] sm:$0xff] }
 0x5ca   :  { %5779 = vmatpush3.bf16.msra.mxu0 %v5754_v44  ;;  %v6748_v44 = vld [vmem:[#allocation3 + $0x18] sm:$0xff] }
 0x5cb   :  { %5780 = vmatprep.subr.bf16.mxu0 %v6413_v0 }
 0x5ce   :  { %5782 = vmatpush3.bf16.msra.mxu0 %v5757_v47 }
 0x5cf   :  { %5783 = vmatprep.subr.bf16.mxu0 %v6413_v0 }
 0x5d2   :  { %5785 = vmatpush3.bf16.msra.mxu0 %v5760_v50  ;;  %v1680_v50 = vld [vmem:[#allocation6 + $0x380] sm:$0xff] }
 0x5d3   :  { %5786 = vmatprep.subr.bf16.mxu0 %v6413_v0  ;;  %v6780_v55 = vpack.c.bf16 %v1681_v51, %v1680_v50  ;;  %v1918_v50 = vld [vmem:[#allocation6 + $0x428] sm:$0xff] }
 0x5d6   :  { %5788 = vmatpush3.bf16.msra.mxu0 %v5763_v57  ;;  %v1682_v57 = vld [vmem:[#allocation6 + $0x390] sm:$0xff] }
 0x5d7   :  { %5789 = vmatprep.subr.bf16.mxu0 %v6413_v0  ;;  %v5895_v62 = vpack.c.bf16 %v1683_v58, %v1682_v57  ;;  %v1920_v57 = vld [vmem:[#allocation6 + $0x438] sm:$0xff] }
 0x5da   :  { %5791 = vmatpush3.bf16.msra.mxu0 %v5766_v61 }
 0x5db   :  { %5792 = vmatprep.subr.bf16.mxu0 %v6413_v0 }
 0x5de   :  { %5794 = vmatpush3.bf16.msra.mxu0 %v5769_v3  ;;  %v1685_v3 = vld [vmem:[#allocation6 + $0x3a8] sm:$0xff] }
 0x5df   :  { %5819 = vmatprep.subr.bf16.mxu0 %v6413_v0  ;;  %v5898_v6 = vpack.c.bf16 %v1685_v3, %v1684_v63  ;;  %v1923_v3 = vld [vmem:[#allocation6 + $0x450] sm:$0xff] }
 0x5e0   :  { %v6735_v14 = vpop.f32.mrb[14].mxu1 }
 0x5e1   :  { %v4572_v15 = vpop.f32.mrb[15].mxu1  ;;  %4606 = vmatmul.mubr.f32.vlgmr.msra.gmra.mrb[16].mxu0 %v6735_v14 }
 0x5e2   :  { %5821 = vmatpush3.bf16.msra.mxu0 %v6732_v11  ;;  %4675 = vmatprep.mubr.msk.f32.mxu0 %vm6414_vm0, %v6415_v1  ;;  %v1690_v15 = vld [vmem:[#allocation6 + $0x3d0] sm:$0xff] }
 0x5e3   :  { %5822 = vmatprep.subr.bf16.mxu0 %v6413_v0 }
 0x5e6   :  { %5824 = vmatpush3.bf16.msra.mxu0 %v5823_v16 }
 0x5e7   :  { %5825 = vmatprep.subr.bf16.mxu0 %v6413_v0 }
 0x5ea   :  { %5827 = vmatpush3.bf16.msra.mxu0 %v5826_v19 }
 0x5eb   :  { %5828 = vmatprep.subr.bf16.mxu0 %v6413_v0 }
 0x5ee   :  { %5830 = vmatpush3.bf16.msra.mxu0 %v5829_v25 }
 0x5ef   :  { %5831 = vmatprep.subr.bf16.mxu0 %v6413_v0 }
 0x5f2   :  { %5833 = vmatpush3.bf16.msra.mxu0 %v5832_v33 }
 0x5f3   :  { %5834 = vmatprep.subr.bf16.mxu0 %v6413_v0 }
 0x5f6   :  { %5836 = vmatpush3.bf16.msra.mxu0 %v5835_v36 }
 0x5f7   :  { %5837 = vmatprep.subr.bf16.mxu0 %v6413_v0 }
 0x5fa   :  { %5839 = vmatpush3.bf16.msra.mxu0 %v5838_v40 }
 0x5fb   :  { %5840 = vmatprep.subr.bf16.mxu0 %v6413_v0 }
 0x5fe   :  { %5842 = vmatpush3.bf16.msra.mxu0 %v5841_v43 }
 0x5ff   :  { %5867 = vmatprep.subr.bf16.mxu0 %v6413_v0 }
 0x601   :  { %4676 = vmatmul.mubr.f32.vlgmr.msra.gmra.mrb[18].mxu0 %v6748_v44 }
 0x602   :  { %5869 = vmatpush3.bf16.msra.mxu0 %v6732_v11  ;;  %4745 = vmatprep.mubr.msk.f32.mxu0 %vm6414_vm0, %v6415_v1 }
 0x603   :  { %5870 = vmatprep.subr.bf16.mxu0 %v6413_v0 }
 0x606   :  { %5872 = vmatpush3.bf16.msra.mxu0 %v5823_v16 }
 0x607   :  { %5873 = vmatprep.subr.bf16.mxu0 %v6413_v0 }
 0x60a   :  { %5875 = vmatpush3.bf16.msra.mxu0 %v5826_v19 }
 0x60b   :  { %5876 = vmatprep.subr.bf16.mxu0 %v6413_v0 }
 0x60e   :  { %5878 = vmatpush3.bf16.msra.mxu0 %v5829_v25 }
 0x60f   :  { %5879 = vmatprep.subr.bf16.mxu0 %v6413_v0 }
 0x612   :  { %5881 = vmatpush3.bf16.msra.mxu0 %v5832_v33 }
 0x613   :  { %5882 = vmatprep.subr.bf16.mxu0 %v6413_v0 }
 0x616   :  { %5884 = vmatpush3.bf16.msra.mxu0 %v5835_v36 }
 0x617   :  { %5885 = vmatprep.subr.bf16.mxu0 %v6413_v0 }
 0x61a   :  { %5887 = vmatpush3.bf16.msra.mxu0 %v5838_v40 }
 0x61b   :  { %5888 = vmatprep.subr.bf16.mxu0 %v6413_v0 }
 0x61e   :  { %5890 = vmatpush3.bf16.msra.mxu0 %v5841_v43 }
 0x61f   :  { %5915 = vmatprep.subr.bf16.mxu0 %v6413_v0 }
 0x694   :  { %v6763_v45 = vpop.f32.mrb[14].mxu0 }
 0x695   :  { %v6279_v46 = vpack.c.bf16 %v6763_v45, %v6719_v7  ;;  %v4537_v47 = vpop.f32.mrb[15].mxu0  ;;  %v6335_v7 = vld [vmem:[#allocation3 + $0x8] sm:$0xff] }
 0x696   :  { %v5967_v47 = vpack.c.bf16 %v1916_v42, %v1915_v41  ;;  %v2149_v42 = vld [vmem:[#allocation6 + $0x4a0] sm:$0xff] }
 0x6b4   :  { %v6767_v48 = vpop.f32.mrb[16].mxu0 }
 0x6b5   :  { %v4607_v49 = vpop.f32.mrb[17].mxu0  ;;  %4641 = vmatmul.mubr.f32.vlgmr.msra.gmra.mrb[16].mxu1 %v6767_v48 }
 0x6b6   :  { %5845 = vmatpush3.bf16.msra.mxu1 %v6732_v11  ;;  %4710 = vmatprep.mubr.msk.f32.mxu1 %vm6414_vm0, %v6415_v1  ;;  %v1688_v11 = vld [vmem:[#allocation6 + $0x3c0] sm:$0xff] }
 0x6b7   :  { %5846 = vmatprep.subr.bf16.mxu1 %v6413_v0  ;;  %v5904_v13 = vpack.c.bf16 %v1689_v12, %v1688_v11  ;;  %v1917_v49 = vld [vmem:[#allocation6 + $0x420] sm:$0xff]  ;;  %v1927_v12 = vld [vmem:[#allocation6 + $0x470] sm:$0xff] }
 0x6b8   :  { %v5970_v51 = vpack.c.bf16 %v1918_v50, %v1917_v49  ;;  %v2151_v49 = vld [vmem:[#allocation6 + $0x4b0] sm:$0xff]  ;;  %v2152_v50 = vld [vmem:[#allocation6 + $0x4b8] sm:$0xff] }
 0x6ba   :  { %5848 = vmatpush3.bf16.msra.mxu1 %v5823_v16  ;;  %v1691_v16 = vld [vmem:[#allocation6 + $0x3d8] sm:$0xff] }
 0x6bb   :  { %5849 = vmatprep.subr.bf16.mxu1 %v6413_v0  ;;  %v5907_v17 = vpack.c.bf16 %v1691_v16, %v1690_v15  ;;  %v6842_v16 = vld [vmem:[#allocation3 + $0x20] sm:$0xff] }
 0x6be   :  { %5851 = vmatpush3.bf16.msra.mxu1 %v5826_v19  ;;  %v1693_v19 = vld [vmem:[#allocation6 + $0x3e8] sm:$0xff] }
 0x6bf   :  { %5852 = vmatprep.subr.bf16.mxu1 %v6413_v0  ;;  %v5910_v22 = vpack.c.bf16 %v1693_v19, %v1692_v18 }
 0x6c2   :  { %5854 = vmatpush3.bf16.msra.mxu1 %v5829_v25  ;;  %v1695_v25 = vld [vmem:[#allocation6 + $0x3f8] sm:$0xff] }
 0x6c3   :  { %5855 = vmatprep.subr.bf16.mxu1 %v6413_v0  ;;  %v5913_v26 = vpack.c.bf16 %v1695_v25, %v1694_v24  ;;  %v2145_v25 = vld [vmem:[#allocation6 + $0x480] sm:$0xff] }
 0x6c6   :  { %5857 = vmatpush3.bf16.msra.mxu1 %v5832_v33 }
 0x6c7   :  { %5858 = vmatprep.subr.bf16.mxu1 %v6413_v0 }
 0x6ca   :  { %5860 = vmatpush3.bf16.msra.mxu1 %v5835_v36 }
 0x6cb   :  { %5861 = vmatprep.subr.bf16.mxu1 %v6413_v0 }
 0x6ce   :  { %5863 = vmatpush3.bf16.msra.mxu1 %v5838_v40  ;;  %v6826_v40 = vpack.c.bf16 %v1914_v38, %v1913_v37  ;;  %v2148_v37 = vld [vmem:[#allocation6 + $0x498] sm:$0xff] }
 0x6cf   :  { %5864 = vmatprep.subr.bf16.mxu1 %v6413_v0 }
 0x6d2   :  { %5866 = vmatpush3.bf16.msra.mxu1 %v5841_v43 }
 0x6d3   :  { %5891 = vmatprep.subr.bf16.mxu1 %v6413_v0 }
 0x6d4   :  { %v6783_v59 = vpop.f32.mrb[18].mxu0 }
 0x6d5   :  { %v4677_v61 = vpop.f32.mrb[19].mxu0  ;;  %4711 = vmatmul.mubr.f32.vlgmr.msra.gmra.mrb[18].mxu1 %v6783_v59 }
 0x6d6   :  { %5893 = vmatpush3.bf16.msra.mxu1 %v6780_v55  ;;  %4780 = vmatprep.mubr.msk.f32.mxu1 %vm6414_vm0, %v6415_v1  ;;  %v1921_v61 = vld [vmem:[#allocation6 + $0x440] sm:$0xff] }
 0x6d7   :  { %5894 = vmatprep.subr.bf16.mxu1 %v6413_v0 }
 0x6da   :  { %5896 = vmatpush3.bf16.msra.mxu1 %v5895_v62 }
 0x6db   :  { %5897 = vmatprep.subr.bf16.mxu1 %v6413_v0 }
 0x6de   :  { %5899 = vmatpush3.bf16.msra.mxu1 %v5898_v6 }
 0x6df   :  { %5900 = vmatprep.subr.bf16.mxu1 %v6413_v0 }
 0x6e2   :  { %5902 = vmatpush3.bf16.msra.mxu1 %v5901_v10 }
 0x6e3   :  { %5903 = vmatprep.subr.bf16.mxu1 %v6413_v0 }
 0x6e6   :  { %5905 = vmatpush3.bf16.msra.mxu1 %v5904_v13 }
 0x6e7   :  { %5906 = vmatprep.subr.bf16.mxu1 %v6413_v0 }
 0x6ea   :  { %5908 = vmatpush3.bf16.msra.mxu1 %v5907_v17 }
 0x6eb   :  { %5909 = vmatprep.subr.bf16.mxu1 %v6413_v0 }
 0x6ee   :  { %5911 = vmatpush3.bf16.msra.mxu1 %v5910_v22 }
 0x6ef   :  { %5912 = vmatprep.subr.bf16.mxu1 %v6413_v0 }
 0x6f2   :  { %5914 = vmatpush3.bf16.msra.mxu1 %v5913_v26 }
 0x6f3   :  { %5939 = vmatprep.subr.bf16.mxu1 %v6413_v0 }
 0x6f5   :  { %4781 = vmatmul.mubr.f32.vlgmr.msra.gmra.mrb[20].mxu1 %v6748_v44 }
 0x6f6   :  { %5941 = vmatpush3.bf16.msra.mxu1 %v6780_v55  ;;  %4850 = vmatprep.mubr.msk.f32.mxu1 %vm6414_vm0, %v6415_v1 }
 0x6f7   :  { %5942 = vmatprep.subr.bf16.mxu1 %v6413_v0 }
 0x6fa   :  { %5944 = vmatpush3.bf16.msra.mxu1 %v5895_v62 }
 0x6fb   :  { %5945 = vmatprep.subr.bf16.mxu1 %v6413_v0 }
 0x6fe   :  { %5947 = vmatpush3.bf16.msra.mxu1 %v5898_v6 }
 0x6ff   :  { %5948 = vmatprep.subr.bf16.mxu1 %v6413_v0 }
 0x702   :  { %5950 = vmatpush3.bf16.msra.mxu1 %v5901_v10 }
 0x703   :  { %5951 = vmatprep.subr.bf16.mxu1 %v6413_v0 }
 0x706   :  { %5953 = vmatpush3.bf16.msra.mxu1 %v5904_v13 }
 0x707   :  { %5954 = vmatprep.subr.bf16.mxu1 %v6413_v0 }
 0x70a   :  { %5956 = vmatpush3.bf16.msra.mxu1 %v5907_v17 }
 0x70b   :  { %5957 = vmatprep.subr.bf16.mxu1 %v6413_v0 }
 0x70e   :  { %5959 = vmatpush3.bf16.msra.mxu1 %v5910_v22 }
 0x70f   :  { %5960 = vmatprep.subr.bf16.mxu1 %v6413_v0 }
 0x712   :  { %5962 = vmatpush3.bf16.msra.mxu1 %v5913_v26 }
 0x713   :  { %5987 = vmatprep.subr.bf16.mxu1 %v6413_v0 }
 0x788   :  { %v6809_v29 = vpop.f32.mrb[16].mxu1 }
 0x789   :  { %v6285_v33 = vpack.c.bf16 %v6809_v29, %v6767_v48  ;;  %v4642_v34 = vpop.f32.mrb[17].mxu1  ;;  %v6270_v48 = vpack.c.bf16 %v6641_v2, %v6335_v7 }
 0x7a8   :  { %v6813_v35 = vpop.f32.mrb[18].mxu1 }
 0x7a9   :  { %v4712_v36 = vpop.f32.mrb[19].mxu1  ;;  %4746 = vmatmul.mubr.f32.vlgmr.msra.gmra.mrb[20].mxu0 %v6813_v35 }
 0x7aa   :  { %5917 = vmatpush3.bf16.msra.mxu0 %v6780_v55  ;;  %4815 = vmatprep.mubr.msk.f32.mxu0 %vm6414_vm0, %v6415_v1  ;;  %v1919_v55 = vld [vmem:[#allocation6 + $0x430] sm:$0xff] }
 0x7ab   :  { %5918 = vmatprep.subr.bf16.mxu0 %v6413_v0  ;;  %v5973_v58 = vpack.c.bf16 %v1920_v57, %v1919_v55  ;;  %v2147_v36 = vld [vmem:[#allocation6 + $0x490] sm:$0xff]  ;;  %v2153_v55 = vld [vmem:[#allocation6 + $0x4c0] sm:$0xff]  ;;  %v2154_v57 = vld [vmem:[#allocation6 + $0x4c8] sm:$0xff] }
 0x7ac   :  { %v6039_v41 = vpack.c.bf16 %v2148_v37, %v2147_v36  ;;  %v2380_v36 = vld [vmem:[#allocation6 + $0x510] sm:$0xff]  ;;  %v2381_v37 = vld [vmem:[#allocation6 + $0x518] sm:$0xff] }
 0x7ae   :  { %5920 = vmatpush3.bf16.msra.mxu0 %v5895_v62  ;;  %v1922_v62 = vld [vmem:[#allocation6 + $0x448] sm:$0xff] }
 0x7af   :  { %5921 = vmatprep.subr.bf16.mxu0 %v6413_v0  ;;  %v5976_v63 = vpack.c.bf16 %v1922_v62, %v1921_v61  ;;  %v2155_v61 = vld [vmem:[#allocation6 + $0x4d0] sm:$0xff]  ;;  %v2156_v62 = vld [vmem:[#allocation6 + $0x4d8] sm:$0xff] }
 0x7b2   :  { %5923 = vmatpush3.bf16.msra.mxu0 %v5898_v6  ;;  %v1924_v6 = vld [vmem:[#allocation6 + $0x458] sm:$0xff] }
 0x7b3   :  { %5924 = vmatprep.subr.bf16.mxu0 %v6413_v0  ;;  %v5979_v8 = vpack.c.bf16 %v1924_v6, %v1923_v3  ;;  %v2157_v3 = vld [vmem:[#allocation6 + $0x4e0] sm:$0xff]  ;;  %v2158_v6 = vld [vmem:[#allocation6 + $0x4e8] sm:$0xff] }
 0x7b6   :  { %5926 = vmatpush3.bf16.msra.mxu0 %v5901_v10  ;;  %v1926_v10 = vld [vmem:[#allocation6 + $0x468] sm:$0xff] }
 0x7b7   :  { %5927 = vmatprep.subr.bf16.mxu0 %v6413_v0  ;;  %v5982_v11 = vpack.c.bf16 %v1926_v10, %v1925_v9  ;;  %v2159_v9 = vld [vmem:[#allocation6 + $0x4f0] sm:$0xff]  ;;  %v2160_v10 = vld [vmem:[#allocation6 + $0x4f8] sm:$0xff] }
 0x7ba   :  { %5929 = vmatpush3.bf16.msra.mxu0 %v5904_v13  ;;  %v1928_v13 = vld [vmem:[#allocation6 + $0x478] sm:$0xff] }
 0x7bb   :  { %5930 = vmatprep.subr.bf16.mxu0 %v6413_v0  ;;  %v5985_v15 = vpack.c.bf16 %v1928_v13, %v1927_v12 }
 0x7be   :  { %5932 = vmatpush3.bf16.msra.mxu0 %v5907_v17 }
 0x7bf   :  { %5933 = vmatprep.subr.bf16.mxu0 %v6413_v0 }
 0x7c2   :  { %5935 = vmatpush3.bf16.msra.mxu0 %v5910_v22 }
 0x7c3   :  { %5936 = vmatprep.subr.bf16.mxu0 %v6413_v0 }
 0x7c6   :  { %5938 = vmatpush3.bf16.msra.mxu0 %v5913_v26  ;;  %v2146_v26 = vld [vmem:[#allocation6 + $0x488] sm:$0xff] }
 0x7c7   :  { %5963 = vmatprep.subr.bf16.mxu0 %v6413_v0  ;;  %v6874_v34 = vpack.c.bf16 %v2146_v26, %v2145_v25  ;;  %v2378_v25 = vld [vmem:[#allocation6 + $0x500] sm:$0xff]  ;;  %v2379_v26 = vld [vmem:[#allocation6 + $0x508] sm:$0xff] }
 0x7c8   :  { %v6829_v43 = vpop.f32.mrb[20].mxu1 }
 0x7c9   :  { %v4782_v44 = vpop.f32.mrb[21].mxu1  ;;  %4816 = vmatmul.mubr.f32.vlgmr.msra.gmra.mrb[22].mxu0 %v6829_v43 }
 0x7ca   :  { %5965 = vmatpush3.bf16.msra.mxu0 %v6826_v40  ;;  %4885 = vmatprep.mubr.msk.f32.mxu0 %vm6414_vm0, %v6415_v1  ;;  %v2150_v44 = vld [vmem:[#allocation6 + $0x4a8] sm:$0xff] }
 0x7cb   :  { %5966 = vmatprep.subr.bf16.mxu0 %v6413_v0 }
 0x7ce   :  { %5968 = vmatpush3.bf16.msra.mxu0 %v5967_v47 }
 0x7cf   :  { %5969 = vmatprep.subr.bf16.mxu0 %v6413_v0 }
 0x7d2   :  { %5971 = vmatpush3.bf16.msra.mxu0 %v5970_v51 }
 0x7d3   :  { %5972 = vmatprep.subr.bf16.mxu0 %v6413_v0 }
 0x7d6   :  { %5974 = vmatpush3.bf16.msra.mxu0 %v5973_v58 }
 0x7d7   :  { %5975 = vmatprep.subr.bf16.mxu0 %v6413_v0 }
 0x7da   :  { %5977 = vmatpush3.bf16.msra.mxu0 %v5976_v63 }
 0x7db   :  { %5978 = vmatprep.subr.bf16.mxu0 %v6413_v0 }
 0x7de   :  { %5980 = vmatpush3.bf16.msra.mxu0 %v5979_v8 }
 0x7df   :  { %5981 = vmatprep.subr.bf16.mxu0 %v6413_v0 }
 0x7e2   :  { %5983 = vmatpush3.bf16.msra.mxu0 %v5982_v11 }
 0x7e3   :  { %5984 = vmatprep.subr.bf16.mxu0 %v6413_v0 }
 0x7e6   :  { %5986 = vmatpush3.bf16.msra.mxu0 %v5985_v15 }
 0x7e7   :  { %6011 = vmatprep.subr.bf16.mxu0 %v6413_v0 }
 0x7e9   :  { %4886 = vmatmul.mubr.f32.vlgmr.msra.gmra.mrb[24].mxu0 %v6842_v16 }
 0x7ea   :  { %6013 = vmatpush3.bf16.msra.mxu0 %v6826_v40  ;;  %4955 = vmatprep.mubr.msk.f32.mxu0 %vm6414_vm0, %v6415_v1 }
 0x7eb   :  { %6014 = vmatprep.subr.bf16.mxu0 %v6413_v0 }
 0x7ee   :  { %6016 = vmatpush3.bf16.msra.mxu0 %v5967_v47 }
 0x7ef   :  { %6017 = vmatprep.subr.bf16.mxu0 %v6413_v0 }
 0x7f2   :  { %6019 = vmatpush3.bf16.msra.mxu0 %v5970_v51 }
 0x7f3   :  { %6020 = vmatprep.subr.bf16.mxu0 %v6413_v0 }
 0x7f6   :  { %6022 = vmatpush3.bf16.msra.mxu0 %v5973_v58 }
 0x7f7   :  { %6023 = vmatprep.subr.bf16.mxu0 %v6413_v0 }
 0x7fa   :  { %6025 = vmatpush3.bf16.msra.mxu0 %v5976_v63 }
 0x7fb   :  { %6026 = vmatprep.subr.bf16.mxu0 %v6413_v0 }
 0x7fe   :  { %6028 = vmatpush3.bf16.msra.mxu0 %v5979_v8 }
 0x7ff   :  { %6029 = vmatprep.subr.bf16.mxu0 %v6413_v0 }
 0x802   :  { %6031 = vmatpush3.bf16.msra.mxu0 %v5982_v11 }
 0x803   :  { %6032 = vmatprep.subr.bf16.mxu0 %v6413_v0 }
 0x806   :  { %6034 = vmatpush3.bf16.msra.mxu0 %v5985_v15 }
 0x807   :  { %6059 = vmatprep.subr.bf16.mxu0 %v6413_v0 }
 0x87c   :  { %v6857_v17 = vpop.f32.mrb[20].mxu0 }
 0x87d   :  { %v6291_v18 = vpack.c.bf16 %v6857_v17, %v6813_v35  ;;  %v4747_v19 = vpop.f32.mrb[21].mxu0 }
 0x89c   :  { %v6861_v22 = vpop.f32.mrb[22].mxu0 }
 0x89d   :  { %v4817_v24 = vpop.f32.mrb[23].mxu0  ;;  %4851 = vmatmul.mubr.f32.vlgmr.msra.gmra.mrb[22].mxu1 %v6861_v22 }
 0x89e   :  { %5989 = vmatpush3.bf16.msra.mxu1 %v6826_v40  ;;  %4920 = vmatprep.mubr.msk.f32.mxu1 %vm6414_vm0, %v6415_v1 }
 0x89f   :  { %5990 = vmatprep.subr.bf16.mxu1 %v6413_v0 }
 0x8a2   :  { %5992 = vmatpush3.bf16.msra.mxu1 %v5967_v47  ;;  %v6042_v47 = vpack.c.bf16 %v2150_v44, %v2149_v42  ;;  %v6111_v42 = vpack.c.bf16 %v2381_v37, %v2380_v36  ;;  %v2382_v44 = vld [vmem:[#allocation6 + $0x520] sm:$0xff] }
 0x8a3   :  { %5993 = vmatprep.subr.bf16.mxu1 %v6413_v0 }
 0x8a6   :  { %5995 = vmatpush3.bf16.msra.mxu1 %v5970_v51  ;;  %v6045_v51 = vpack.c.bf16 %v2152_v50, %v2151_v49  ;;  %v2384_v50 = vld [vmem:[#allocation6 + $0x530] sm:$0xff] }
 0x8a7   :  { %5996 = vmatprep.subr.bf16.mxu1 %v6413_v0 }
 0x8aa   :  { %5998 = vmatpush3.bf16.msra.mxu1 %v5973_v58  ;;  %v6048_v58 = vpack.c.bf16 %v2154_v57, %v2153_v55  ;;  %v2386_v57 = vld [vmem:[#allocation6 + $0x540] sm:$0xff] }
 0x8ab   :  { %5999 = vmatprep.subr.bf16.mxu1 %v6413_v0 }
 0x8ae   :  { %6001 = vmatpush3.bf16.msra.mxu1 %v5976_v63  ;;  %v6051_v63 = vpack.c.bf16 %v2156_v62, %v2155_v61  ;;  %v2388_v62 = vld [vmem:[#allocation6 + $0x550] sm:$0xff] }
 0x8af   :  { %6002 = vmatprep.subr.bf16.mxu1 %v6413_v0 }
 0x8b2   :  { %6004 = vmatpush3.bf16.msra.mxu1 %v5979_v8  ;;  %v6054_v8 = vpack.c.bf16 %v2158_v6, %v2157_v3  ;;  %v2390_v6 = vld [vmem:[#allocation6 + $0x560] sm:$0xff] }
 0x8b3   :  { %6005 = vmatprep.subr.bf16.mxu1 %v6413_v0 }
 0x8b6   :  { %6007 = vmatpush3.bf16.msra.mxu1 %v5982_v11  ;;  %v6057_v11 = vpack.c.bf16 %v2160_v10, %v2159_v9  ;;  %v2392_v10 = vld [vmem:[#allocation6 + $0x570] sm:$0xff] }
 0x8b7   :  { %6008 = vmatprep.subr.bf16.mxu1 %v6413_v0 }
 0x8ba   :  { %6010 = vmatpush3.bf16.msra.mxu1 %v5985_v15 }
 0x8bb   :  { %6035 = vmatprep.subr.bf16.mxu1 %v6413_v0 }
 0x8bc   :  { %v6877_v38 = vpop.f32.mrb[24].mxu0 }
 0x8bd   :  { %v4887_v40 = vpop.f32.mrb[25].mxu0  ;;  %4921 = vmatmul.mubr.f32.vlgmr.msra.gmra.mrb[24].mxu1 %v6877_v38 }
 0x8be   :  { %6037 = vmatpush3.bf16.msra.mxu1 %v6874_v34  ;;  %4990 = vmatprep.mubr.msk.f32.mxu1 %vm6414_vm0, %v6415_v1 }
 0x8bf   :  { %6038 = vmatprep.subr.bf16.mxu1 %v6413_v0 }
 0x8c2   :  { %6040 = vmatpush3.bf16.msra.mxu1 %v6039_v41 }
 0x8c3   :  { %6041 = vmatprep.subr.bf16.mxu1 %v6413_v0 }
 0x8c6   :  { %6043 = vmatpush3.bf16.msra.mxu1 %v6042_v47 }
 0x8c7   :  { %6044 = vmatprep.subr.bf16.mxu1 %v6413_v0 }
 0x8ca   :  { %6046 = vmatpush3.bf16.msra.mxu1 %v6045_v51 }
 0x8cb   :  { %6047 = vmatprep.subr.bf16.mxu1 %v6413_v0 }
 0x8ce   :  { %6049 = vmatpush3.bf16.msra.mxu1 %v6048_v58 }
 0x8cf   :  { %6050 = vmatprep.subr.bf16.mxu1 %v6413_v0 }
 0x8d2   :  { %6052 = vmatpush3.bf16.msra.mxu1 %v6051_v63 }
 0x8d3   :  { %6053 = vmatprep.subr.bf16.mxu1 %v6413_v0 }
 0x8d6   :  { %6055 = vmatpush3.bf16.msra.mxu1 %v6054_v8 }
 0x8d7   :  { %6056 = vmatprep.subr.bf16.mxu1 %v6413_v0 }
 0x8da   :  { %6058 = vmatpush3.bf16.msra.mxu1 %v6057_v11 }
 0x8db   :  { %6083 = vmatprep.subr.bf16.mxu1 %v6413_v0 }
 0x8dd   :  { %4991 = vmatmul.mubr.f32.vlgmr.msra.gmra.mrb[26].mxu1 %v6842_v16 }
 0x8de   :  { %6085 = vmatpush3.bf16.msra.mxu1 %v6874_v34  ;;  %5060 = vmatprep.mubr.msk.f32.mxu1 %vm6414_vm0, %v6415_v1 }
 0x8df   :  { %6086 = vmatprep.subr.bf16.mxu1 %v6413_v0 }
 0x8e2   :  { %6088 = vmatpush3.bf16.msra.mxu1 %v6039_v41 }
 0x8e3   :  { %6089 = vmatprep.subr.bf16.mxu1 %v6413_v0 }
 0x8e6   :  { %6091 = vmatpush3.bf16.msra.mxu1 %v6042_v47 }
 0x8e7   :  { %6092 = vmatprep.subr.bf16.mxu1 %v6413_v0 }
 0x8ea   :  { %6094 = vmatpush3.bf16.msra.mxu1 %v6045_v51 }
 0x8eb   :  { %6095 = vmatprep.subr.bf16.mxu1 %v6413_v0 }
 0x8ee   :  { %6097 = vmatpush3.bf16.msra.mxu1 %v6048_v58 }
 0x8ef   :  { %6098 = vmatprep.subr.bf16.mxu1 %v6413_v0 }
 0x8f2   :  { %6100 = vmatpush3.bf16.msra.mxu1 %v6051_v63 }
 0x8f3   :  { %6101 = vmatprep.subr.bf16.mxu1 %v6413_v0 }
 0x8f6   :  { %6103 = vmatpush3.bf16.msra.mxu1 %v6054_v8 }
 0x8f7   :  { %6104 = vmatprep.subr.bf16.mxu1 %v6413_v0 }
 0x8fa   :  { %6106 = vmatpush3.bf16.msra.mxu1 %v6057_v11 }
 0x8fb   :  { %6131 = vmatprep.subr.bf16.mxu1 %v6413_v0 }
 0x970   :  { %v6903_v12 = vpop.f32.mrb[22].mxu1 }
 0x971   :  { %v6297_v13 = vpack.c.bf16 %v6903_v12, %v6861_v22  ;;  %v4852_v15 = vpop.f32.mrb[23].mxu1 }
 0x990   :  { %v6907_v19 = vpop.f32.mrb[24].mxu1 }
 0x991   :  { %v4922_v24 = vpop.f32.mrb[25].mxu1  ;;  %4956 = vmatmul.mubr.f32.vlgmr.msra.gmra.mrb[26].mxu0 %v6907_v19 }
 0x992   :  { %6061 = vmatpush3.bf16.msra.mxu0 %v6874_v34  ;;  %5025 = vmatprep.mubr.msk.f32.mxu0 %vm6414_vm0, %v6415_v1  ;;  %v6920_v34 = vpack.c.bf16 %v2379_v26, %v2378_v25  ;;  %v6936_v24 = vld [vmem:[#allocation3 + $0x28] sm:$0xff] }
 0x993   :  { %6062 = vmatprep.subr.bf16.mxu0 %v6413_v0 }
 0x996   :  { %6064 = vmatpush3.bf16.msra.mxu0 %v6039_v41 }
 0x997   :  { %6065 = vmatprep.subr.bf16.mxu0 %v6413_v0 }
 0x99a   :  { %6067 = vmatpush3.bf16.msra.mxu0 %v6042_v47  ;;  %v2383_v47 = vld [vmem:[#allocation6 + $0x528] sm:$0xff] }
 0x99b   :  { %6068 = vmatprep.subr.bf16.mxu0 %v6413_v0  ;;  %v6114_v49 = vpack.c.bf16 %v2383_v47, %v2382_v44  ;;  %v2611_v44 = vld [vmem:[#allocation6 + $0x588] sm:$0xff]  ;;  %v2612_v47 = vld [vmem:[#allocation6 + $0x590] sm:$0xff] }
 0x99e   :  { %6070 = vmatpush3.bf16.msra.mxu0 %v6045_v51  ;;  %v2385_v51 = vld [vmem:[#allocation6 + $0x538] sm:$0xff] }
 0x99f   :  { %6071 = vmatprep.subr.bf16.mxu0 %v6413_v0  ;;  %v6117_v55 = vpack.c.bf16 %v2385_v51, %v2384_v50 }
 0x9a2   :  { %6073 = vmatpush3.bf16.msra.mxu0 %v6048_v58  ;;  %v2387_v58 = vld [vmem:[#allocation6 + $0x548] sm:$0xff] }
 0x9a3   :  { %6074 = vmatprep.subr.bf16.mxu0 %v6413_v0  ;;  %v6120_v61 = vpack.c.bf16 %v2387_v58, %v2386_v57  ;;  %v2614_v57 = vld [vmem:[#allocation6 + $0x5a0] sm:$0xff]  ;;  %v2615_v58 = vld [vmem:[#allocation6 + $0x5a8] sm:$0xff] }
 0x9a6   :  { %6076 = vmatpush3.bf16.msra.mxu0 %v6051_v63  ;;  %v2389_v63 = vld [vmem:[#allocation6 + $0x558] sm:$0xff] }
 0x9a7   :  { %6077 = vmatprep.subr.bf16.mxu0 %v6413_v0  ;;  %v6123_v3 = vpack.c.bf16 %v2389_v63, %v2388_v62  ;;  %v2616_v62 = vld [vmem:[#allocation6 + $0x5b0] sm:$0xff]  ;;  %v2617_v63 = vld [vmem:[#allocation6 + $0x5b8] sm:$0xff] }
 0x9aa   :  { %6079 = vmatpush3.bf16.msra.mxu0 %v6054_v8  ;;  %v2391_v8 = vld [vmem:[#allocation6 + $0x568] sm:$0xff] }
 0x9ab   :  { %6080 = vmatprep.subr.bf16.mxu0 %v6413_v0  ;;  %v6126_v9 = vpack.c.bf16 %v2391_v8, %v2390_v6  ;;  %v2618_v6 = vld [vmem:[#allocation6 + $0x5c0] sm:$0xff]  ;;  %v2619_v8 = vld [vmem:[#allocation6 + $0x5c8] sm:$0xff] }
 0x9ae   :  { %6082 = vmatpush3.bf16.msra.mxu0 %v6057_v11  ;;  %v2393_v11 = vld [vmem:[#allocation6 + $0x578] sm:$0xff] }
 0x9af   :  { %6107 = vmatprep.subr.bf16.mxu0 %v6413_v0  ;;  %v6129_v15 = vpack.c.bf16 %v2393_v11, %v2392_v10  ;;  %v2620_v10 = vld [vmem:[#allocation6 + $0x5d0] sm:$0xff]  ;;  %v2621_v11 = vld [vmem:[#allocation6 + $0x5d8] sm:$0xff] }
 0x9b0   :  { %v6923_v40 = vpop.f32.mrb[26].mxu1 }
 0x9b1   :  { %v4992_v41 = vpop.f32.mrb[27].mxu1  ;;  %5026 = vmatmul.mubr.f32.vlgmr.msra.gmra.mrb[28].mxu0 %v6923_v40  ;;  %v6306_v23 = vpack.c.bf16 %v6923_v40, %v6842_v16 }
 0x9b2   :  { %6109 = vmatpush3.bf16.msra.mxu0 %v6920_v34  ;;  %5095 = vmatprep.mubr.msk.f32.mxu0 %vm6414_vm0, %v6415_v1 }
 0x9b3   :  { %6110 = vmatprep.subr.bf16.mxu0 %v6413_v0 }
 0x9b6   :  { %6112 = vmatpush3.bf16.msra.mxu0 %v6111_v42 }
 0x9b7   :  { %6113 = vmatprep.subr.bf16.mxu0 %v6413_v0 }
 0x9ba   :  { %6115 = vmatpush3.bf16.msra.mxu0 %v6114_v49 }
 0x9bb   :  { %6116 = vmatprep.subr.bf16.mxu0 %v6413_v0 }
 0x9be   :  { %6118 = vmatpush3.bf16.msra.mxu0 %v6117_v55 }
 0x9bf   :  { %6119 = vmatprep.subr.bf16.mxu0 %v6413_v0 }
 0x9c2   :  { %6121 = vmatpush3.bf16.msra.mxu0 %v6120_v61 }
 0x9c3   :  { %6122 = vmatprep.subr.bf16.mxu0 %v6413_v0 }
 0x9c6   :  { %6124 = vmatpush3.bf16.msra.mxu0 %v6123_v3 }
 0x9c7   :  { %6125 = vmatprep.subr.bf16.mxu0 %v6413_v0 }
 0x9ca   :  { %6127 = vmatpush3.bf16.msra.mxu0 %v6126_v9 }
 0x9cb   :  { %6128 = vmatprep.subr.bf16.mxu0 %v6413_v0 }
 0x9ce   :  { %6130 = vmatpush3.bf16.msra.mxu0 %v6129_v15 }
 0x9cf   :  { %6155 = vmatprep.subr.bf16.mxu0 %v6413_v0 }
 0x9d1   :  { %5096 = vmatmul.mubr.f32.vlgmr.msra.gmra.mrb[30].mxu0 %v6936_v24 }
 0x9d2   :  { %6157 = vmatpush3.bf16.msra.mxu0 %v6920_v34  ;;  %5165 = vmatprep.mubr.msk.f32.mxu0 %vm6414_vm0, %v6415_v1 }
 0x9d3   :  { %6158 = vmatprep.subr.bf16.mxu0 %v6413_v0 }
 0x9d6   :  { %6160 = vmatpush3.bf16.msra.mxu0 %v6111_v42 }
 0x9d7   :  { %6161 = vmatprep.subr.bf16.mxu0 %v6413_v0 }
 0x9da   :  { %6163 = vmatpush3.bf16.msra.mxu0 %v6114_v49 }
 0x9db   :  { %6164 = vmatprep.subr.bf16.mxu0 %v6413_v0 }
 0x9de   :  { %6166 = vmatpush3.bf16.msra.mxu0 %v6117_v55 }
 0x9df   :  { %6167 = vmatprep.subr.bf16.mxu0 %v6413_v0 }
 0x9e2   :  { %6169 = vmatpush3.bf16.msra.mxu0 %v6120_v61 }
 0x9e3   :  { %6170 = vmatprep.subr.bf16.mxu0 %v6413_v0 }
 0x9e6   :  { %6172 = vmatpush3.bf16.msra.mxu0 %v6123_v3 }
 0x9e7   :  { %6173 = vmatprep.subr.bf16.mxu0 %v6413_v0 }
 0x9ea   :  { %6175 = vmatpush3.bf16.msra.mxu0 %v6126_v9 }
 0x9eb   :  { %6176 = vmatprep.subr.bf16.mxu0 %v6413_v0 }
 0x9ee   :  { %6178 = vmatpush3.bf16.msra.mxu0 %v6129_v15 }
 0x9ef   :  { %6203 = vmatprep.subr.bf16.mxu0 %v6413_v0 }
 0xa64   :  { %v6951_v25 = vpop.f32.mrb[26].mxu0 }
 0xa65   :  { %v6303_v26 = vpack.c.bf16 %v6951_v25, %v6907_v19  ;;  %v4957_v36 = vpop.f32.mrb[27].mxu0 }
 0xa66   :  { %v2622_v36 = vld [vmem:[#allocation6 + $0x5e0] sm:$0xff] }
 0xa84   :  { %v6955_v37 = vpop.f32.mrb[28].mxu0 }
 0xa85   :  { %v5027_v41 = vpop.f32.mrb[29].mxu0  ;;  %5061 = vmatmul.mubr.f32.vlgmr.msra.gmra.mrb[28].mxu1 %v6955_v37 }
 0xa86   :  { %6133 = vmatpush3.bf16.msra.mxu1 %v6920_v34  ;;  %5130 = vmatprep.mubr.msk.f32.mxu1 %vm6414_vm0, %v6415_v1  ;;  %v2610_v34 = vld [vmem:[#allocation6 + $0x580] sm:$0xff]  ;;  %v2623_v41 = vld [vmem:[#allocation6 + $0x5e8] sm:$0xff] }
 0xa87   :  { %6134 = vmatprep.subr.bf16.mxu1 %v6413_v0 }
 0xa8a   :  { %6136 = vmatpush3.bf16.msra.mxu1 %v6111_v42  ;;  %v6968_v42 = vpack.c.bf16 %v2611_v44, %v2610_v34  ;;  %v6198_v34 = vpack.c.bf16 %v2623_v41, %v2622_v36  ;;  %v2624_v44 = vld [vmem:[#allocation6 + $0x5f0] sm:$0xff] }
 0xa8b   :  { %6137 = vmatprep.subr.bf16.mxu1 %v6413_v0 }
 0xa8e   :  { %6139 = vmatpush3.bf16.msra.mxu1 %v6114_v49  ;;  %v2613_v49 = vld [vmem:[#allocation6 + $0x598] sm:$0xff] }
 0xa8f   :  { %6140 = vmatprep.subr.bf16.mxu1 %v6413_v0 }
 0xa92   :  { %6142 = vmatpush3.bf16.msra.mxu1 %v6117_v55  ;;  %v6183_v55 = vpack.c.bf16 %v2613_v49, %v2612_v47  ;;  %v2625_v47 = vld [vmem:[#allocation6 + $0x5f8] sm:$0xff] }
 0xa93   :  { %6143 = vmatprep.subr.bf16.mxu1 %v6413_v0  ;;  %v6201_v49 = vpack.c.bf16 %v2625_v47, %v2624_v44 }
 0xa96   :  { %6145 = vmatpush3.bf16.msra.mxu1 %v6120_v61  ;;  %v6186_v61 = vpack.c.bf16 %v2615_v58, %v2614_v57 }
 0xa97   :  { %6146 = vmatprep.subr.bf16.mxu1 %v6413_v0 }
 0xa9a   :  { %6148 = vmatpush3.bf16.msra.mxu1 %v6123_v3  ;;  %v6189_v3 = vpack.c.bf16 %v2617_v63, %v2616_v62 }
 0xa9b   :  { %6149 = vmatprep.subr.bf16.mxu1 %v6413_v0 }
 0xa9e   :  { %6151 = vmatpush3.bf16.msra.mxu1 %v6126_v9  ;;  %v6192_v9 = vpack.c.bf16 %v2619_v8, %v2618_v6 }
 0xa9f   :  { %6152 = vmatprep.subr.bf16.mxu1 %v6413_v0 }
 0xaa2   :  { %6154 = vmatpush3.bf16.msra.mxu1 %v6129_v15  ;;  %v6195_v15 = vpack.c.bf16 %v2621_v11, %v2620_v10 }
 0xaa3   :  { %6179 = vmatprep.subr.bf16.mxu1 %v6413_v0 }
 0xaa4   :  { %v6971_v50 = vpop.f32.mrb[30].mxu0 }
 0xaa5   :  { %v5097_v51 = vpop.f32.mrb[31].mxu0  ;;  %5131 = vmatmul.mubr.f32.vlgmr.msra.gmra.mrb[30].mxu1 %v6971_v50  ;;  %v6312_v2 = vpack.c.bf16 %v6971_v50, %v6936_v24 }
 0xaa6   :  { %6181 = vmatpush3.bf16.msra.mxu1 %v6968_v42  ;;  %5200 = vmatprep.mubr.msk.f32.mxu1 %vm6414_vm0, %v6415_v1 }
 0xaa7   :  { %6182 = vmatprep.subr.bf16.mxu1 %v6413_v0 }
 0xaaa   :  { %6184 = vmatpush3.bf16.msra.mxu1 %v6183_v55 }
 0xaab   :  { %6185 = vmatprep.subr.bf16.mxu1 %v6413_v0 }
 0xaae   :  { %6187 = vmatpush3.bf16.msra.mxu1 %v6186_v61 }
 0xaaf   :  { %6188 = vmatprep.subr.bf16.mxu1 %v6413_v0 }
 0xab2   :  { %6190 = vmatpush3.bf16.msra.mxu1 %v6189_v3 }
 0xab3   :  { %6191 = vmatprep.subr.bf16.mxu1 %v6413_v0 }
 0xab6   :  { %6193 = vmatpush3.bf16.msra.mxu1 %v6192_v9 }
 0xab7   :  { %6194 = vmatprep.subr.bf16.mxu1 %v6413_v0 }
 0xaba   :  { %6196 = vmatpush3.bf16.msra.mxu1 %v6195_v15 }
 0xabb   :  { %6197 = vmatprep.subr.bf16.mxu1 %v6413_v0 }
 0xabe   :  { %6199 = vmatpush3.bf16.msra.mxu1 %v6198_v34 }
 0xabf   :  { %6200 = vmatprep.subr.bf16.mxu1 %v6413_v0 }
 0xac2   :  { %6202 = vmatpush3.bf16.msra.mxu1 %v6201_v49 }
 0xac3   :  { %6227 = vmatprep.subr.bf16.mxu1 %v6413_v0 }
 0xac5   :  { %5201 = vmatmul.mubr.f32.vlgmr.msra.gmra.mrb[32].mxu1 %v6936_v24 }
 0xac6   :  { %6229 = vmatpush3.bf16.msra.mxu1 %v6968_v42  ;;  %5270 = vmatprep.mubr.msk.f32.mxu1 %vm6414_vm0, %v6415_v1 }
 0xac7   :  { %6230 = vmatprep.subr.bf16.mxu1 %v6413_v0 }
 0xaca   :  { %6232 = vmatpush3.bf16.msra.mxu1 %v6183_v55 }
 0xacb   :  { %6233 = vmatprep.subr.bf16.mxu1 %v6413_v0 }
 0xace   :  { %6235 = vmatpush3.bf16.msra.mxu1 %v6186_v61 }
 0xacf   :  { %6236 = vmatprep.subr.bf16.mxu1 %v6413_v0 }
 0xad2   :  { %6238 = vmatpush3.bf16.msra.mxu1 %v6189_v3 }
 0xad3   :  { %6239 = vmatprep.subr.bf16.mxu1 %v6413_v0 }
 0xad6   :  { %6241 = vmatpush3.bf16.msra.mxu1 %v6192_v9 }
 0xad7   :  { %6242 = vmatprep.subr.bf16.mxu1 %v6413_v0 }
 0xada   :  { %6244 = vmatpush3.bf16.msra.mxu1 %v6195_v15 }
 0xadb   :  { %6245 = vmatprep.subr.bf16.mxu1 %v6413_v0 }
 0xade   :  { %6247 = vmatpush3.bf16.msra.mxu1 %v6198_v34 }
 0xadf   :  { %6248 = vmatprep.subr.bf16.mxu1 %v6413_v0 }
 0xae2   :  { %6250 = vmatpush3.bf16.msra.mxu1 %v6201_v49 }
 0xae3   :  { %6263 = vmatprep.subr.bf16.mxu1 %v6413_v0 }
 0xb58   :  { %v6997_v51 = vpop.f32.mrb[28].mxu1 }
 0xb59   :  { %v6309_v57 = vpack.c.bf16 %v6997_v51, %v6955_v37  ;;  %v5062_v58 = vpop.f32.mrb[29].mxu1  ;;  %v6333_v37 = vld [vmem:[#allocation3] sm:$0xff] }
 0xb78   :  { %v7001_v62 = vpop.f32.mrb[30].mxu1 }
 0xb79   :  { %v5132_v63 = vpop.f32.mrb[31].mxu1  ;;  %5166 = vmatmul.mubr.f32.vlgmr.msra.gmra.mrb[32].mxu0 %v7001_v62 }
 0xb7a   :  { %6205 = vmatpush3.bf16.msra.mxu0 %v6968_v42  ;;  %5235 = vmatprep.mubr.msk.f32.mxu0 %vm6414_vm0, %v6415_v1  ;;  %v6252_v42 = vpack.c.bf16 %v6508_v32, %v6333_v37  ;;  %v7034_v32 = vld [vmem:[%s7133_s2] sm:$0xff] }
 0xb7b   :  { %6206 = vmatprep.subr.bf16.mxu0 %v6413_v0 }
 0xb7e   :  { %6208 = vmatpush3.bf16.msra.mxu0 %v6183_v55 }
 0xb7f   :  { %6209 = vmatprep.subr.bf16.mxu0 %v6413_v0 }
 0xb82   :  { %6211 = vmatpush3.bf16.msra.mxu0 %v6186_v61 }
 0xb83   :  { %6212 = vmatprep.subr.bf16.mxu0 %v6413_v0 }
 0xb86   :  { %6214 = vmatpush3.bf16.msra.mxu0 %v6189_v3  ;;  %v6258_v3 = vpack.c.bf16 %v6547_v60, %v6333_v37  ;;  %v6282_v60 = vpack.c.bf16 %v6735_v14, %v6334_v53  ;;  %v6264_v14 = vpack.c.bf16 %v6595_v30, %v6335_v7  ;;  %v6336_v30 = vld [vmem:[#allocation3 + $0x18] sm:$0xff] }
 0xb87   :  { %6215 = vmatprep.subr.bf16.mxu0 %v6413_v0  ;;  %v6288_v29 = vpack.c.bf16 %v6783_v59, %v6336_v30  ;;  %v6294_v56 = vpack.c.bf16 %v6829_v43, %v6336_v30 }
 0xb8a   :  { %6217 = vmatpush3.bf16.msra.mxu0 %v6192_v9 }
 0xb8b   :  { %6218 = vmatprep.subr.bf16.mxu0 %v6413_v0 }
 0xb8e   :  { %6220 = vmatpush3.bf16.msra.mxu0 %v6195_v15 }
 0xb8f   :  { %6221 = vmatprep.subr.bf16.mxu0 %v6413_v0 }
 0xb92   :  { %6223 = vmatpush3.bf16.msra.mxu0 %v6198_v34 }
 0xb93   :  { %6224 = vmatprep.subr.bf16.mxu0 %v6413_v0 }
 0xb96   :  { %6226 = vmatpush3.bf16.msra.mxu0 %v6201_v49 }
 0xb97   :  { %6251 = vmatprep.subr.bf16.mxu0 %v6413_v0 }
 0xb98   :  { %v7016_v55 = vpop.f32.mrb[32].mxu1 }
 0xb99   :  { %v5202_v61 = vpop.f32.mrb[33].mxu1  ;;  %5236 = vmatmul.mubr.f32.vlgmr.msra.gmra.mrb[34].mxu0 %v7016_v55  ;;  %v6318_v27 = vpack.c.bf16 %v7016_v55, %v6936_v24 }
 0xb9a   :  { %6253 = vmatpush3.bf16.msra.mxu0 %v6252_v42  ;;  %5289 = vmatprep.mubr.msk.f32.mxu0 %vm6414_vm0, %v6415_v1 }
 0xb9b   :  { %6254 = vmatprep.subr.bf16.mxu0 %v6413_v0 }
 0xb9e   :  { %6256 = vmatpush3.bf16.msra.mxu0 %v6255_v21  ;;  %v6300_v21 = vpack.c.bf16 %v6877_v38, %v6842_v16 }
 0xb9f   :  { %6257 = vmatprep.subr.bf16.mxu0 %v6413_v0 }
 0xba2   :  { %6259 = vmatpush3.bf16.msra.mxu0 %v6258_v3 }
 0xba3   :  { %6260 = vmatprep.subr.bf16.mxu0 %v6413_v0 }
 0xba6   :  { %6262 = vmatpush3.bf16.msra.mxu0 %v6261_v54 }
 0xba7   :  { %6275 = vmatprep.subr.bf16.mxu0 %v6413_v0 }
 0xba9   :  { %5290 = vmatmul.mubr.msk.f32.vlgmr.msra.gmra.mrb[36].mxu0 %vm2848_vm1, %v7034_v32 }
 0xbaa   :  { %6277 = vmatpush3.bf16.msra.mxu0 %v6276_v20  ;;  %5327 = vmatprep.mubr.msk.f32.mxu0 %vm6414_vm0, %v6415_v1 }
 0xbab   :  { %6278 = vmatprep.subr.bf16.mxu0 %v6413_v0 }
 0xbae   :  { %6280 = vmatpush3.bf16.msra.mxu0 %v6279_v46 }
 0xbaf   :  { %6281 = vmatprep.subr.bf16.mxu0 %v6413_v0 }
 0xbb2   :  { %6283 = vmatpush3.bf16.msra.mxu0 %v6282_v60 }
 0xbb3   :  { %6284 = vmatprep.subr.bf16.mxu0 %v6413_v0 }
 0xbb6   :  { %6286 = vmatpush3.bf16.msra.mxu0 %v6285_v33 }
 0xbb7   :  { %6299 = vmatprep.subr.bf16.mxu0 %v6413_v0 }
 0xbb9   :  { %5328 = vmatmul.mubr.msk.f32.vlgmr.msra.gmra.mrb[38].mxu0 %vm2848_vm1, %v7034_v32 }
 0xbba   :  { %6301 = vmatpush3.bf16.msra.mxu0 %v6300_v21  ;;  %5365 = vmatprep.mubr.msk.f32.mxu0 %vm6414_vm0, %v6415_v1 }
 0xbbb   :  { %6302 = vmatprep.subr.bf16.mxu0 %v6413_v0 }
 0xbbe   :  { %6304 = vmatpush3.bf16.msra.mxu0 %v6303_v26 }
 0xbbf   :  { %6305 = vmatprep.subr.bf16.mxu0 %v6413_v0 }
 0xbc2   :  { %6307 = vmatpush3.bf16.msra.mxu0 %v6306_v23 }
 0xbc3   :  { %6308 = vmatprep.subr.bf16.mxu0 %v6413_v0 }
 0xbc6   :  { %6310 = vmatpush3.bf16.msra.mxu0 %v6309_v57 }
 0xbc9   :  { %5366 = vmatmul.mubr.msk.f32.vlgmr.msra.gmra.mrb[40].mxu0 %vm2848_vm1, %v7034_v32 }
 0xc4c   :  { %v2604_v52 = vpop.f32.mrb[32].mxu0 }
 0xc4d   :  { %v6315_v54 = vpack.c.bf16 %v2604_v52, %v7001_v62  ;;  %v5167_v39 = vpop.f32.mrb[33].mxu0 }
 0xc6c   :  { %v2764_v45 = vpop.f32.mrb[34].mxu0 }
 0xc6d   :  { %v5237_v46 = vpop.f32.mrb[35].mxu0  ;;  %5271 = vmatmul.mubr.f32.vlgmr.msra.gmra.mrb[34].mxu1 %v2764_v45 }
 0xc6e   :  { %6265 = vmatpush3.bf16.msra.mxu1 %v6264_v14  ;;  %5308 = vmatprep.mubr.msk.f32.mxu1 %vm6414_vm0, %v6415_v1 }
 0xc6f   :  { %6266 = vmatprep.subr.bf16.mxu1 %v6413_v0 }
 0xc72   :  { %6268 = vmatpush3.bf16.msra.mxu1 %v6267_v28  ;;  %v47_v28 = vld [vmem:[%s7134_s3] sm:$0xff]  ;;  %s6417_s3 = smov [#allocation8]  }
 0xc73   :  { %6269 = vmatprep.subr.bf16.mxu1 %v6413_v0  ;;  %50 = vperm.xlu0 %6332, %v47_v28   ;;  %s3328_s16 = sshll.u32 %s6417_s3, 4  ;;  %s3329_s16 = int_to_ptr.vmem [resolvable:$true] %s3328_s16 }
 0xc74   :  { %s6381_s17 = scalar_lea.vmem %s3329_s16, 768  ;;  %p6386_p3 = scmp.lt.s32.totalorder %s3329_s16, %s3329_s16 }
 0xc75   :  { %p6382_p2 = scmp.ne.s32.totalorder %s3329_s16, %s6381_s17  ;;  %p6387_p4 = scmp.lt.s32.totalorder %s6381_s17, %s6381_s17 }
 0xc76   :  { %6271 = vmatpush3.bf16.msra.mxu1 %v6270_v48 }
 0xc77   :  { %6272 = vmatprep.subr.bf16.mxu1 %v6413_v0  ;;  %p6388_p5 = por %p6387_p4, %p6386_p3 }
 0xc79   :  { %p6389_p6 = pnand %p6388_p5, %p6382_p2 }
 0xc7a   :  { %6274 = vmatpush3.bf16.msra.mxu1 %v6273_v5 }
 0xc7b   :  { %6287 = vmatprep.subr.bf16.mxu1 %v6413_v0 }
 0xc7c   :  { %v2918_v31 = vpop.f32.mrb[36].mxu0 }
 0xc7d   :  { %5309 = vmatmul.mubr.msk.f32.vlgmr.msra.gmra.mrb[36].mxu1 %vm2848_vm1, %v7034_v32  ;;  %v5291_v5 = vpop.f32.mrb[37].mxu0 }
 0xc7e   :  { %6289 = vmatpush3.bf16.msra.mxu1 %v6288_v29  ;;  %5346 = vmatprep.mubr.msk.f32.mxu1 %vm6414_vm0, %v6415_v1 }
 0xc7f   :  { %6290 = vmatprep.subr.bf16.mxu1 %v6413_v0 }
 0xc82   :  { %6292 = vmatpush3.bf16.msra.mxu1 %v6291_v18 }
 0xc83   :  { %6293 = vmatprep.subr.bf16.mxu1 %v6413_v0 }
 0xc86   :  { %6295 = vmatpush3.bf16.msra.mxu1 %v6294_v56 }
 0xc87   :  { %6296 = vmatprep.subr.bf16.mxu1 %v6413_v0 }
 0xc8a   :  { %6298 = vmatpush3.bf16.msra.mxu1 %v6297_v13 }
 0xc8b   :  { %6311 = vmatprep.subr.bf16.mxu1 %v6413_v0 }
 0xc8d   :  { %5347 = vmatmul.mubr.msk.f32.vlgmr.msra.gmra.mrb[38].mxu1 %vm2848_vm1, %v7034_v32 }
 0xc8e   :  { %6313 = vmatpush3.bf16.msra.mxu1 %v6312_v2  ;;  %5384 = vmatprep.mubr.msk.f32.mxu1 %vm6414_vm0, %v6415_v1  ;;  %v3077_v1 = vpop.f32.mrb[38].mxu0 }
 0xc8f   :  { %6314 = vmatprep.subr.bf16.mxu1 %v6413_v0  ;;  %v5329_v59 = vpop.f32.mrb[39].mxu0 }
 0xc92   :  { %6316 = vmatpush3.bf16.msra.mxu1 %v6315_v54 }
 0xc93   :  { %6317 = vmatprep.subr.bf16.mxu1 %v6413_v0 }
 0xc96   :  { %6319 = vmatpush3.bf16.msra.mxu1 %v6318_v27 }
 0xc97   :  { %6320 = vmatprep.subr.bf16.mxu1 %v6413_v0 }
 0xc9c   :  { %v3237_v33 = vpop.f32.mrb[40].mxu0 }
 0xc9d   :  { %v5367_v35 = vpop.f32.mrb[41].mxu0 }
 0xcf2   :  { %v51_v0 = vpop.permute.xlu0 %50 }
 0xcf3   :  { %v2919_v18 = vadd.f32 %v2918_v31, %v51_v0  ;;  %v3078_v22 = vadd.f32 %v3077_v1, %v51_v0  ;;  %v3238_v38 = vadd.f32 %v3237_v33, %v51_v0 }
 0xcf5   :  { %2922 = vst [vmem:[#allocation8] sm:$0xff] %v2919_v18  ;;  %3082 = vst [vmem:[#allocation8 + $0x10] sm:$0xff] %v3078_v22 }
 0xcf6   :  { %3242 = vst [vmem:[#allocation8 + $0x20] sm:$0xff] %v3238_v38 }
 0xd40   :  { %v2835_v43 = vpop.f32.mrb[34].mxu1 }
 0xd41   :  { %v6321_v16 = vpack.c.bf16 %v2835_v43, %v2764_v45  ;;  %v5272_v17 = vpop.f32.mrb[35].mxu1 }
 0xd43   :  { %6322 = vmatpush3.bf16.msra.mxu1 %v6321_v16 }
 0xd46   :  { %5385 = vmatmul.mubr.msk.f32.vlgmr.msra.gmra.mrb[40].mxu1 %vm2848_vm1, %v7034_v32 }
 0xd50   :  { %v2997_v12 = vpop.f32.mrb[36].mxu1 }
 0xd51   :  { %v2998_v13 = vadd.f32 %v2997_v12, %v51_v0  ;;  %v5310_v19 = vpop.f32.mrb[37].mxu1 }
 0xd53   :  { %3002 = vst [vmem:[#allocation8 + $0x8] sm:$0xff] %v2998_v13 }
 0xd60   :  { %v3157_v40 = vpop.f32.mrb[38].mxu1 }
 0xd61   :  { %v3158_v24 = vadd.f32 %v3157_v40, %v51_v0  ;;  %v5348_v25 = vpop.f32.mrb[39].mxu1 }
 0xd63   :  { %3162 = vst [vmem:[#allocation8 + $0x18] sm:$0xff] %v3158_v24 }
 0xe19   :  { %v3317_v26 = vpop.f32.mrb[40].mxu1 }
 0xe1a   :  { %v3318_v50 = vadd.f32 %v3317_v26, %v51_v0  ;;  %v5386_v6 = vpop.f32.mrb[41].mxu1 }
 0xe1c   :  { %3322 = vst [vmem:[#allocation8 + $0x28] sm:$0xff] %v3318_v50 }
 0xe1d   :  { %6392 = shalt.err (!%p6389_p6)
}
 0xe1e   :  { %s6393_s20 = scalar_lea.hbm %s7135_s4, 768 }
 0xe1f   :  { %p6394_p7 = scmp.ne.s32.totalorder %s7135_s4, %s6393_s20  ;;  %p6397_p8 = scmp.lt.u32.totalorder %s6393_s20, %s7135_s4 }
 0xe21   :  { %p6399_p9 = pnand %p6397_p8, %p6394_p7 }
 0xe23   :  { %6402 = shalt.err (!%p6399_p9)
}
 0xe24   :  { %3334 = dma.vmem_to_hbm [thread:$0]  %s3329_s16, 768, %s7135_s4, [#allocation5], %s6410_s25, %s6410_s25, %s6411_s26  }
 0xe25   :  { %6407 = dma.done.wait [#allocation5], 768  }
 0xe26   :  { %6408 = vsyncadd [#allocation5], 4294966528 }
 0xe27   :  { %3338 = vsyncpa [#allocation4], 1 }
 0xe28   :  { %3339 = vsyncpa [#allocation7], 1 }
 0xe29   :  { %3340 = vsyncpa [#allocation5], 1 }

</bundles_post_ra>
